<compile_context>
chip_gen: v7x
topology: tpu7x:2x2x1
jax: 0.10.0
libtpu: 0.0.40
codegen_flags: <defaults>
</compile_context>

<pallas_src>
import jax
import jax.numpy as jnp
from jax import lax
from jax.experimental import pallas as pl
from jax.experimental.pallas import tpu as pltpu


def _round_up(n, m):
    return ((n + m - 1) // m) * m


def _make_stacked_lstm_kernel(layer_num, seq_len, b_pad, h_pad):
    """Fused kernel body for `layer_num` stacked LSTM layers (PyTorch gate order i,f,g,o)."""

    def kernel(*refs):
        x_ref = refs[0]
        w_refs = refs[1:1 + 3 * layer_num]
        out_ref = refs[1 + 3 * layer_num]          # (T*Bp, Hp)  also the inter-layer slab
        xproj_ref = refs[2 + 3 * layer_num]        # (T*Bp, 4*Hp) VMEM scratch

        layer_in = x_ref[...]                      # (T*Bp, Dp) previous-layer activations

        for l in range(layer_num):
            wih_ref = w_refs[3 * l + 0]            # (Dp, 4*Hp)
            whh_ref = w_refs[3 * l + 1]            # (Hp, 4*Hp)
            b_ref = w_refs[3 * l + 2]              # (1,  4*Hp)

            # Prologue: batched input projection for ALL timesteps, bias folded in.
            xproj_ref[...] = (
                jnp.dot(layer_in, wih_ref[...], preferred_element_type=jnp.float32)
                + b_ref[...]
            )

            h0 = jnp.zeros((b_pad, h_pad), jnp.float32)
            c0 = jnp.zeros((b_pad, h_pad), jnp.float32)

            def step(t, carry, _whh_ref=whh_ref):
                h, c = carry
                row = pl.multiple_of(t * b_pad, b_pad)
                gx = xproj_ref[pl.ds(row, b_pad), :]               # (Bp, 4*Hp)
                gates = gx + jnp.dot(h, _whh_ref[...],
                                     preferred_element_type=jnp.float32)
                # Each gate occupies its own 128-lane-aligned block (padded to h_pad).
                i_g = jax.nn.sigmoid(gates[:, 0 * h_pad:1 * h_pad])
                f_g = jax.nn.sigmoid(gates[:, 1 * h_pad:2 * h_pad])
                g_g = jnp.tanh(gates[:, 2 * h_pad:3 * h_pad])
                o_g = jax.nn.sigmoid(gates[:, 3 * h_pad:4 * h_pad])
                c_new = f_g * c + i_g * g_g
                h_new = o_g * jnp.tanh(c_new)
                out_ref[pl.ds(row, b_pad), :] = h_new
                return (h_new, c_new)

            lax.fori_loop(0, seq_len, step, (h0, c0), unroll=(seq_len <= 32))

            if l + 1 < layer_num:
                # Inter-layer activations never leave VMEM.
                layer_in = out_ref[...]

    return kernel


def basic_rnn_forward(x, params):
    """BasicRNN.forward (eval mode): (seq_len, batch, emb_dim) -> (seq_len, batch, hid_dim)."""
    seq_len, batch, emb_dim = x.shape
    hid_dim = params[0][1].shape[1]                # w_hh: (4H, H)
    layer_num = len(params)

    b_pad = _round_up(max(batch, 8), 8)            # f32 sublane alignment
    h_pad = _round_up(max(hid_dim, 128), 128)      # one full 128-lane block per gate
    d_pad = _round_up(max(emb_dim, 128), 128)

    # ---- pad & pack inputs and parameters (host/XLA side, one-time) ----
    x_p = jnp.zeros((seq_len, b_pad, d_pad), jnp.float32)
    x_p = x_p.at[:, :batch, :emb_dim].set(x.astype(jnp.float32))
    x_p = x_p.reshape(seq_len * b_pad, d_pad)

    operands = [x_p]
    in_specs = [pl.BlockSpec((seq_len * b_pad, d_pad), lambda i: (0, 0))]

    in_dim, in_dim_pad = emb_dim, d_pad
    for (w_ih, w_hh, b_ih, b_hh) in params:
        # (4H, Din) -> (Din_pad, 4*Hp), each gate padded to h_pad output lanes.
        wih_t = jnp.asarray(w_ih, jnp.float32).T.reshape(in_dim, 4, hid_dim)
        wih_p = jnp.zeros((in_dim_pad, 4, h_pad), jnp.float32)
        wih_p = wih_p.at[:in_dim, :, :hid_dim].set(wih_t).reshape(in_dim_pad, 4 * h_pad)

        whh_t = jnp.asarray(w_hh, jnp.float32).T.reshape(hid_dim, 4, hid_dim)
        whh_p = jnp.zeros((h_pad, 4, h_pad), jnp.float32)
        whh_p = whh_p.at[:hid_dim, :, :hid_dim].set(whh_t).reshape(h_pad, 4 * h_pad)

        bias = jnp.asarray(b_ih + b_hh, jnp.float32).reshape(4, hid_dim)
        bias_p = jnp.zeros((4, h_pad), jnp.float32)
        bias_p = bias_p.at[:, :hid_dim].set(bias).reshape(1, 4 * h_pad)

        operands += [wih_p, whh_p, bias_p]
        in_specs += [
            pl.BlockSpec((in_dim_pad, 4 * h_pad), lambda i: (0, 0)),
            pl.BlockSpec((h_pad, 4 * h_pad), lambda i: (0, 0)),
            pl.BlockSpec((1, 4 * h_pad), lambda i: (0, 0)),
        ]
        in_dim, in_dim_pad = hid_dim, h_pad

    kernel = _make_stacked_lstm_kernel(layer_num, seq_len, b_pad, h_pad)

    out_p = pl.pallas_call(
        kernel,
        out_shape=jax.ShapeDtypeStruct((seq_len * b_pad, h_pad), jnp.float32),
        grid=(1,),
        in_specs=in_specs,
        out_specs=pl.BlockSpec((seq_len * b_pad, h_pad), lambda i: (0, 0)),
        scratch_shapes=[pltpu.VMEM((seq_len * b_pad, 4 * h_pad), jnp.float32)],
        compiler_params=pltpu.CompilerParams(
            dimension_semantics=("arbitrary",),
        ),
    )(*operands)

    return out_p.reshape(seq_len, b_pad, h_pad)[:, :batch, :hid_dim]


def init_basic_rnn_params(key, layer_num, emb_dim, hid_dim):
    """Parameter init mimicking torch.nn.LSTM's U(-1/sqrt(H), 1/sqrt(H))."""
    params = []
    bound = 1.0 / (hid_dim ** 0.5)
    in_dim = emb_dim
    for _ in range(layer_num):
        key, k1, k2, k3, k4 = jax.random.split(key, 5)
        w_ih = jax.random.uniform(k1, (4 * hid_dim, in_dim), jnp.float32, -bound, bound)
        w_hh = jax.random.uniform(k2, (4 * hid_dim, hid_dim), jnp.float32, -bound, bound)
        b_ih = jax.random.uniform(k3, (4 * hid_dim,), jnp.float32, -bound, bound)
        b_hh = jax.random.uniform(k4, (4 * hid_dim,), jnp.float32, -bound, bound)
        params.append((w_ih, w_hh, b_ih, b_hh))
        in_dim = hid_dim
    return params


def _lstm_layer_ref(x, w_ih, w_hh, b_ih, b_hh):
    """Pure-JAX reference (lax.scan) for one LSTM layer."""
    hid_dim = w_hh.shape[1]
    batch = x.shape[1]
    bias = (b_ih + b_hh)[None, :]

    def step(carry, x_t):
        h, c = carry
        gates = x_t @ w_ih.T + h @ w_hh.T + bias
        i, f, g, o = jnp.split(gates, 4, axis=-1)
        c_new = jax.nn.sigmoid(f) * c + jax.nn.sigmoid(i) * jnp.tanh(g)
        h_new = jax.nn.sigmoid(o) * jnp.tanh(c_new)
        return (h_new, c_new), h_new

    init = (jnp.zeros((batch, hid_dim), jnp.float32),
            jnp.zeros((batch, hid_dim), jnp.float32))
    _, out = lax.scan(step, init, x)
    return out


if __name__ == "__main__":
    # BasicRNN(layer_num=2, unit='lstm', emb_dim=16, hid_dim=32, droprate=0.5), eval mode.
    layer_num, emb_dim, hid_dim = 2, 16, 32
    seq_len, batch = 8, 2

    key = jax.random.PRNGKey(0)
    key, xkey = jax.random.split(key)
    x = jax.random.normal(xkey, (seq_len, batch, emb_dim), jnp.float32)

    params = init_basic_rnn_params(key, layer_num, emb_dim, hid_dim)

    out = jax.block_until_ready(basic_rnn_forward(x, params))
    assert out.shape == (seq_len, batch, hid_dim)

    # Cross-check against the pure-JAX reference.
    ref = x
    for (w_ih, w_hh, b_ih, b_hh) in params:
        ref = _lstm_layer_ref(ref, w_ih, w_hh, b_ih, b_hh)
    if not jnp.allclose(out, ref, atol=1e-4, rtol=1e-4):
        max_err = float(jnp.max(jnp.abs(out - ref)))
        raise AssertionError(f"Pallas LSTM output does not match reference, max_err={max_err}")

    print("KERNEL_OK")
</pallas_src>

<mosaic_0001>
module attributes {stable_mosaic.version = 11 : i64} {
  func.func @kernel(%arg0: i32, %arg1: memref<64x128xf32, #tpu.memory_space<vmem>>, %arg2: memref<128x512xf32, #tpu.memory_space<vmem>>, %arg3: memref<128x512xf32, #tpu.memory_space<vmem>>, %arg4: memref<1x512xf32, #tpu.memory_space<vmem>>, %arg5: memref<128x512xf32, #tpu.memory_space<vmem>>, %arg6: memref<128x512xf32, #tpu.memory_space<vmem>>, %arg7: memref<1x512xf32, #tpu.memory_space<vmem>>, %arg8: memref<64x128xf32, #tpu.memory_space<vmem>>, %arg9: memref<64x512xf32, #tpu.memory_space<vmem>>) attributes {dimension_semantics = [#tpu.dimension_semantics<arbitrary>], iteration_bounds = array<i64: 1>, scalar_prefetch = 0 : i64, scratch_operands = 1 : i64, tpu.core_type = #tpu.core_type<tc>, window_params = [{pipeline_mode = #tpu.pipeline_mode<synchronous>, transform_indices = @transform_0, window_bounds = array<i64: 64, 128>}, {pipeline_mode = #tpu.pipeline_mode<synchronous>, transform_indices = @transform_1, window_bounds = array<i64: 128, 512>}, {pipeline_mode = #tpu.pipeline_mode<synchronous>, transform_indices = @transform_2, window_bounds = array<i64: 128, 512>}, {pipeline_mode = #tpu.pipeline_mode<synchronous>, transform_indices = @transform_3, window_bounds = array<i64: 1, 512>}, {pipeline_mode = #tpu.pipeline_mode<synchronous>, transform_indices = @transform_4, window_bounds = array<i64: 128, 512>}, {pipeline_mode = #tpu.pipeline_mode<synchronous>, transform_indices = @transform_5, window_bounds = array<i64: 128, 512>}, {pipeline_mode = #tpu.pipeline_mode<synchronous>, transform_indices = @transform_6, window_bounds = array<i64: 1, 512>}, {pipeline_mode = #tpu.pipeline_mode<synchronous>, transform_indices = @transform_7, window_bounds = array<i64: 64, 128>}]} {
    %c0 = arith.constant 0 : index
    %c0_0 = arith.constant 0 : index
    %0 = vector.load %arg1[%c0, %c0_0] : memref<64x128xf32, #tpu.memory_space<vmem>>, vector<64x128xf32>
    %c0_1 = arith.constant 0 : index
    %c0_2 = arith.constant 0 : index
    %1 = vector.load %arg2[%c0_1, %c0_2] : memref<128x512xf32, #tpu.memory_space<vmem>>, vector<128x512xf32>
    %cst = arith.constant dense<0.000000e+00> : vector<64x512xf32>
    %2 = tpu.matmul %0, %1, %cst {dimension_numbers = #tpu.dot_dimension_numbers<[1], [0], [0], [1], [0, 0, 1, 1], [], []>} : vector<64x128xf32>, vector<128x512xf32>, vector<64x512xf32> -> vector<64x512xf32>
    %c0_3 = arith.constant 0 : index
    %c0_4 = arith.constant 0 : index
    %3 = vector.load %arg4[%c0_3, %c0_4] : memref<1x512xf32, #tpu.memory_space<vmem>>, vector<1x512xf32>
    %4 = vector.broadcast %3 : vector<1x512xf32> to vector<64x512xf32>
    %5 = arith.addf %2, %4 : vector<64x512xf32>
    %c0_5 = arith.constant 0 : index
    %c0_6 = arith.constant 0 : index
    %6 = vector.load %arg9[%c0_5, %c0_6] : memref<64x512xf32, #tpu.memory_space<vmem>>, vector<64x512xf32>
    tpu.vector_store %arg9[%c0_5, %c0_6], %5 {strides = array<i32>} : memref<64x512xf32, #tpu.memory_space<vmem>>, vector<64x512xf32>,
    %cst_7 = arith.constant 0.000000e+00 : f32
    %7 = vector.broadcast %cst_7 : f32 to vector<8x128xf32>
    %cst_8 = arith.constant 0.000000e+00 : f32
    %8 = vector.broadcast %cst_8 : f32 to vector<8x128xf32>
    %c0_i32 = arith.constant 0 : i32
    %c8_i32 = arith.constant 8 : i32
    %9 = arith.muli %c0_i32, %c8_i32 : i32
    %10 = tpu.assume_multiple %9, 8 : i32
    %11 = arith.index_cast %10 : i32 to index
    %c0_9 = arith.constant 0 : index
    %12 = vector.load %arg9[%11, %c0_9] : memref<64x512xf32, #tpu.memory_space<vmem>>, vector<8x512xf32>
    %c0_10 = arith.constant 0 : index
    %c0_11 = arith.constant 0 : index
    %13 = vector.load %arg3[%c0_10, %c0_11] : memref<128x512xf32, #tpu.memory_space<vmem>>, vector<128x512xf32>
    %cst_12 = arith.constant dense<0.000000e+00> : vector<8x512xf32>
    %14 = tpu.matmul %7, %13, %cst_12 {dimension_numbers = #tpu.dot_dimension_numbers<[1], [0], [0], [1], [0, 0, 1, 1], [], []>} : vector<8x128xf32>, vector<128x512xf32>, vector<8x512xf32> -> vector<8x512xf32>
    %15 = arith.addf %12, %14 : vector<8x512xf32>
    %16 = vector.extract_strided_slice %15 {offsets = [0, 0], sizes = [8, 128], strides = [1, 1]} : vector<8x512xf32> to vector<8x128xf32>
    %17 = arith.negf %16 : vector<8x128xf32>
    %18 = math.exp %17 : vector<8x128xf32>
    %cst_13 = arith.constant 1.000000e+00 : f32
    %19 = vector.broadcast %cst_13 : f32 to vector<8x128xf32>
    %20 = arith.addf %19, %18 : vector<8x128xf32>
    %21 = arith.divf %19, %20 : vector<8x128xf32>
    %22 = vector.extract_strided_slice %15 {offsets = [0, 128], sizes = [8, 128], strides = [1, 1]} : vector<8x512xf32> to vector<8x128xf32>
    %23 = arith.negf %22 : vector<8x128xf32>
    %24 = math.exp %23 : vector<8x128xf32>
    %cst_14 = arith.constant 1.000000e+00 : f32
    %25 = vector.broadcast %cst_14 : f32 to vector<8x128xf32>
    %26 = arith.addf %25, %24 : vector<8x128xf32>
    %27 = arith.divf %25, %26 : vector<8x128xf32>
    %28 = vector.extract_strided_slice %15 {offsets = [0, 256], sizes = [8, 128], strides = [1, 1]} : vector<8x512xf32> to vector<8x128xf32>
    %29 = math.tanh %28 : vector<8x128xf32>
    %30 = vector.extract_strided_slice %15 {offsets = [0, 384], sizes = [8, 128], strides = [1, 1]} : vector<8x512xf32> to vector<8x128xf32>
    %31 = arith.negf %30 : vector<8x128xf32>
    %32 = math.exp %31 : vector<8x128xf32>
    %cst_15 = arith.constant 1.000000e+00 : f32
    %33 = vector.broadcast %cst_15 : f32 to vector<8x128xf32>
    %34 = arith.addf %33, %32 : vector<8x128xf32>
    %35 = arith.divf %33, %34 : vector<8x128xf32>
    %36 = arith.mulf %27, %8 : vector<8x128xf32>
    %37 = arith.mulf %21, %29 : vector<8x128xf32>
    %38 = arith.addf %36, %37 : vector<8x128xf32>
    %39 = math.tanh %38 : vector<8x128xf32>
    %40 = arith.mulf %35, %39 : vector<8x128xf32>
    %41 = arith.index_cast %10 : i32 to index
    %c0_16 = arith.constant 0 : index
    %42 = vector.load %arg8[%41, %c0_16] : memref<64x128xf32, #tpu.memory_space<vmem>>, vector<8x128xf32>
    tpu.vector_store %arg8[%41, %c0_16], %40 {strides = array<i32>} : memref<64x128xf32, #tpu.memory_space<vmem>>, vector<8x128xf32>,
    %c1_i32 = arith.constant 1 : i32
    %c8_i32_17 = arith.constant 8 : i32
    %43 = arith.muli %c1_i32, %c8_i32_17 : i32
    %44 = tpu.assume_multiple %43, 8 : i32
    %45 = arith.index_cast %44 : i32 to index
    %c0_18 = arith.constant 0 : index
    %46 = vector.load %arg9[%45, %c0_18] : memref<64x512xf32, #tpu.memory_space<vmem>>, vector<8x512xf32>
    %c0_19 = arith.constant 0 : index
    %c0_20 = arith.constant 0 : index
    %47 = vector.load %arg3[%c0_19, %c0_20] : memref<128x512xf32, #tpu.memory_space<vmem>>, vector<128x512xf32>
    %cst_21 = arith.constant dense<0.000000e+00> : vector<8x512xf32>
    %48 = tpu.matmul %40, %47, %cst_21 {dimension_numbers = #tpu.dot_dimension_numbers<[1], [0], [0], [1], [0, 0, 1, 1], [], []>} : vector<8x128xf32>, vector<128x512xf32>, vector<8x512xf32> -> vector<8x512xf32>
    %49 = arith.addf %46, %48 : vector<8x512xf32>
    %50 = vector.extract_strided_slice %49 {offsets = [0, 0], sizes = [8, 128], strides = [1, 1]} : vector<8x512xf32> to vector<8x128xf32>
    %51 = arith.negf %50 : vector<8x128xf32>
    %52 = math.exp %51 : vector<8x128xf32>
    %cst_22 = arith.constant 1.000000e+00 : f32
    %53 = vector.broadcast %cst_22 : f32 to vector<8x128xf32>
    %54 = arith.addf %53, %52 : vector<8x128xf32>
    %55 = arith.divf %53, %54 : vector<8x128xf32>
    %56 = vector.extract_strided_slice %49 {offsets = [0, 128], sizes = [8, 128], strides = [1, 1]} : vector<8x512xf32> to vector<8x128xf32>
    %57 = arith.negf %56 : vector<8x128xf32>
    %58 = math.exp %57 : vector<8x128xf32>
    %cst_23 = arith.constant 1.000000e+00 : f32
    %59 = vector.broadcast %cst_23 : f32 to vector<8x128xf32>
    %60 = arith.addf %59, %58 : vector<8x128xf32>
    %61 = arith.divf %59, %60 : vector<8x128xf32>
    %62 = vector.extract_strided_slice %49 {offsets = [0, 256], sizes = [8, 128], strides = [1, 1]} : vector<8x512xf32> to vector<8x128xf32>
    %63 = math.tanh %62 : vector<8x128xf32>
    %64 = vector.extract_strided_slice %49 {offsets = [0, 384], sizes = [8, 128], strides = [1, 1]} : vector<8x512xf32> to vector<8x128xf32>
    %65 = arith.negf %64 : vector<8x128xf32>
    %66 = math.exp %65 : vector<8x128xf32>
    %cst_24 = arith.constant 1.000000e+00 : f32
    %67 = vector.broadcast %cst_24 : f32 to vector<8x128xf32>
    %68 = arith.addf %67, %66 : vector<8x128xf32>
    %69 = arith.divf %67, %68 : vector<8x128xf32>
    %70 = arith.mulf %61, %38 : vector<8x128xf32>
    %71 = arith.mulf %55, %63 : vector<8x128xf32>
    %72 = arith.addf %70, %71 : vector<8x128xf32>
    %73 = math.tanh %72 : vector<8x128xf32>
    %74 = arith.mulf %69, %73 : vector<8x128xf32>
    %75 = arith.index_cast %44 : i32 to index
    %c0_25 = arith.constant 0 : index
    %76 = vector.load %arg8[%75, %c0_25] : memref<64x128xf32, #tpu.memory_space<vmem>>, vector<8x128xf32>
    tpu.vector_store %arg8[%75, %c0_25], %74 {strides = array<i32>} : memref<64x128xf32, #tpu.memory_space<vmem>>, vector<8x128xf32>,
    %c2_i32 = arith.constant 2 : i32
    %c8_i32_26 = arith.constant 8 : i32
    %77 = arith.muli %c2_i32, %c8_i32_26 : i32
    %78 = tpu.assume_multiple %77, 8 : i32
    %79 = arith.index_cast %78 : i32 to index
    %c0_27 = arith.constant 0 : index
    %80 = vector.load %arg9[%79, %c0_27] : memref<64x512xf32, #tpu.memory_space<vmem>>, vector<8x512xf32>
    %c0_28 = arith.constant 0 : index
    %c0_29 = arith.constant 0 : index
    %81 = vector.load %arg3[%c0_28, %c0_29] : memref<128x512xf32, #tpu.memory_space<vmem>>, vector<128x512xf32>
    %cst_30 = arith.constant dense<0.000000e+00> : vector<8x512xf32>
    %82 = tpu.matmul %74, %81, %cst_30 {dimension_numbers = #tpu.dot_dimension_numbers<[1], [0], [0], [1], [0, 0, 1, 1], [], []>} : vector<8x128xf32>, vector<128x512xf32>, vector<8x512xf32> -> vector<8x512xf32>
    %83 = arith.addf %80, %82 : vector<8x512xf32>
    %84 = vector.extract_strided_slice %83 {offsets = [0, 0], sizes = [8, 128], strides = [1, 1]} : vector<8x512xf32> to vector<8x128xf32>
    %85 = arith.negf %84 : vector<8x128xf32>
    %86 = math.exp %85 : vector<8x128xf32>
    %cst_31 = arith.constant 1.000000e+00 : f32
    %87 = vector.broadcast %cst_31 : f32 to vector<8x128xf32>
    %88 = arith.addf %87, %86 : vector<8x128xf32>
    %89 = arith.divf %87, %88 : vector<8x128xf32>
    %90 = vector.extract_strided_slice %83 {offsets = [0, 128], sizes = [8, 128], strides = [1, 1]} : vector<8x512xf32> to vector<8x128xf32>
    %91 = arith.negf %90 : vector<8x128xf32>
    %92 = math.exp %91 : vector<8x128xf32>
    %cst_32 = arith.constant 1.000000e+00 : f32
    %93 = vector.broadcast %cst_32 : f32 to vector<8x128xf32>
    %94 = arith.addf %93, %92 : vector<8x128xf32>
    %95 = arith.divf %93, %94 : vector<8x128xf32>
    %96 = vector.extract_strided_slice %83 {offsets = [0, 256], sizes = [8, 128], strides = [1, 1]} : vector<8x512xf32> to vector<8x128xf32>
    %97 = math.tanh %96 : vector<8x128xf32>
    %98 = vector.extract_strided_slice %83 {offsets = [0, 384], sizes = [8, 128], strides = [1, 1]} : vector<8x512xf32> to vector<8x128xf32>
    %99 = arith.negf %98 : vector<8x128xf32>
    %100 = math.exp %99 : vector<8x128xf32>
    %cst_33 = arith.constant 1.000000e+00 : f32
    %101 = vector.broadcast %cst_33 : f32 to vector<8x128xf32>
    %102 = arith.addf %101, %100 : vector<8x128xf32>
    %103 = arith.divf %101, %102 : vector<8x128xf32>
    %104 = arith.mulf %95, %72 : vector<8x128xf32>
    %105 = arith.mulf %89, %97 : vector<8x128xf32>
    %106 = arith.addf %104, %105 : vector<8x128xf32>
    %107 = math.tanh %106 : vector<8x128xf32>
    %108 = arith.mulf %103, %107 : vector<8x128xf32>
    %109 = arith.index_cast %78 : i32 to index
    %c0_34 = arith.constant 0 : index
    %110 = vector.load %arg8[%109, %c0_34] : memref<64x128xf32, #tpu.memory_space<vmem>>, vector<8x128xf32>
    tpu.vector_store %arg8[%109, %c0_34], %108 {strides = array<i32>} : memref<64x128xf32, #tpu.memory_space<vmem>>, vector<8x128xf32>,
    %c3_i32 = arith.constant 3 : i32
    %c8_i32_35 = arith.constant 8 : i32
    %111 = arith.muli %c3_i32, %c8_i32_35 : i32
    %112 = tpu.assume_multiple %111, 8 : i32
    %113 = arith.index_cast %112 : i32 to index
    %c0_36 = arith.constant 0 : index
    %114 = vector.load %arg9[%113, %c0_36] : memref<64x512xf32, #tpu.memory_space<vmem>>, vector<8x512xf32>
    %c0_37 = arith.constant 0 : index
    %c0_38 = arith.constant 0 : index
    %115 = vector.load %arg3[%c0_37, %c0_38] : memref<128x512xf32, #tpu.memory_space<vmem>>, vector<128x512xf32>
    %cst_39 = arith.constant dense<0.000000e+00> : vector<8x512xf32>
    %116 = tpu.matmul %108, %115, %cst_39 {dimension_numbers = #tpu.dot_dimension_numbers<[1], [0], [0], [1], [0, 0, 1, 1], [], []>} : vector<8x128xf32>, vector<128x512xf32>, vector<8x512xf32> -> vector<8x512xf32>
    %117 = arith.addf %114, %116 : vector<8x512xf32>
    %118 = vector.extract_strided_slice %117 {offsets = [0, 0], sizes = [8, 128], strides = [1, 1]} : vector<8x512xf32> to vector<8x128xf32>
    %119 = arith.negf %118 : vector<8x128xf32>
    %120 = math.exp %119 : vector<8x128xf32>
    %cst_40 = arith.constant 1.000000e+00 : f32
    %121 = vector.broadcast %cst_40 : f32 to vector<8x128xf32>
    %122 = arith.addf %121, %120 : vector<8x128xf32>
    %123 = arith.divf %121, %122 : vector<8x128xf32>
    %124 = vector.extract_strided_slice %117 {offsets = [0, 128], sizes = [8, 128], strides = [1, 1]} : vector<8x512xf32> to vector<8x128xf32>
    %125 = arith.negf %124 : vector<8x128xf32>
    %126 = math.exp %125 : vector<8x128xf32>
    %cst_41 = arith.constant 1.000000e+00 : f32
    %127 = vector.broadcast %cst_41 : f32 to vector<8x128xf32>
    %128 = arith.addf %127, %126 : vector<8x128xf32>
    %129 = arith.divf %127, %128 : vector<8x128xf32>
    %130 = vector.extract_strided_slice %117 {offsets = [0, 256], sizes = [8, 128], strides = [1, 1]} : vector<8x512xf32> to vector<8x128xf32>
    %131 = math.tanh %130 : vector<8x128xf32>
    %132 = vector.extract_strided_slice %117 {offsets = [0, 384], sizes = [8, 128], strides = [1, 1]} : vector<8x512xf32> to vector<8x128xf32>
    %133 = arith.negf %132 : vector<8x128xf32>
    %134 = math.exp %133 : vector<8x128xf32>
    %cst_42 = arith.constant 1.000000e+00 : f32
    %135 = vector.broadcast %cst_42 : f32 to vector<8x128xf32>
    %136 = arith.addf %135, %134 : vector<8x128xf32>
    %137 = arith.divf %135, %136 : vector<8x128xf32>
    %138 = arith.mulf %129, %106 : vector<8x128xf32>
    %139 = arith.mulf %123, %131 : vector<8x128xf32>
    %140 = arith.addf %138, %139 : vector<8x128xf32>
    %141 = math.tanh %140 : vector<8x128xf32>
    %142 = arith.mulf %137, %141 : vector<8x128xf32>
    %143 = arith.index_cast %112 : i32 to index
    %c0_43 = arith.constant 0 : index
    %144 = vector.load %arg8[%143, %c0_43] : memref<64x128xf32, #tpu.memory_space<vmem>>, vector<8x128xf32>
    tpu.vector_store %arg8[%143, %c0_43], %142 {strides = array<i32>} : memref<64x128xf32, #tpu.memory_space<vmem>>, vector<8x128xf32>,
    %c4_i32 = arith.constant 4 : i32
    %c8_i32_44 = arith.constant 8 : i32
    %145 = arith.muli %c4_i32, %c8_i32_44 : i32
    %146 = tpu.assume_multiple %145, 8 : i32
    %147 = arith.index_cast %146 : i32 to index
    %c0_45 = arith.constant 0 : index
    %148 = vector.load %arg9[%147, %c0_45] : memref<64x512xf32, #tpu.memory_space<vmem>>, vector<8x512xf32>
    %c0_46 = arith.constant 0 : index
    %c0_47 = arith.constant 0 : index
    %149 = vector.load %arg3[%c0_46, %c0_47] : memref<128x512xf32, #tpu.memory_space<vmem>>, vector<128x512xf32>
    %cst_48 = arith.constant dense<0.000000e+00> : vector<8x512xf32>
    %150 = tpu.matmul %142, %149, %cst_48 {dimension_numbers = #tpu.dot_dimension_numbers<[1], [0], [0], [1], [0, 0, 1, 1], [], []>} : vector<8x128xf32>, vector<128x512xf32>, vector<8x512xf32> -> vector<8x512xf32>
    %151 = arith.addf %148, %150 : vector<8x512xf32>
    %152 = vector.extract_strided_slice %151 {offsets = [0, 0], sizes = [8, 128], strides = [1, 1]} : vector<8x512xf32> to vector<8x128xf32>
    %153 = arith.negf %152 : vector<8x128xf32>
    %154 = math.exp %153 : vector<8x128xf32>
    %cst_49 = arith.constant 1.000000e+00 : f32
    %155 = vector.broadcast %cst_49 : f32 to vector<8x128xf32>
    %156 = arith.addf %155, %154 : vector<8x128xf32>
    %157 = arith.divf %155, %156 : vector<8x128xf32>
    %158 = vector.extract_strided_slice %151 {offsets = [0, 128], sizes = [8, 128], strides = [1, 1]} : vector<8x512xf32> to vector<8x128xf32>
    %159 = arith.negf %158 : vector<8x128xf32>
    %160 = math.exp %159 : vector<8x128xf32>
    %cst_50 = arith.constant 1.000000e+00 : f32
    %161 = vector.broadcast %cst_50 : f32 to vector<8x128xf32>
    %162 = arith.addf %161, %160 : vector<8x128xf32>
    %163 = arith.divf %161, %162 : vector<8x128xf32>
    %164 = vector.extract_strided_slice %151 {offsets = [0, 256], sizes = [8, 128], strides = [1, 1]} : vector<8x512xf32> to vector<8x128xf32>
    %165 = math.tanh %164 : vector<8x128xf32>
    %166 = vector.extract_strided_slice %151 {offsets = [0, 384], sizes = [8, 128], strides = [1, 1]} : vector<8x512xf32> to vector<8x128xf32>
    %167 = arith.negf %166 : vector<8x128xf32>
    %168 = math.exp %167 : vector<8x128xf32>
    %cst_51 = arith.constant 1.000000e+00 : f32
    %169 = vector.broadcast %cst_51 : f32 to vector<8x128xf32>
    %170 = arith.addf %169, %168 : vector<8x128xf32>
    %171 = arith.divf %169, %170 : vector<8x128xf32>
    %172 = arith.mulf %163, %140 : vector<8x128xf32>
    %173 = arith.mulf %157, %165 : vector<8x128xf32>
    %174 = arith.addf %172, %173 : vector<8x128xf32>
    %175 = math.tanh %174 : vector<8x128xf32>
    %176 = arith.mulf %171, %175 : vector<8x128xf32>
    %177 = arith.index_cast %146 : i32 to index
    %c0_52 = arith.constant 0 : index
    %178 = vector.load %arg8[%177, %c0_52] : memref<64x128xf32, #tpu.memory_space<vmem>>, vector<8x128xf32>
    tpu.vector_store %arg8[%177, %c0_52], %176 {strides = array<i32>} : memref<64x128xf32, #tpu.memory_space<vmem>>, vector<8x128xf32>,
    %c5_i32 = arith.constant 5 : i32
    %c8_i32_53 = arith.constant 8 : i32
    %179 = arith.muli %c5_i32, %c8_i32_53 : i32
    %180 = tpu.assume_multiple %179, 8 : i32
    %181 = arith.index_cast %180 : i32 to index
    %c0_54 = arith.constant 0 : index
    %182 = vector.load %arg9[%181, %c0_54] : memref<64x512xf32, #tpu.memory_space<vmem>>, vector<8x512xf32>
    %c0_55 = arith.constant 0 : index
    %c0_56 = arith.constant 0 : index
    %183 = vector.load %arg3[%c0_55, %c0_56] : memref<128x512xf32, #tpu.memory_space<vmem>>, vector<128x512xf32>
    %cst_57 = arith.constant dense<0.000000e+00> : vector<8x512xf32>
    %184 = tpu.matmul %176, %183, %cst_57 {dimension_numbers = #tpu.dot_dimension_numbers<[1], [0], [0], [1], [0, 0, 1, 1], [], []>} : vector<8x128xf32>, vector<128x512xf32>, vector<8x512xf32> -> vector<8x512xf32>
    %185 = arith.addf %182, %184 : vector<8x512xf32>
    %186 = vector.extract_strided_slice %185 {offsets = [0, 0], sizes = [8, 128], strides = [1, 1]} : vector<8x512xf32> to vector<8x128xf32>
    %187 = arith.negf %186 : vector<8x128xf32>
    %188 = math.exp %187 : vector<8x128xf32>
    %cst_58 = arith.constant 1.000000e+00 : f32
    %189 = vector.broadcast %cst_58 : f32 to vector<8x128xf32>
    %190 = arith.addf %189, %188 : vector<8x128xf32>
    %191 = arith.divf %189, %190 : vector<8x128xf32>
    %192 = vector.extract_strided_slice %185 {offsets = [0, 128], sizes = [8, 128], strides = [1, 1]} : vector<8x512xf32> to vector<8x128xf32>
    %193 = arith.negf %192 : vector<8x128xf32>
    %194 = math.exp %193 : vector<8x128xf32>
    %cst_59 = arith.constant 1.000000e+00 : f32
    %195 = vector.broadcast %cst_59 : f32 to vector<8x128xf32>
    %196 = arith.addf %195, %194 : vector<8x128xf32>
    %197 = arith.divf %195, %196 : vector<8x128xf32>
    %198 = vector.extract_strided_slice %185 {offsets = [0, 256], sizes = [8, 128], strides = [1, 1]} : vector<8x512xf32> to vector<8x128xf32>
    %199 = math.tanh %198 : vector<8x128xf32>
    %200 = vector.extract_strided_slice %185 {offsets = [0, 384], sizes = [8, 128], strides = [1, 1]} : vector<8x512xf32> to vector<8x128xf32>
    %201 = arith.negf %200 : vector<8x128xf32>
    %202 = math.exp %201 : vector<8x128xf32>
    %cst_60 = arith.constant 1.000000e+00 : f32
    %203 = vector.broadcast %cst_60 : f32 to vector<8x128xf32>
    %204 = arith.addf %203, %202 : vector<8x128xf32>
    %205 = arith.divf %203, %204 : vector<8x128xf32>
    %206 = arith.mulf %197, %174 : vector<8x128xf32>
    %207 = arith.mulf %191, %199 : vector<8x128xf32>
    %208 = arith.addf %206, %207 : vector<8x128xf32>
    %209 = math.tanh %208 : vector<8x128xf32>
    %210 = arith.mulf %205, %209 : vector<8x128xf32>
    %211 = arith.index_cast %180 : i32 to index
    %c0_61 = arith.constant 0 : index
    %212 = vector.load %arg8[%211, %c0_61] : memref<64x128xf32, #tpu.memory_space<vmem>>, vector<8x128xf32>
    tpu.vector_store %arg8[%211, %c0_61], %210 {strides = array<i32>} : memref<64x128xf32, #tpu.memory_space<vmem>>, vector<8x128xf32>,
    %c6_i32 = arith.constant 6 : i32
    %c8_i32_62 = arith.constant 8 : i32
    %213 = arith.muli %c6_i32, %c8_i32_62 : i32
    %214 = tpu.assume_multiple %213, 8 : i32
    %215 = arith.index_cast %214 : i32 to index
    %c0_63 = arith.constant 0 : index
    %216 = vector.load %arg9[%215, %c0_63] : memref<64x512xf32, #tpu.memory_space<vmem>>, vector<8x512xf32>
    %c0_64 = arith.constant 0 : index
    %c0_65 = arith.constant 0 : index
    %217 = vector.load %arg3[%c0_64, %c0_65] : memref<128x512xf32, #tpu.memory_space<vmem>>, vector<128x512xf32>
    %cst_66 = arith.constant dense<0.000000e+00> : vector<8x512xf32>
    %218 = tpu.matmul %210, %217, %cst_66 {dimension_numbers = #tpu.dot_dimension_numbers<[1], [0], [0], [1], [0, 0, 1, 1], [], []>} : vector<8x128xf32>, vector<128x512xf32>, vector<8x512xf32> -> vector<8x512xf32>
    %219 = arith.addf %216, %218 : vector<8x512xf32>
    %220 = vector.extract_strided_slice %219 {offsets = [0, 0], sizes = [8, 128], strides = [1, 1]} : vector<8x512xf32> to vector<8x128xf32>
    %221 = arith.negf %220 : vector<8x128xf32>
    %222 = math.exp %221 : vector<8x128xf32>
    %cst_67 = arith.constant 1.000000e+00 : f32
    %223 = vector.broadcast %cst_67 : f32 to vector<8x128xf32>
    %224 = arith.addf %223, %222 : vector<8x128xf32>
    %225 = arith.divf %223, %224 : vector<8x128xf32>
    %226 = vector.extract_strided_slice %219 {offsets = [0, 128], sizes = [8, 128], strides = [1, 1]} : vector<8x512xf32> to vector<8x128xf32>
    %227 = arith.negf %226 : vector<8x128xf32>
    %228 = math.exp %227 : vector<8x128xf32>
    %cst_68 = arith.constant 1.000000e+00 : f32
    %229 = vector.broadcast %cst_68 : f32 to vector<8x128xf32>
    %230 = arith.addf %229, %228 : vector<8x128xf32>
    %231 = arith.divf %229, %230 : vector<8x128xf32>
    %232 = vector.extract_strided_slice %219 {offsets = [0, 256], sizes = [8, 128], strides = [1, 1]} : vector<8x512xf32> to vector<8x128xf32>
    %233 = math.tanh %232 : vector<8x128xf32>
    %234 = vector.extract_strided_slice %219 {offsets = [0, 384], sizes = [8, 128], strides = [1, 1]} : vector<8x512xf32> to vector<8x128xf32>
    %235 = arith.negf %234 : vector<8x128xf32>
    %236 = math.exp %235 : vector<8x128xf32>
    %cst_69 = arith.constant 1.000000e+00 : f32
    %237 = vector.broadcast %cst_69 : f32 to vector<8x128xf32>
    %238 = arith.addf %237, %236 : vector<8x128xf32>
    %239 = arith.divf %237, %238 : vector<8x128xf32>
    %240 = arith.mulf %231, %208 : vector<8x128xf32>
    %241 = arith.mulf %225, %233 : vector<8x128xf32>
    %242 = arith.addf %240, %241 : vector<8x128xf32>
    %243 = math.tanh %242 : vector<8x128xf32>
    %244 = arith.mulf %239, %243 : vector<8x128xf32>
    %245 = arith.index_cast %214 : i32 to index
    %c0_70 = arith.constant 0 : index
    %246 = vector.load %arg8[%245, %c0_70] : memref<64x128xf32, #tpu.memory_space<vmem>>, vector<8x128xf32>
    tpu.vector_store %arg8[%245, %c0_70], %244 {strides = array<i32>} : memref<64x128xf32, #tpu.memory_space<vmem>>, vector<8x128xf32>,
    %c7_i32 = arith.constant 7 : i32
    %c8_i32_71 = arith.constant 8 : i32
    %247 = arith.muli %c7_i32, %c8_i32_71 : i32
    %248 = tpu.assume_multiple %247, 8 : i32
    %249 = arith.index_cast %248 : i32 to index
    %c0_72 = arith.constant 0 : index
    %250 = vector.load %arg9[%249, %c0_72] : memref<64x512xf32, #tpu.memory_space<vmem>>, vector<8x512xf32>
    %c0_73 = arith.constant 0 : index
    %c0_74 = arith.constant 0 : index
    %251 = vector.load %arg3[%c0_73, %c0_74] : memref<128x512xf32, #tpu.memory_space<vmem>>, vector<128x512xf32>
    %cst_75 = arith.constant dense<0.000000e+00> : vector<8x512xf32>
    %252 = tpu.matmul %244, %251, %cst_75 {dimension_numbers = #tpu.dot_dimension_numbers<[1], [0], [0], [1], [0, 0, 1, 1], [], []>} : vector<8x128xf32>, vector<128x512xf32>, vector<8x512xf32> -> vector<8x512xf32>
    %253 = arith.addf %250, %252 : vector<8x512xf32>
    %254 = vector.extract_strided_slice %253 {offsets = [0, 0], sizes = [8, 128], strides = [1, 1]} : vector<8x512xf32> to vector<8x128xf32>
    %255 = arith.negf %254 : vector<8x128xf32>
    %256 = math.exp %255 : vector<8x128xf32>
    %cst_76 = arith.constant 1.000000e+00 : f32
    %257 = vector.broadcast %cst_76 : f32 to vector<8x128xf32>
    %258 = arith.addf %257, %256 : vector<8x128xf32>
    %259 = arith.divf %257, %258 : vector<8x128xf32>
    %260 = vector.extract_strided_slice %253 {offsets = [0, 128], sizes = [8, 128], strides = [1, 1]} : vector<8x512xf32> to vector<8x128xf32>
    %261 = arith.negf %260 : vector<8x128xf32>
    %262 = math.exp %261 : vector<8x128xf32>
    %cst_77 = arith.constant 1.000000e+00 : f32
    %263 = vector.broadcast %cst_77 : f32 to vector<8x128xf32>
    %264 = arith.addf %263, %262 : vector<8x128xf32>
    %265 = arith.divf %263, %264 : vector<8x128xf32>
    %266 = vector.extract_strided_slice %253 {offsets = [0, 256], sizes = [8, 128], strides = [1, 1]} : vector<8x512xf32> to vector<8x128xf32>
    %267 = math.tanh %266 : vector<8x128xf32>
    %268 = vector.extract_strided_slice %253 {offsets = [0, 384], sizes = [8, 128], strides = [1, 1]} : vector<8x512xf32> to vector<8x128xf32>
    %269 = arith.negf %268 : vector<8x128xf32>
    %270 = math.exp %269 : vector<8x128xf32>
    %cst_78 = arith.constant 1.000000e+00 : f32
    %271 = vector.broadcast %cst_78 : f32 to vector<8x128xf32>
    %272 = arith.addf %271, %270 : vector<8x128xf32>
    %273 = arith.divf %271, %272 : vector<8x128xf32>
    %274 = arith.mulf %265, %242 : vector<8x128xf32>
    %275 = arith.mulf %259, %267 : vector<8x128xf32>
    %276 = arith.addf %274, %275 : vector<8x128xf32>
    %277 = math.tanh %276 : vector<8x128xf32>
    %278 = arith.mulf %273, %277 : vector<8x128xf32>
    %279 = arith.index_cast %248 : i32 to index
    %c0_79 = arith.constant 0 : index
    %280 = vector.load %arg8[%279, %c0_79] : memref<64x128xf32, #tpu.memory_space<vmem>>, vector<8x128xf32>
    tpu.vector_store %arg8[%279, %c0_79], %278 {strides = array<i32>} : memref<64x128xf32, #tpu.memory_space<vmem>>, vector<8x128xf32>,
    %c8_i32_80 = arith.constant 8 : i32
    %c0_81 = arith.constant 0 : index
    %c0_82 = arith.constant 0 : index
    %281 = vector.load %arg8[%c0_81, %c0_82] : memref<64x128xf32, #tpu.memory_space<vmem>>, vector<64x128xf32>
    %c0_83 = arith.constant 0 : index
    %c0_84 = arith.constant 0 : index
    %282 = vector.load %arg5[%c0_83, %c0_84] : memref<128x512xf32, #tpu.memory_space<vmem>>, vector<128x512xf32>
    %cst_85 = arith.constant dense<0.000000e+00> : vector<64x512xf32>
    %283 = tpu.matmul %281, %282, %cst_85 {dimension_numbers = #tpu.dot_dimension_numbers<[1], [0], [0], [1], [0, 0, 1, 1], [], []>} : vector<64x128xf32>, vector<128x512xf32>, vector<64x512xf32> -> vector<64x512xf32>
    %c0_86 = arith.constant 0 : index
    %c0_87 = arith.constant 0 : index
    %284 = vector.load %arg7[%c0_86, %c0_87] : memref<1x512xf32, #tpu.memory_space<vmem>>, vector<1x512xf32>
    %285 = vector.broadcast %284 : vector<1x512xf32> to vector<64x512xf32>
    %286 = arith.addf %283, %285 : vector<64x512xf32>
    %c0_88 = arith.constant 0 : index
    %c0_89 = arith.constant 0 : index
    %287 = vector.load %arg9[%c0_88, %c0_89] : memref<64x512xf32, #tpu.memory_space<vmem>>, vector<64x512xf32>
    tpu.vector_store %arg9[%c0_88, %c0_89], %286 {strides = array<i32>} : memref<64x512xf32, #tpu.memory_space<vmem>>, vector<64x512xf32>,
    %cst_90 = arith.constant 0.000000e+00 : f32
    %288 = vector.broadcast %cst_90 : f32 to vector<8x128xf32>
    %cst_91 = arith.constant 0.000000e+00 : f32
    %289 = vector.broadcast %cst_91 : f32 to vector<8x128xf32>
    %c0_i32_92 = arith.constant 0 : i32
    %c8_i32_93 = arith.constant 8 : i32
    %290 = arith.muli %c0_i32_92, %c8_i32_93 : i32
    %291 = tpu.assume_multiple %290, 8 : i32
    %292 = arith.index_cast %291 : i32 to index
    %c0_94 = arith.constant 0 : index
    %293 = vector.load %arg9[%292, %c0_94] : memref<64x512xf32, #tpu.memory_space<vmem>>, vector<8x512xf32>
    %c0_95 = arith.constant 0 : index
    %c0_96 = arith.constant 0 : index
    %294 = vector.load %arg6[%c0_95, %c0_96] : memref<128x512xf32, #tpu.memory_space<vmem>>, vector<128x512xf32>
    %cst_97 = arith.constant dense<0.000000e+00> : vector<8x512xf32>
    %295 = tpu.matmul %288, %294, %cst_97 {dimension_numbers = #tpu.dot_dimension_numbers<[1], [0], [0], [1], [0, 0, 1, 1], [], []>} : vector<8x128xf32>, vector<128x512xf32>, vector<8x512xf32> -> vector<8x512xf32>
    %296 = arith.addf %293, %295 : vector<8x512xf32>
    %297 = vector.extract_strided_slice %296 {offsets = [0, 0], sizes = [8, 128], strides = [1, 1]} : vector<8x512xf32> to vector<8x128xf32>
    %298 = arith.negf %297 : vector<8x128xf32>
    %299 = math.exp %298 : vector<8x128xf32>
    %cst_98 = arith.constant 1.000000e+00 : f32
    %300 = vector.broadcast %cst_98 : f32 to vector<8x128xf32>
    %301 = arith.addf %300, %299 : vector<8x128xf32>
    %302 = arith.divf %300, %301 : vector<8x128xf32>
    %303 = vector.extract_strided_slice %296 {offsets = [0, 128], sizes = [8, 128], strides = [1, 1]} : vector<8x512xf32> to vector<8x128xf32>
    %304 = arith.negf %303 : vector<8x128xf32>
    %305 = math.exp %304 : vector<8x128xf32>
    %cst_99 = arith.constant 1.000000e+00 : f32
    %306 = vector.broadcast %cst_99 : f32 to vector<8x128xf32>
    %307 = arith.addf %306, %305 : vector<8x128xf32>
    %308 = arith.divf %306, %307 : vector<8x128xf32>
    %309 = vector.extract_strided_slice %296 {offsets = [0, 256], sizes = [8, 128], strides = [1, 1]} : vector<8x512xf32> to vector<8x128xf32>
    %310 = math.tanh %309 : vector<8x128xf32>
    %311 = vector.extract_strided_slice %296 {offsets = [0, 384], sizes = [8, 128], strides = [1, 1]} : vector<8x512xf32> to vector<8x128xf32>
    %312 = arith.negf %311 : vector<8x128xf32>
    %313 = math.exp %312 : vector<8x128xf32>
    %cst_100 = arith.constant 1.000000e+00 : f32
    %314 = vector.broadcast %cst_100 : f32 to vector<8x128xf32>
    %315 = arith.addf %314, %313 : vector<8x128xf32>
    %316 = arith.divf %314, %315 : vector<8x128xf32>
    %317 = arith.mulf %308, %289 : vector<8x128xf32>
    %318 = arith.mulf %302, %310 : vector<8x128xf32>
    %319 = arith.addf %317, %318 : vector<8x128xf32>
    %320 = math.tanh %319 : vector<8x128xf32>
    %321 = arith.mulf %316, %320 : vector<8x128xf32>
    %322 = arith.index_cast %291 : i32 to index
    %c0_101 = arith.constant 0 : index
    %323 = vector.load %arg8[%322, %c0_101] : memref<64x128xf32, #tpu.memory_space<vmem>>, vector<8x128xf32>
    tpu.vector_store %arg8[%322, %c0_101], %321 {strides = array<i32>} : memref<64x128xf32, #tpu.memory_space<vmem>>, vector<8x128xf32>,
    %c1_i32_102 = arith.constant 1 : i32
    %c8_i32_103 = arith.constant 8 : i32
    %324 = arith.muli %c1_i32_102, %c8_i32_103 : i32
    %325 = tpu.assume_multiple %324, 8 : i32
    %326 = arith.index_cast %325 : i32 to index
    %c0_104 = arith.constant 0 : index
    %327 = vector.load %arg9[%326, %c0_104] : memref<64x512xf32, #tpu.memory_space<vmem>>, vector<8x512xf32>
    %c0_105 = arith.constant 0 : index
    %c0_106 = arith.constant 0 : index
    %328 = vector.load %arg6[%c0_105, %c0_106] : memref<128x512xf32, #tpu.memory_space<vmem>>, vector<128x512xf32>
    %cst_107 = arith.constant dense<0.000000e+00> : vector<8x512xf32>
    %329 = tpu.matmul %321, %328, %cst_107 {dimension_numbers = #tpu.dot_dimension_numbers<[1], [0], [0], [1], [0, 0, 1, 1], [], []>} : vector<8x128xf32>, vector<128x512xf32>, vector<8x512xf32> -> vector<8x512xf32>
    %330 = arith.addf %327, %329 : vector<8x512xf32>
    %331 = vector.extract_strided_slice %330 {offsets = [0, 0], sizes = [8, 128], strides = [1, 1]} : vector<8x512xf32> to vector<8x128xf32>
    %332 = arith.negf %331 : vector<8x128xf32>
    %333 = math.exp %332 : vector<8x128xf32>
    %cst_108 = arith.constant 1.000000e+00 : f32
    %334 = vector.broadcast %cst_108 : f32 to vector<8x128xf32>
    %335 = arith.addf %334, %333 : vector<8x128xf32>
    %336 = arith.divf %334, %335 : vector<8x128xf32>
    %337 = vector.extract_strided_slice %330 {offsets = [0, 128], sizes = [8, 128], strides = [1, 1]} : vector<8x512xf32> to vector<8x128xf32>
    %338 = arith.negf %337 : vector<8x128xf32>
    %339 = math.exp %338 : vector<8x128xf32>
    %cst_109 = arith.constant 1.000000e+00 : f32
    %340 = vector.broadcast %cst_109 : f32 to vector<8x128xf32>
    %341 = arith.addf %340, %339 : vector<8x128xf32>
    %342 = arith.divf %340, %341 : vector<8x128xf32>
    %343 = vector.extract_strided_slice %330 {offsets = [0, 256], sizes = [8, 128], strides = [1, 1]} : vector<8x512xf32> to vector<8x128xf32>
    %344 = math.tanh %343 : vector<8x128xf32>
    %345 = vector.extract_strided_slice %330 {offsets = [0, 384], sizes = [8, 128], strides = [1, 1]} : vector<8x512xf32> to vector<8x128xf32>
    %346 = arith.negf %345 : vector<8x128xf32>
    %347 = math.exp %346 : vector<8x128xf32>
    %cst_110 = arith.constant 1.000000e+00 : f32
    %348 = vector.broadcast %cst_110 : f32 to vector<8x128xf32>
    %349 = arith.addf %348, %347 : vector<8x128xf32>
    %350 = arith.divf %348, %349 : vector<8x128xf32>
    %351 = arith.mulf %342, %319 : vector<8x128xf32>
    %352 = arith.mulf %336, %344 : vector<8x128xf32>
    %353 = arith.addf %351, %352 : vector<8x128xf32>
    %354 = math.tanh %353 : vector<8x128xf32>
    %355 = arith.mulf %350, %354 : vector<8x128xf32>
    %356 = arith.index_cast %325 : i32 to index
    %c0_111 = arith.constant 0 : index
    %357 = vector.load %arg8[%356, %c0_111] : memref<64x128xf32, #tpu.memory_space<vmem>>, vector<8x128xf32>
    tpu.vector_store %arg8[%356, %c0_111], %355 {strides = array<i32>} : memref<64x128xf32, #tpu.memory_space<vmem>>, vector<8x128xf32>,
    %c2_i32_112 = arith.constant 2 : i32
    %c8_i32_113 = arith.constant 8 : i32
    %358 = arith.muli %c2_i32_112, %c8_i32_113 : i32
    %359 = tpu.assume_multiple %358, 8 : i32
    %360 = arith.index_cast %359 : i32 to index
    %c0_114 = arith.constant 0 : index
    %361 = vector.load %arg9[%360, %c0_114] : memref<64x512xf32, #tpu.memory_space<vmem>>, vector<8x512xf32>
    %c0_115 = arith.constant 0 : index
    %c0_116 = arith.constant 0 : index
    %362 = vector.load %arg6[%c0_115, %c0_116] : memref<128x512xf32, #tpu.memory_space<vmem>>, vector<128x512xf32>
    %cst_117 = arith.constant dense<0.000000e+00> : vector<8x512xf32>
    %363 = tpu.matmul %355, %362, %cst_117 {dimension_numbers = #tpu.dot_dimension_numbers<[1], [0], [0], [1], [0, 0, 1, 1], [], []>} : vector<8x128xf32>, vector<128x512xf32>, vector<8x512xf32> -> vector<8x512xf32>
    %364 = arith.addf %361, %363 : vector<8x512xf32>
    %365 = vector.extract_strided_slice %364 {offsets = [0, 0], sizes = [8, 128], strides = [1, 1]} : vector<8x512xf32> to vector<8x128xf32>
    %366 = arith.negf %365 : vector<8x128xf32>
    %367 = math.exp %366 : vector<8x128xf32>
    %cst_118 = arith.constant 1.000000e+00 : f32
    %368 = vector.broadcast %cst_118 : f32 to vector<8x128xf32>
    %369 = arith.addf %368, %367 : vector<8x128xf32>
    %370 = arith.divf %368, %369 : vector<8x128xf32>
    %371 = vector.extract_strided_slice %364 {offsets = [0, 128], sizes = [8, 128], strides = [1, 1]} : vector<8x512xf32> to vector<8x128xf32>
    %372 = arith.negf %371 : vector<8x128xf32>
    %373 = math.exp %372 : vector<8x128xf32>
    %cst_119 = arith.constant 1.000000e+00 : f32
    %374 = vector.broadcast %cst_119 : f32 to vector<8x128xf32>
    %375 = arith.addf %374, %373 : vector<8x128xf32>
    %376 = arith.divf %374, %375 : vector<8x128xf32>
    %377 = vector.extract_strided_slice %364 {offsets = [0, 256], sizes = [8, 128], strides = [1, 1]} : vector<8x512xf32> to vector<8x128xf32>
    %378 = math.tanh %377 : vector<8x128xf32>
    %379 = vector.extract_strided_slice %364 {offsets = [0, 384], sizes = [8, 128], strides = [1, 1]} : vector<8x512xf32> to vector<8x128xf32>
    %380 = arith.negf %379 : vector<8x128xf32>
    %381 = math.exp %380 : vector<8x128xf32>
    %cst_120 = arith.constant 1.000000e+00 : f32
    %382 = vector.broadcast %cst_120 : f32 to vector<8x128xf32>
    %383 = arith.addf %382, %381 : vector<8x128xf32>
    %384 = arith.divf %382, %383 : vector<8x128xf32>
    %385 = arith.mulf %376, %353 : vector<8x128xf32>
    %386 = arith.mulf %370, %378 : vector<8x128xf32>
    %387 = arith.addf %385, %386 : vector<8x128xf32>
    %388 = math.tanh %387 : vector<8x128xf32>
    %389 = arith.mulf %384, %388 : vector<8x128xf32>
    %390 = arith.index_cast %359 : i32 to index
    %c0_121 = arith.constant 0 : index
    %391 = vector.load %arg8[%390, %c0_121] : memref<64x128xf32, #tpu.memory_space<vmem>>, vector<8x128xf32>
    tpu.vector_store %arg8[%390, %c0_121], %389 {strides = array<i32>} : memref<64x128xf32, #tpu.memory_space<vmem>>, vector<8x128xf32>,
    %c3_i32_122 = arith.constant 3 : i32
    %c8_i32_123 = arith.constant 8 : i32
    %392 = arith.muli %c3_i32_122, %c8_i32_123 : i32
    %393 = tpu.assume_multiple %392, 8 : i32
    %394 = arith.index_cast %393 : i32 to index
    %c0_124 = arith.constant 0 : index
    %395 = vector.load %arg9[%394, %c0_124] : memref<64x512xf32, #tpu.memory_space<vmem>>, vector<8x512xf32>
    %c0_125 = arith.constant 0 : index
    %c0_126 = arith.constant 0 : index
    %396 = vector.load %arg6[%c0_125, %c0_126] : memref<128x512xf32, #tpu.memory_space<vmem>>, vector<128x512xf32>
    %cst_127 = arith.constant dense<0.000000e+00> : vector<8x512xf32>
    %397 = tpu.matmul %389, %396, %cst_127 {dimension_numbers = #tpu.dot_dimension_numbers<[1], [0], [0], [1], [0, 0, 1, 1], [], []>} : vector<8x128xf32>, vector<128x512xf32>, vector<8x512xf32> -> vector<8x512xf32>
    %398 = arith.addf %395, %397 : vector<8x512xf32>
    %399 = vector.extract_strided_slice %398 {offsets = [0, 0], sizes = [8, 128], strides = [1, 1]} : vector<8x512xf32> to vector<8x128xf32>
    %400 = arith.negf %399 : vector<8x128xf32>
    %401 = math.exp %400 : vector<8x128xf32>
    %cst_128 = arith.constant 1.000000e+00 : f32
    %402 = vector.broadcast %cst_128 : f32 to vector<8x128xf32>
    %403 = arith.addf %402, %401 : vector<8x128xf32>
    %404 = arith.divf %402, %403 : vector<8x128xf32>
    %405 = vector.extract_strided_slice %398 {offsets = [0, 128], sizes = [8, 128], strides = [1, 1]} : vector<8x512xf32> to vector<8x128xf32>
    %406 = arith.negf %405 : vector<8x128xf32>
    %407 = math.exp %406 : vector<8x128xf32>
    %cst_129 = arith.constant 1.000000e+00 : f32
    %408 = vector.broadcast %cst_129 : f32 to vector<8x128xf32>
    %409 = arith.addf %408, %407 : vector<8x128xf32>
    %410 = arith.divf %408, %409 : vector<8x128xf32>
    %411 = vector.extract_strided_slice %398 {offsets = [0, 256], sizes = [8, 128], strides = [1, 1]} : vector<8x512xf32> to vector<8x128xf32>
    %412 = math.tanh %411 : vector<8x128xf32>
    %413 = vector.extract_strided_slice %398 {offsets = [0, 384], sizes = [8, 128], strides = [1, 1]} : vector<8x512xf32> to vector<8x128xf32>
    %414 = arith.negf %413 : vector<8x128xf32>
    %415 = math.exp %414 : vector<8x128xf32>
    %cst_130 = arith.constant 1.000000e+00 : f32
    %416 = vector.broadcast %cst_130 : f32 to vector<8x128xf32>
    %417 = arith.addf %416, %415 : vector<8x128xf32>
    %418 = arith.divf %416, %417 : vector<8x128xf32>
    %419 = arith.mulf %410, %387 : vector<8x128xf32>
    %420 = arith.mulf %404, %412 : vector<8x128xf32>
    %421 = arith.addf %419, %420 : vector<8x128xf32>
    %422 = math.tanh %421 : vector<8x128xf32>
    %423 = arith.mulf %418, %422 : vector<8x128xf32>
    %424 = arith.index_cast %393 : i32 to index
    %c0_131 = arith.constant 0 : index
    %425 = vector.load %arg8[%424, %c0_131] : memref<64x128xf32, #tpu.memory_space<vmem>>, vector<8x128xf32>
    tpu.vector_store %arg8[%424, %c0_131], %423 {strides = array<i32>} : memref<64x128xf32, #tpu.memory_space<vmem>>, vector<8x128xf32>,
    %c4_i32_132 = arith.constant 4 : i32
    %c8_i32_133 = arith.constant 8 : i32
    %426 = arith.muli %c4_i32_132, %c8_i32_133 : i32
    %427 = tpu.assume_multiple %426, 8 : i32
    %428 = arith.index_cast %427 : i32 to index
    %c0_134 = arith.constant 0 : index
    %429 = vector.load %arg9[%428, %c0_134] : memref<64x512xf32, #tpu.memory_space<vmem>>, vector<8x512xf32>
    %c0_135 = arith.constant 0 : index
    %c0_136 = arith.constant 0 : index
    %430 = vector.load %arg6[%c0_135, %c0_136] : memref<128x512xf32, #tpu.memory_space<vmem>>, vector<128x512xf32>
    %cst_137 = arith.constant dense<0.000000e+00> : vector<8x512xf32>
    %431 = tpu.matmul %423, %430, %cst_137 {dimension_numbers = #tpu.dot_dimension_numbers<[1], [0], [0], [1], [0, 0, 1, 1], [], []>} : vector<8x128xf32>, vector<128x512xf32>, vector<8x512xf32> -> vector<8x512xf32>
    %432 = arith.addf %429, %431 : vector<8x512xf32>
    %433 = vector.extract_strided_slice %432 {offsets = [0, 0], sizes = [8, 128], strides = [1, 1]} : vector<8x512xf32> to vector<8x128xf32>
    %434 = arith.negf %433 : vector<8x128xf32>
    %435 = math.exp %434 : vector<8x128xf32>
    %cst_138 = arith.constant 1.000000e+00 : f32
    %436 = vector.broadcast %cst_138 : f32 to vector<8x128xf32>
    %437 = arith.addf %436, %435 : vector<8x128xf32>
    %438 = arith.divf %436, %437 : vector<8x128xf32>
    %439 = vector.extract_strided_slice %432 {offsets = [0, 128], sizes = [8, 128], strides = [1, 1]} : vector<8x512xf32> to vector<8x128xf32>
    %440 = arith.negf %439 : vector<8x128xf32>
    %441 = math.exp %440 : vector<8x128xf32>
    %cst_139 = arith.constant 1.000000e+00 : f32
    %442 = vector.broadcast %cst_139 : f32 to vector<8x128xf32>
    %443 = arith.addf %442, %441 : vector<8x128xf32>
    %444 = arith.divf %442, %443 : vector<8x128xf32>
    %445 = vector.extract_strided_slice %432 {offsets = [0, 256], sizes = [8, 128], strides = [1, 1]} : vector<8x512xf32> to vector<8x128xf32>
    %446 = math.tanh %445 : vector<8x128xf32>
    %447 = vector.extract_strided_slice %432 {offsets = [0, 384], sizes = [8, 128], strides = [1, 1]} : vector<8x512xf32> to vector<8x128xf32>
    %448 = arith.negf %447 : vector<8x128xf32>
    %449 = math.exp %448 : vector<8x128xf32>
    %cst_140 = arith.constant 1.000000e+00 : f32
    %450 = vector.broadcast %cst_140 : f32 to vector<8x128xf32>
    %451 = arith.addf %450, %449 : vector<8x128xf32>
    %452 = arith.divf %450, %451 : vector<8x128xf32>
    %453 = arith.mulf %444, %421 : vector<8x128xf32>
    %454 = arith.mulf %438, %446 : vector<8x128xf32>
    %455 = arith.addf %453, %454 : vector<8x128xf32>
    %456 = math.tanh %455 : vector<8x128xf32>
    %457 = arith.mulf %452, %456 : vector<8x128xf32>
    %458 = arith.index_cast %427 : i32 to index
    %c0_141 = arith.constant 0 : index
    %459 = vector.load %arg8[%458, %c0_141] : memref<64x128xf32, #tpu.memory_space<vmem>>, vector<8x128xf32>
    tpu.vector_store %arg8[%458, %c0_141], %457 {strides = array<i32>} : memref<64x128xf32, #tpu.memory_space<vmem>>, vector<8x128xf32>,
    %c5_i32_142 = arith.constant 5 : i32
    %c8_i32_143 = arith.constant 8 : i32
    %460 = arith.muli %c5_i32_142, %c8_i32_143 : i32
    %461 = tpu.assume_multiple %460, 8 : i32
    %462 = arith.index_cast %461 : i32 to index
    %c0_144 = arith.constant 0 : index
    %463 = vector.load %arg9[%462, %c0_144] : memref<64x512xf32, #tpu.memory_space<vmem>>, vector<8x512xf32>
    %c0_145 = arith.constant 0 : index
    %c0_146 = arith.constant 0 : index
    %464 = vector.load %arg6[%c0_145, %c0_146] : memref<128x512xf32, #tpu.memory_space<vmem>>, vector<128x512xf32>
    %cst_147 = arith.constant dense<0.000000e+00> : vector<8x512xf32>
    %465 = tpu.matmul %457, %464, %cst_147 {dimension_numbers = #tpu.dot_dimension_numbers<[1], [0], [0], [1], [0, 0, 1, 1], [], []>} : vector<8x128xf32>, vector<128x512xf32>, vector<8x512xf32> -> vector<8x512xf32>
    %466 = arith.addf %463, %465 : vector<8x512xf32>
    %467 = vector.extract_strided_slice %466 {offsets = [0, 0], sizes = [8, 128], strides = [1, 1]} : vector<8x512xf32> to vector<8x128xf32>
    %468 = arith.negf %467 : vector<8x128xf32>
    %469 = math.exp %468 : vector<8x128xf32>
    %cst_148 = arith.constant 1.000000e+00 : f32
    %470 = vector.broadcast %cst_148 : f32 to vector<8x128xf32>
    %471 = arith.addf %470, %469 : vector<8x128xf32>
    %472 = arith.divf %470, %471 : vector<8x128xf32>
    %473 = vector.extract_strided_slice %466 {offsets = [0, 128], sizes = [8, 128], strides = [1, 1]} : vector<8x512xf32> to vector<8x128xf32>
    %474 = arith.negf %473 : vector<8x128xf32>
    %475 = math.exp %474 : vector<8x128xf32>
    %cst_149 = arith.constant 1.000000e+00 : f32
    %476 = vector.broadcast %cst_149 : f32 to vector<8x128xf32>
    %477 = arith.addf %476, %475 : vector<8x128xf32>
    %478 = arith.divf %476, %477 : vector<8x128xf32>
    %479 = vector.extract_strided_slice %466 {offsets = [0, 256], sizes = [8, 128], strides = [1, 1]} : vector<8x512xf32> to vector<8x128xf32>
    %480 = math.tanh %479 : vector<8x128xf32>
    %481 = vector.extract_strided_slice %466 {offsets = [0, 384], sizes = [8, 128], strides = [1, 1]} : vector<8x512xf32> to vector<8x128xf32>
    %482 = arith.negf %481 : vector<8x128xf32>
    %483 = math.exp %482 : vector<8x128xf32>
    %cst_150 = arith.constant 1.000000e+00 : f32
    %484 = vector.broadcast %cst_150 : f32 to vector<8x128xf32>
    %485 = arith.addf %484, %483 : vector<8x128xf32>
    %486 = arith.divf %484, %485 : vector<8x128xf32>
    %487 = arith.mulf %478, %455 : vector<8x128xf32>
    %488 = arith.mulf %472, %480 : vector<8x128xf32>
    %489 = arith.addf %487, %488 : vector<8x128xf32>
    %490 = math.tanh %489 : vector<8x128xf32>
    %491 = arith.mulf %486, %490 : vector<8x128xf32>
    %492 = arith.index_cast %461 : i32 to index
    %c0_151 = arith.constant 0 : index
    %493 = vector.load %arg8[%492, %c0_151] : memref<64x128xf32, #tpu.memory_space<vmem>>, vector<8x128xf32>
    tpu.vector_store %arg8[%492, %c0_151], %491 {strides = array<i32>} : memref<64x128xf32, #tpu.memory_space<vmem>>, vector<8x128xf32>,
    %c6_i32_152 = arith.constant 6 : i32
    %c8_i32_153 = arith.constant 8 : i32
    %494 = arith.muli %c6_i32_152, %c8_i32_153 : i32
    %495 = tpu.assume_multiple %494, 8 : i32
    %496 = arith.index_cast %495 : i32 to index
    %c0_154 = arith.constant 0 : index
    %497 = vector.load %arg9[%496, %c0_154] : memref<64x512xf32, #tpu.memory_space<vmem>>, vector<8x512xf32>
    %c0_155 = arith.constant 0 : index
    %c0_156 = arith.constant 0 : index
    %498 = vector.load %arg6[%c0_155, %c0_156] : memref<128x512xf32, #tpu.memory_space<vmem>>, vector<128x512xf32>
    %cst_157 = arith.constant dense<0.000000e+00> : vector<8x512xf32>
    %499 = tpu.matmul %491, %498, %cst_157 {dimension_numbers = #tpu.dot_dimension_numbers<[1], [0], [0], [1], [0, 0, 1, 1], [], []>} : vector<8x128xf32>, vector<128x512xf32>, vector<8x512xf32> -> vector<8x512xf32>
    %500 = arith.addf %497, %499 : vector<8x512xf32>
    %501 = vector.extract_strided_slice %500 {offsets = [0, 0], sizes = [8, 128], strides = [1, 1]} : vector<8x512xf32> to vector<8x128xf32>
    %502 = arith.negf %501 : vector<8x128xf32>
    %503 = math.exp %502 : vector<8x128xf32>
    %cst_158 = arith.constant 1.000000e+00 : f32
    %504 = vector.broadcast %cst_158 : f32 to vector<8x128xf32>
    %505 = arith.addf %504, %503 : vector<8x128xf32>
    %506 = arith.divf %504, %505 : vector<8x128xf32>
    %507 = vector.extract_strided_slice %500 {offsets = [0, 128], sizes = [8, 128], strides = [1, 1]} : vector<8x512xf32> to vector<8x128xf32>
    %508 = arith.negf %507 : vector<8x128xf32>
    %509 = math.exp %508 : vector<8x128xf32>
    %cst_159 = arith.constant 1.000000e+00 : f32
    %510 = vector.broadcast %cst_159 : f32 to vector<8x128xf32>
    %511 = arith.addf %510, %509 : vector<8x128xf32>
    %512 = arith.divf %510, %511 : vector<8x128xf32>
    %513 = vector.extract_strided_slice %500 {offsets = [0, 256], sizes = [8, 128], strides = [1, 1]} : vector<8x512xf32> to vector<8x128xf32>
    %514 = math.tanh %513 : vector<8x128xf32>
    %515 = vector.extract_strided_slice %500 {offsets = [0, 384], sizes = [8, 128], strides = [1, 1]} : vector<8x512xf32> to vector<8x128xf32>
    %516 = arith.negf %515 : vector<8x128xf32>
    %517 = math.exp %516 : vector<8x128xf32>
    %cst_160 = arith.constant 1.000000e+00 : f32
    %518 = vector.broadcast %cst_160 : f32 to vector<8x128xf32>
    %519 = arith.addf %518, %517 : vector<8x128xf32>
    %520 = arith.divf %518, %519 : vector<8x128xf32>
    %521 = arith.mulf %512, %489 : vector<8x128xf32>
    %522 = arith.mulf %506, %514 : vector<8x128xf32>
    %523 = arith.addf %521, %522 : vector<8x128xf32>
    %524 = math.tanh %523 : vector<8x128xf32>
    %525 = arith.mulf %520, %524 : vector<8x128xf32>
    %526 = arith.index_cast %495 : i32 to index
    %c0_161 = arith.constant 0 : index
    %527 = vector.load %arg8[%526, %c0_161] : memref<64x128xf32, #tpu.memory_space<vmem>>, vector<8x128xf32>
    tpu.vector_store %arg8[%526, %c0_161], %525 {strides = array<i32>} : memref<64x128xf32, #tpu.memory_space<vmem>>, vector<8x128xf32>,
    %c7_i32_162 = arith.constant 7 : i32
    %c8_i32_163 = arith.constant 8 : i32
    %528 = arith.muli %c7_i32_162, %c8_i32_163 : i32
    %529 = tpu.assume_multiple %528, 8 : i32
    %530 = arith.index_cast %529 : i32 to index
    %c0_164 = arith.constant 0 : index
    %531 = vector.load %arg9[%530, %c0_164] : memref<64x512xf32, #tpu.memory_space<vmem>>, vector<8x512xf32>
    %c0_165 = arith.constant 0 : index
    %c0_166 = arith.constant 0 : index
    %532 = vector.load %arg6[%c0_165, %c0_166] : memref<128x512xf32, #tpu.memory_space<vmem>>, vector<128x512xf32>
    %cst_167 = arith.constant dense<0.000000e+00> : vector<8x512xf32>
    %533 = tpu.matmul %525, %532, %cst_167 {dimension_numbers = #tpu.dot_dimension_numbers<[1], [0], [0], [1], [0, 0, 1, 1], [], []>} : vector<8x128xf32>, vector<128x512xf32>, vector<8x512xf32> -> vector<8x512xf32>
    %534 = arith.addf %531, %533 : vector<8x512xf32>
    %535 = vector.extract_strided_slice %534 {offsets = [0, 0], sizes = [8, 128], strides = [1, 1]} : vector<8x512xf32> to vector<8x128xf32>
    %536 = arith.negf %535 : vector<8x128xf32>
    %537 = math.exp %536 : vector<8x128xf32>
    %cst_168 = arith.constant 1.000000e+00 : f32
    %538 = vector.broadcast %cst_168 : f32 to vector<8x128xf32>
    %539 = arith.addf %538, %537 : vector<8x128xf32>
    %540 = arith.divf %538, %539 : vector<8x128xf32>
    %541 = vector.extract_strided_slice %534 {offsets = [0, 128], sizes = [8, 128], strides = [1, 1]} : vector<8x512xf32> to vector<8x128xf32>
    %542 = arith.negf %541 : vector<8x128xf32>
    %543 = math.exp %542 : vector<8x128xf32>
    %cst_169 = arith.constant 1.000000e+00 : f32
    %544 = vector.broadcast %cst_169 : f32 to vector<8x128xf32>
    %545 = arith.addf %544, %543 : vector<8x128xf32>
    %546 = arith.divf %544, %545 : vector<8x128xf32>
    %547 = vector.extract_strided_slice %534 {offsets = [0, 256], sizes = [8, 128], strides = [1, 1]} : vector<8x512xf32> to vector<8x128xf32>
    %548 = math.tanh %547 : vector<8x128xf32>
    %549 = vector.extract_strided_slice %534 {offsets = [0, 384], sizes = [8, 128], strides = [1, 1]} : vector<8x512xf32> to vector<8x128xf32>
    %550 = arith.negf %549 : vector<8x128xf32>
    %551 = math.exp %550 : vector<8x128xf32>
    %cst_170 = arith.constant 1.000000e+00 : f32
    %552 = vector.broadcast %cst_170 : f32 to vector<8x128xf32>
    %553 = arith.addf %552, %551 : vector<8x128xf32>
    %554 = arith.divf %552, %553 : vector<8x128xf32>
    %555 = arith.mulf %546, %523 : vector<8x128xf32>
    %556 = arith.mulf %540, %548 : vector<8x128xf32>
    %557 = arith.addf %555, %556 : vector<8x128xf32>
    %558 = math.tanh %557 : vector<8x128xf32>
    %559 = arith.mulf %554, %558 : vector<8x128xf32>
    %560 = arith.index_cast %529 : i32 to index
    %c0_171 = arith.constant 0 : index
    %561 = vector.load %arg8[%560, %c0_171] : memref<64x128xf32, #tpu.memory_space<vmem>>, vector<8x128xf32>
    tpu.vector_store %arg8[%560, %c0_171], %559 {strides = array<i32>} : memref<64x128xf32, #tpu.memory_space<vmem>>, vector<8x128xf32>,
    %c8_i32_172 = arith.constant 8 : i32
    return
  }
  func.func @transform_0(%arg0: i32) -> (i32, i32) {
    %c0_i32 = arith.constant 0 : i32
    %c0_i32_0 = arith.constant 0 : i32
    %c0_i32_1 = arith.constant 0 : i32
    return %c0_i32, %c0_i32_0 : i32, i32
  }
  func.func @transform_1(%arg0: i32) -> (i32, i32) {
    %c0_i32 = arith.constant 0 : i32
    %c0_i32_0 = arith.constant 0 : i32
    %c0_i32_1 = arith.constant 0 : i32
    return %c0_i32, %c0_i32_0 : i32, i32
  }
  func.func @transform_2(%arg0: i32) -> (i32, i32) {
    %c0_i32 = arith.constant 0 : i32
    %c0_i32_0 = arith.constant 0 : i32
    %c0_i32_1 = arith.constant 0 : i32
    return %c0_i32, %c0_i32_0 : i32, i32
  }
  func.func @transform_3(%arg0: i32) -> (i32, i32) {
    %c0_i32 = arith.constant 0 : i32
    %c0_i32_0 = arith.constant 0 : i32
    %c0_i32_1 = arith.constant 0 : i32
    return %c0_i32, %c0_i32_0 : i32, i32
  }
  func.func @transform_4(%arg0: i32) -> (i32, i32) {
    %c0_i32 = arith.constant 0 : i32
    %c0_i32_0 = arith.constant 0 : i32
    %c0_i32_1 = arith.constant 0 : i32
    return %c0_i32, %c0_i32_0 : i32, i32
  }
  func.func @transform_5(%arg0: i32) -> (i32, i32) {
    %c0_i32 = arith.constant 0 : i32
    %c0_i32_0 = arith.constant 0 : i32
    %c0_i32_1 = arith.constant 0 : i32
    return %c0_i32, %c0_i32_0 : i32, i32
  }
  func.func @transform_6(%arg0: i32) -> (i32, i32) {
    %c0_i32 = arith.constant 0 : i32
    %c0_i32_0 = arith.constant 0 : i32
    %c0_i32_1 = arith.constant 0 : i32
    return %c0_i32, %c0_i32_0 : i32, i32
  }
  func.func @transform_7(%arg0: i32) -> (i32, i32) {
    %c0_i32 = arith.constant 0 : i32
    %c0_i32_0 = arith.constant 0 : i32
    %c0_i32_1 = arith.constant 0 : i32
    return %c0_i32, %c0_i32_0 : i32, i32
  }
}

</mosaic_0001>

<bundles_post_ra>
// kernel: tpu_custom_call.1
= control target key start
LH: loop header
LB: loop body
LE: loop exit
PB: predicated region body
PF: predicated region fallthrough
CT: control target
= control target key end

     0   :  { %12 = vsyncpa [#allocation4], 0  ;;  %s7562_s0 = inlined_call_operand.hbm [shape: f32[64,128], index: 0, kind: input, shape index: {}]   ;;  %s7563_s1 = inlined_call_operand.hbm [shape: f32[128,512], index: 1, kind: input, shape index: {}]   ;;  %s7564_s2 = inlined_call_operand.hbm [shape: f32[128,512], index: 2, kind: input, shape index: {}]   ;;  %s7565_s3 = inlined_call_operand.vmem [shape: f32[1,512], index: 3, kind: input, shape index: {}]   ;;  %s7566_s4 = inlined_call_operand.hbm [shape: f32[128,512], index: 4, kind: input, shape index: {}]   ;;  %s7567_s5 = inlined_call_operand.hbm [shape: f32[128,512], index: 5, kind: input, shape index: {}]   ;;  %s7568_s6 = inlined_call_operand.vmem [shape: f32[1,512], index: 6, kind: input, shape index: {}]   ;;  %s7569_s7 = inlined_call_operand.hbm [shape: f32[64,128], index: 7, kind: output, shape index: {}]  }
   0x1   :  { %13 = vsyncpa [#allocation7], 0 }
   0x2   :  { %14 = vsyncpa [#allocation10], 0 }
   0x3   :  { %15 = vsyncpa [#allocation5], 0  ;;  %s6415_s24 = smov [#allocation6]   ;;  %s6275_s28 = scalar_lea.hbm %s7563_s1, 8192 }
   0x4   :  { %s33_s25 = sshll.u32 %s6415_s24, 4  ;;  %p6276_p0 = scmp.ne.s32.totalorder %s7563_s1, %s6275_s28  ;;  %s34_s25 = int_to_ptr.vmem [resolvable:$true] %s33_s25 }
   0x5   :  { %p6279_p1 = scmp.lt.u32.totalorder %s6275_s28, %s7563_s1 }
   0x7   :  { %p6281_p2 = pnand %p6279_p1, %p6276_p0 }
   0x9   :  { %6284 = shalt.err (!%p6281_p2)
}
   0xa   :  { %s6285_s10 = scalar_lea.vmem %s34_s25, 8192  ;;  %p6290_p4 = scmp.lt.s32.totalorder %s34_s25, %s34_s25 }
   0xb   :  { %p6286_p3 = scmp.ne.s32.totalorder %s34_s25, %s6285_s10  ;;  %p6291_p5 = scmp.lt.s32.totalorder %s6285_s10, %s6285_s10 }
   0xd   :  { %p6292_p6 = por %p6291_p5, %p6290_p4 }
   0xf   :  { %p6293_p7 = pnand %p6292_p6, %p6286_p3 }
  0x11   :  { %6296 = shalt.err (!%p6293_p7)
}
  0x12   :  { %s6416_s11 = smov 512   ;;  %s6417_s12 = smov 32  }
  0x13   :  { %39 = dma.hbm_to_vmem [thread:$0]  %s7563_s1, 8192, %s34_s25, [#allocation7], %s6416_s11, %s6416_s11, %s6417_s12  }
  0x14   :  { %s6418_s15 = smov [#allocation9]   ;;  %s6419_s17 = smov [#allocation3]  }
  0x15   :  { %s59_s16 = sshll.u32 %s6418_s15, 4  ;;  %s21_s18 = sshll.u32 %s6419_s17, 4  ;;  %s60_s16 = int_to_ptr.vmem [resolvable:$true] %s59_s16  ;;  %s22_s18 = int_to_ptr.vmem [resolvable:$true] %s21_s18 }
  0x16   :  { %s6297_s21 = scalar_lea.hbm %s7566_s4, 8192 }
  0x17   :  { %p6298_p8 = scmp.ne.s32.totalorder %s7566_s4, %s6297_s21  ;;  %p6301_p9 = scmp.lt.u32.totalorder %s6297_s21, %s7566_s4 }
  0x19   :  { %p6303_p10 = pnand %p6301_p9, %p6298_p8 }
  0x1b   :  { %6306 = shalt.err (!%p6303_p10)
}
  0x1c   :  { %s6307_s1 = scalar_lea.vmem %s60_s16, 8192  ;;  %p6312_p12 = scmp.lt.s32.totalorder %s60_s16, %s60_s16 }
  0x1d   :  { %p6308_p11 = scmp.ne.s32.totalorder %s60_s16, %s6307_s1  ;;  %p6313_p13 = scmp.lt.s32.totalorder %s6307_s1, %s6307_s1 }
  0x1f   :  { %p6314_p0 = por %p6313_p13, %p6312_p12 }
  0x21   :  { %p6315_p1 = pnand %p6314_p0, %p6308_p11 }
  0x23   :  { %6318 = shalt.err (!%p6315_p1)
}
  0x24   :  { %65 = dma.hbm_to_vmem [thread:$0]  %s7566_s4, 8192, %s60_s16, [#allocation10], %s6416_s11, %s6416_s11, %s6417_s12  }
  0x25   :  { %s6319_s30 = scalar_lea.hbm %s7562_s0, 1024 }
  0x26   :  { %p6320_p2 = scmp.ne.s32.totalorder %s7562_s0, %s6319_s30  ;;  %p6323_p3 = scmp.lt.u32.totalorder %s6319_s30, %s7562_s0 }
  0x28   :  { %p6325_p4 = pnand %p6323_p3, %p6320_p2 }
  0x2a   :  { %6328 = shalt.err (!%p6325_p4)
}
  0x2b   :  { %s6329_s14 = scalar_lea.vmem %s22_s18, 1024  ;;  %p6334_p6 = scmp.lt.s32.totalorder %s22_s18, %s22_s18 }
  0x2c   :  { %p6330_p5 = scmp.ne.s32.totalorder %s22_s18, %s6329_s14  ;;  %p6335_p7 = scmp.lt.s32.totalorder %s6329_s14, %s6329_s14 }
  0x2e   :  { %p6336_p8 = por %p6335_p7, %p6334_p6 }
  0x30   :  { %p6337_p9 = pnand %p6336_p8, %p6330_p5 }
  0x32   :  { %6340 = shalt.err (!%p6337_p9)
}
  0x33   :  { %s6420_s4 = smov 128   ;;  %s6421_s15 = smov 8  }
  0x34   :  { %27 = dma.hbm_to_vmem [thread:$0]  %s7562_s0, 1024, %s22_s18, [#allocation4], %s6420_s4, %s6420_s4, %s6421_s15  }
  0x35   :  { %s6422_s19 = smov [#allocation8]   ;;  %s6423_s21 = smov [#allocation11]  }
  0x36   :  { %s45_s20 = sshll.u32 %s6422_s19, 4  ;;  %s71_s22 = sshll.u32 %s6423_s21, 4  ;;  %s46_s20 = int_to_ptr.vmem [resolvable:$true] %s45_s20  ;;  %s72_s22 = int_to_ptr.vmem [resolvable:$true] %s71_s22 }
  0x37   :  { %s6341_s26 = scalar_lea.hbm %s7564_s2, 8192 }
  0x38   :  { %p6342_p10 = scmp.ne.s32.totalorder %s7564_s2, %s6341_s26  ;;  %p6345_p11 = scmp.lt.u32.totalorder %s6341_s26, %s7564_s2 }
  0x3a   :  { %p6347_p12 = pnand %p6345_p11, %p6342_p10 }
  0x3c   :  { %6350 = shalt.err (!%p6347_p12)
}
  0x3d   :  { %s6351_s0 = scalar_lea.vmem %s46_s20, 8192  ;;  %p6356_p0 = scmp.lt.s32.totalorder %s46_s20, %s46_s20 }
  0x3e   :  { %p6352_p13 = scmp.ne.s32.totalorder %s46_s20, %s6351_s0  ;;  %p6357_p1 = scmp.lt.s32.totalorder %s6351_s0, %s6351_s0 }
  0x40   :  { %p6358_p2 = por %p6357_p1, %p6356_p0 }
  0x42   :  { %p6359_p3 = pnand %p6358_p2, %p6352_p13 }
  0x44   :  { %6362 = shalt.err (!%p6359_p3)
}
  0x45   :  { %51 = dma.hbm_to_vmem [thread:$0]  %s7564_s2, 8192, %s46_s20, [#allocation7], %s6416_s11, %s6416_s11, %s6417_s12  }
  0x46   :  { %s6363_s9 = scalar_lea.hbm %s7567_s5, 8192 }
  0x47   :  { %p6364_p4 = scmp.ne.s32.totalorder %s7567_s5, %s6363_s9  ;;  %p6367_p5 = scmp.lt.u32.totalorder %s6363_s9, %s7567_s5 }
  0x49   :  { %p6369_p6 = pnand %p6367_p5, %p6364_p4 }
  0x4b   :  { %6372 = shalt.err (!%p6369_p6)
}
  0x4c   :  { %s6373_s17 = scalar_lea.vmem %s72_s22, 8192  ;;  %p6378_p8 = scmp.lt.s32.totalorder %s72_s22, %s72_s22 }
  0x4d   :  { %p6374_p7 = scmp.ne.s32.totalorder %s72_s22, %s6373_s17  ;;  %p6379_p9 = scmp.lt.s32.totalorder %s6373_s17, %s6373_s17 }
  0x4f   :  { %p6380_p10 = por %p6379_p9, %p6378_p8 }
  0x51   :  { %p6381_p11 = pnand %p6380_p10, %p6374_p7 }
  0x53   :  { %6384 = shalt.err (!%p6381_p11)
}
  0x54   :  { %77 = dma.hbm_to_vmem [thread:$0]  %s7567_s5, 8192, %s72_s22, [#allocation10], %s6416_s11, %s6416_s11, %s6417_s12  }
  0x55   :  { %6407 = dma.done.wait [#allocation4], 1024  }
  0x56   :  { %6408 = vsyncadd [#allocation4], 4294966272 }
  0x57   :  { %6409 = dma.done.wait [#allocation7], 16384  }
  0x58   :  { %6410 = vsyncadd [#allocation7], 4294950912 }
  0x59   :  { %6411 = dma.done.wait [#allocation10], 16384  }
  0x5a   :  { %6412 = vsyncadd [#allocation10], 4294950912  ;;  %v6424_v0 = vmov 0.0   ;;  %v104_v1 = vld [vmem:[#allocation6 + $0x8] sm:$0xff]  ;;  %v106_v3 = vld [vmem:[#allocation6 + $0x18] sm:$0xff] }
  0x5b   :  { %253 = vmatprep.mubr.f32.mxu0 %v6424_v0  ;;  %366 = vmatprep.mubr.f32.mxu1 %v6424_v0  ;;  %v108_v2 = vld [vmem:[#allocation6 + $0x28] sm:$0xff]  ;;  %v110_v5 = vld [vmem:[#allocation6 + $0x38] sm:$0xff]  ;;  %v103_v6 = vld [vmem:[#allocation6] sm:$0xff] }
  0x5c   :  { %v4728_v4 = vpack.c.bf16 %v108_v2, %v104_v1  ;;  %v107_v7 = vld [vmem:[#allocation6 + $0x20] sm:$0xff]  ;;  %v4760_v8 = vpack.c.bf16 %v110_v5, %v106_v3  ;;  %v105_v10 = vld [vmem:[#allocation6 + $0x10] sm:$0xff]  ;;  %v112_v12 = vld [vmem:[#allocation6 + $0x48] sm:$0xff] }
  0x5d   :  { %v4730_v9 = vpack.c.bf16 %v107_v7, %v103_v6  ;;  %v109_v11 = vld [vmem:[#allocation6 + $0x30] sm:$0xff]  ;;  %v116_v14 = vld [vmem:[#allocation6 + $0x68] sm:$0xff]  ;;  %v114_v15 = vld [vmem:[#allocation6 + $0x58] sm:$0xff] }
  0x5e   :  { %4729 = vmatprep.subr.bf16.mxu0 %v4728_v4  ;;  %v4762_v13 = vpack.c.bf16 %v109_v11, %v105_v10  ;;  %v118_v16 = vld [vmem:[#allocation6 + $0x78] sm:$0xff]  ;;  %4761 = vmatprep.subr.bf16.mxu1 %v4760_v8  ;;  %v4732_v17 = vpack.c.bf16 %v116_v14, %v112_v12  ;;  %v111_v19 = vld [vmem:[#allocation6 + $0x40] sm:$0xff]  ;;  %v113_v21 = vld [vmem:[#allocation6 + $0x50] sm:$0xff] }
  0x5f   :  { %4731 = vmatpush1.bf16.msra.mxu0 %v4730_v9  ;;  %v4764_v18 = vpack.c.bf16 %v118_v16, %v114_v15  ;;  %v115_v20 = vld [vmem:[#allocation6 + $0x60] sm:$0xff]  ;;  %v117_v23 = vld [vmem:[#allocation6 + $0x70] sm:$0xff]  ;;  %v120_v24 = vld [vmem:[#allocation6 + $0x88] sm:$0xff] }
  0x60   :  { %4763 = vmatpush1.bf16.msra.mxu1 %v4762_v13  ;;  %v4734_v22 = vpack.c.bf16 %v115_v20, %v111_v19  ;;  %v124_v25 = vld [vmem:[#allocation6 + $0xa8] sm:$0xff]  ;;  %4733 = vmatprep.subr.bf16.mxu0 %v4732_v17  ;;  %v4766_v26 = vpack.c.bf16 %v117_v23, %v113_v21  ;;  %v122_v28 = vld [vmem:[#allocation6 + $0x98] sm:$0xff]  ;;  %v119_v30 = vld [vmem:[#allocation6 + $0x80] sm:$0xff] }
  0x61   :  { %4765 = vmatprep.subr.bf16.mxu1 %v4764_v18  ;;  %v4736_v27 = vpack.c.bf16 %v124_v25, %v120_v24  ;;  %v126_v29 = vld [vmem:[#allocation6 + $0xb8] sm:$0xff]  ;;  %v123_v32 = vld [vmem:[#allocation6 + $0xa0] sm:$0xff]  ;;  %v121_v33 = vld [vmem:[#allocation6 + $0x90] sm:$0xff] }
  0x62   :  { %v4768_v31 = vpack.c.bf16 %v126_v29, %v122_v28  ;;  %v125_v34 = vld [vmem:[#allocation6 + $0xb0] sm:$0xff]  ;;  %v4738_v35 = vpack.c.bf16 %v123_v32, %v119_v30  ;;  %v128_v36 = vld [vmem:[#allocation6 + $0xc8] sm:$0xff]  ;;  %v130_v38 = vld [vmem:[#allocation6 + $0xd8] sm:$0xff] }
  0x63   :  { %4735 = vmatpush1.bf16.msra.mxu0 %v4734_v22  ;;  %v132_v37 = vld [vmem:[#allocation6 + $0xe8] sm:$0xff]  ;;  %v4770_v39 = vpack.c.bf16 %v125_v34, %v121_v33  ;;  %v134_v41 = vld [vmem:[#allocation6 + $0xf8] sm:$0xff]  ;;  %v127_v42 = vld [vmem:[#allocation6 + $0xc0] sm:$0xff] }
  0x64   :  { %4767 = vmatpush1.bf16.msra.mxu1 %v4766_v26  ;;  %4737 = vmatprep.subr.bf16.mxu0 %v4736_v27  ;;  %v4740_v40 = vpack.c.bf16 %v132_v37, %v128_v36  ;;  %v131_v43 = vld [vmem:[#allocation6 + $0xe0] sm:$0xff]  ;;  %v4772_v44 = vpack.c.bf16 %v134_v41, %v130_v38  ;;  %v129_v45 = vld [vmem:[#allocation6 + $0xd0] sm:$0xff]  ;;  %v136_v47 = vld [vmem:[#allocation6 + $0x108] sm:$0xff] }
  0x65   :  { %4769 = vmatprep.subr.bf16.mxu1 %v4768_v31  ;;  %v133_v46 = vld [vmem:[#allocation6 + $0xf0] sm:$0xff]  ;;  %v140_v48 = vld [vmem:[#allocation6 + $0x128] sm:$0xff]  ;;  %v138_v49 = vld [vmem:[#allocation6 + $0x118] sm:$0xff]  ;;  %v4742_v51 = vpack.c.bf16 %v131_v43, %v127_v42 }
  0x66   :  { %v142_v50 = vld [vmem:[#allocation6 + $0x138] sm:$0xff]  ;;  %v4774_v52 = vpack.c.bf16 %v133_v46, %v129_v45  ;;  %v4744_v53 = vpack.c.bf16 %v140_v48, %v136_v47  ;;  %v135_v54 = vld [vmem:[#allocation6 + $0x100] sm:$0xff]  ;;  %v137_v56 = vld [vmem:[#allocation6 + $0x110] sm:$0xff] }
  0x67   :  { %4739 = vmatpush1.bf16.msra.mxu0 %v4738_v35  ;;  %v139_v55 = vld [vmem:[#allocation6 + $0x120] sm:$0xff]  ;;  %v4776_v57 = vpack.c.bf16 %v142_v50, %v138_v49  ;;  %v141_v58 = vld [vmem:[#allocation6 + $0x130] sm:$0xff]  ;;  %v144_v59 = vld [vmem:[#allocation6 + $0x148] sm:$0xff] }
  0x68   :  { %4771 = vmatpush1.bf16.msra.mxu1 %v4770_v39  ;;  %4741 = vmatprep.subr.bf16.mxu0 %v4740_v40  ;;  %v148_v60 = vld [vmem:[#allocation6 + $0x168] sm:$0xff]  ;;  %v146_v61 = vld [vmem:[#allocation6 + $0x158] sm:$0xff]  ;;  %v4746_v63 = vpack.c.bf16 %v139_v55, %v135_v54  ;;  %v4778_v1 = vpack.c.bf16 %v141_v58, %v137_v56  ;;  %v143_v3 = vld [vmem:[#allocation6 + $0x140] sm:$0xff] }
  0x69   :  { %4773 = vmatprep.subr.bf16.mxu1 %v4772_v44  ;;  %v150_v62 = vld [vmem:[#allocation6 + $0x178] sm:$0xff]  ;;  %v4748_v2 = vpack.c.bf16 %v148_v60, %v144_v59  ;;  %v147_v4 = vld [vmem:[#allocation6 + $0x160] sm:$0xff]  ;;  %v145_v5 = vld [vmem:[#allocation6 + $0x150] sm:$0xff] }
  0x6a   :  { %v4780_v6 = vpack.c.bf16 %v150_v62, %v146_v61  ;;  %v149_v7 = vld [vmem:[#allocation6 + $0x170] sm:$0xff]  ;;  %v152_v8 = vld [vmem:[#allocation6 + $0x188] sm:$0xff]  ;;  %v154_v10 = vld [vmem:[#allocation6 + $0x198] sm:$0xff]  ;;  %v4750_v12 = vpack.c.bf16 %v147_v4, %v143_v3 }
  0x6b   :  { %4743 = vmatpush1.bf16.msra.mxu0 %v4742_v51  ;;  %v156_v9 = vld [vmem:[#allocation6 + $0x1a8] sm:$0xff]  ;;  %v158_v11 = vld [vmem:[#allocation6 + $0x1b8] sm:$0xff]  ;;  %v4782_v13 = vpack.c.bf16 %v149_v7, %v145_v5  ;;  %v151_v15 = vld [vmem:[#allocation6 + $0x180] sm:$0xff] }
  0x6c   :  { %4775 = vmatpush1.bf16.msra.mxu1 %v4774_v52  ;;  %4745 = vmatprep.subr.bf16.mxu0 %v4744_v53  ;;  %v4752_v14 = vpack.c.bf16 %v156_v9, %v152_v8  ;;  %v155_v16 = vld [vmem:[#allocation6 + $0x1a0] sm:$0xff]  ;;  %v153_v17 = vld [vmem:[#allocation6 + $0x190] sm:$0xff]  ;;  %v4784_v18 = vpack.c.bf16 %v158_v11, %v154_v10  ;;  %v160_v20 = vld [vmem:[#allocation6 + $0x1c8] sm:$0xff] }
  0x6d   :  { %4777 = vmatprep.subr.bf16.mxu1 %v4776_v57  ;;  %v157_v19 = vld [vmem:[#allocation6 + $0x1b0] sm:$0xff]  ;;  %v164_v21 = vld [vmem:[#allocation6 + $0x1e8] sm:$0xff]  ;;  %v162_v22 = vld [vmem:[#allocation6 + $0x1d8] sm:$0xff]  ;;  %v4754_v24 = vpack.c.bf16 %v155_v16, %v151_v15 }
  0x6e   :  { %v166_v23 = vld [vmem:[#allocation6 + $0x1f8] sm:$0xff]  ;;  %v4786_v25 = vpack.c.bf16 %v157_v19, %v153_v17  ;;  %v4756_v26 = vpack.c.bf16 %v164_v21, %v160_v20  ;;  %v159_v27 = vld [vmem:[#allocation6 + $0x1c0] sm:$0xff]  ;;  %v161_v29 = vld [vmem:[#allocation6 + $0x1d0] sm:$0xff] }
  0x6f   :  { %4747 = vmatpush1.bf16.msra.mxu0 %v4746_v63  ;;  %v163_v28 = vld [vmem:[#allocation6 + $0x1e0] sm:$0xff]  ;;  %v4788_v30 = vpack.c.bf16 %v166_v23, %v162_v22  ;;  %v165_v31 = vld [vmem:[#allocation6 + $0x1f0] sm:$0xff]  ;;  %v455_v32 = vld [vmem:[#allocation8 + $0x8] sm:$0xff] }
  0x70   :  { %4779 = vmatpush1.bf16.msra.mxu1 %v4778_v1  ;;  %4749 = vmatprep.subr.bf16.mxu0 %v4748_v2  ;;  %v459_v33 = vld [vmem:[#allocation8 + $0x28] sm:$0xff]  ;;  %v457_v34 = vld [vmem:[#allocation8 + $0x18] sm:$0xff]  ;;  %v4758_v36 = vpack.c.bf16 %v163_v28, %v159_v27  ;;  %v4790_v37 = vpack.c.bf16 %v165_v31, %v161_v29  ;;  %v454_v39 = vld [vmem:[#allocation8] sm:$0xff] }
  0x71   :  { %4781 = vmatprep.subr.bf16.mxu1 %v4780_v6  ;;  %v461_v35 = vld [vmem:[#allocation8 + $0x38] sm:$0xff]  ;;  %v6543_v38 = vpack.c.bf16 %v459_v33, %v455_v32  ;;  %v458_v40 = vld [vmem:[#allocation8 + $0x20] sm:$0xff]  ;;  %v456_v42 = vld [vmem:[#allocation8 + $0x10] sm:$0xff] }
  0x72   :  { %v6545_v41 = vpack.c.bf16 %v461_v35, %v457_v34  ;;  %v460_v43 = vld [vmem:[#allocation8 + $0x30] sm:$0xff]  ;;  %v463_v44 = vld [vmem:[#allocation8 + $0x48] sm:$0xff]  ;;  %v95_v46 = vld [vmem:[#allocation3] sm:$0xff]  ;;  %v6547_v47 = vpack.c.bf16 %v458_v40, %v454_v39 }
  0x73   :  { %4751 = vmatpush1.bf16.msra.mxu0 %v4750_v12  ;;  %v467_v45 = vld [vmem:[#allocation8 + $0x68] sm:$0xff]  ;;  %v465_v48 = vld [vmem:[#allocation8 + $0x58] sm:$0xff]  ;;  %v6550_v50 = vpack.c.bf16 %v460_v43, %v456_v42  ;;  %v462_v51 = vld [vmem:[#allocation8 + $0x40] sm:$0xff] }
  0x74   :  { %4783 = vmatpush1.bf16.msra.mxu1 %v4782_v13  ;;  %4753 = vmatprep.subr.bf16.mxu0 %v4752_v14  ;;  %v469_v49 = vld [vmem:[#allocation8 + $0x78] sm:$0xff]  ;;  %v466_v52 = vld [vmem:[#allocation8 + $0x60] sm:$0xff]  ;;  %v6553_v53 = vpack.c.bf16 %v467_v45, %v463_v44  ;;  %v464_v54 = vld [vmem:[#allocation8 + $0x50] sm:$0xff] }
  0x75   :  { %4785 = vmatprep.subr.bf16.mxu1 %v4784_v18  ;;  %v468_v55 = vld [vmem:[#allocation8 + $0x70] sm:$0xff]  ;;  %v6555_v56 = vpack.c.bf16 %v469_v49, %v465_v48  ;;  %v471_v57 = vld [vmem:[#allocation8 + $0x88] sm:$0xff]  ;;  %v6558_v60 = vpack.c.bf16 %v466_v52, %v462_v51  ;;  %v473_v61 = vld [vmem:[#allocation8 + $0x98] sm:$0xff] }
  0x76   :  { %v475_v58 = vld [vmem:[#allocation8 + $0xa8] sm:$0xff]  ;;  %v477_v62 = vld [vmem:[#allocation8 + $0xb8] sm:$0xff]  ;;  %v6562_v63 = vpack.c.bf16 %v468_v55, %v464_v54  ;;  %v470_v1 = vld [vmem:[#allocation8 + $0x80] sm:$0xff] }
  0x77   :  { %4755 = vmatpush1.bf16.msra.mxu0 %v4754_v24  ;;  %v96_v59 = vld [vmem:[#allocation3 + $0x8] sm:$0xff]  ;;  %v474_v2 = vld [vmem:[#allocation8 + $0xa0] sm:$0xff]  ;;  %v6566_v3 = vpack.c.bf16 %v475_v58, %v471_v57  ;;  %v472_v4 = vld [vmem:[#allocation8 + $0x90] sm:$0xff]  ;;  %v6569_v6 = vpack.c.bf16 %v477_v62, %v473_v61 }
  0x78   :  { %4787 = vmatpush1.bf16.msra.mxu1 %v4786_v25  ;;  %4757 = vmatprep.subr.bf16.mxu0 %v4756_v26  ;;  %v476_v5 = vld [vmem:[#allocation8 + $0xb0] sm:$0xff]  ;;  %v479_v7 = vld [vmem:[#allocation8 + $0xc8] sm:$0xff]  ;;  %v6572_v10 = vpack.c.bf16 %v474_v2, %v470_v1  ;;  %v481_v11 = vld [vmem:[#allocation8 + $0xd8] sm:$0xff] }
  0x79   :  { %4789 = vmatprep.subr.bf16.mxu1 %v4788_v30  ;;  %v483_v8 = vld [vmem:[#allocation8 + $0xe8] sm:$0xff]  ;;  %v97_v9 = vld [vmem:[#allocation3 + $0x10] sm:$0xff]  ;;  %v485_v12 = vld [vmem:[#allocation8 + $0xf8] sm:$0xff]  ;;  %v6576_v13 = vpack.c.bf16 %v476_v5, %v472_v4 }
  0x7a   :  { %v478_v14 = vld [vmem:[#allocation8 + $0xc0] sm:$0xff]  ;;  %v6580_v16 = vpack.c.bf16 %v483_v8, %v479_v7  ;;  %v480_v17 = vld [vmem:[#allocation8 + $0xd0] sm:$0xff]  ;;  %v6583_v19 = vpack.c.bf16 %v485_v12, %v481_v11  ;;  %v487_v20 = vld [vmem:[#allocation8 + $0x108] sm:$0xff] }
  0x7b   :  { %4759 = vmatpush1.bf16.msra.mxu0 %v4758_v36  ;;  %v482_v15 = vld [vmem:[#allocation8 + $0xe0] sm:$0xff]  ;;  %v484_v18 = vld [vmem:[#allocation8 + $0xf0] sm:$0xff]  ;;  %v491_v21 = vld [vmem:[#allocation8 + $0x128] sm:$0xff] }
  0x7c   :  { %4791 = vmatpush1.bf16.msra.mxu1 %v4790_v37  ;;  %4793 = vmatprep.subr.bf16.mxu0 %v6543_v38  ;;  %v98_v22 = vld [vmem:[#allocation3 + $0x18] sm:$0xff]  ;;  %v6586_v23 = vpack.c.bf16 %v482_v15, %v478_v14  ;;  %v6590_v26 = vpack.c.bf16 %v484_v18, %v480_v17  ;;  %v486_v27 = vld [vmem:[#allocation8 + $0x100] sm:$0xff]  ;;  %v6594_v29 = vpack.c.bf16 %v491_v21, %v487_v20  ;;  %v488_v30 = vld [vmem:[#allocation8 + $0x110] sm:$0xff] }
  0x7d   :  { %4825 = vmatprep.subr.bf16.mxu1 %v6545_v41  ;;  %v489_v24 = vld [vmem:[#allocation8 + $0x118] sm:$0xff]  ;;  %v490_v28 = vld [vmem:[#allocation8 + $0x120] sm:$0xff]  ;;  %v492_v31 = vld [vmem:[#allocation8 + $0x130] sm:$0xff] }
  0x7e   :  { %254 = vmatmul.mubr.f32.vlgmr.msra.gmra.mrb[0].mxu0 %v95_v46  ;;  %v493_v25 = vld [vmem:[#allocation8 + $0x138] sm:$0xff]  ;;  %v495_v33 = vld [vmem:[#allocation8 + $0x148] sm:$0xff]  ;;  %v99_v35 = vld [vmem:[#allocation3 + $0x20] sm:$0xff]  ;;  %v6600_v36 = vpack.c.bf16 %v490_v28, %v486_v27  ;;  %v6604_v40 = vpack.c.bf16 %v492_v31, %v488_v30  ;;  %v169_v28 = vlaneseq }
  0x7f   :  { %367 = vmatmul.mubr.f32.vlgmr.msra.gmra.mrb[0].mxu1 %v95_v46  ;;  %4795 = vmatpush1.bf16.msra.mxu0 %v6547_v47  ;;  %v6597_v32 = vpack.c.bf16 %v493_v25, %v489_v24  ;;  %v499_v34 = vld [vmem:[#allocation8 + $0x168] sm:$0xff]  ;;  %v497_v37 = vld [vmem:[#allocation8 + $0x158] sm:$0xff]  ;;  %v494_v42 = vld [vmem:[#allocation8 + $0x140] sm:$0xff] }
  0x80   :  { %4827 = vmatpush1.bf16.msra.mxu1 %v6550_v50  ;;  %259 = vmatprep.mubr.f32.mxu0 %v6424_v0  ;;  %v501_v39 = vld [vmem:[#allocation8 + $0x178] sm:$0xff]  ;;  %v498_v43 = vld [vmem:[#allocation8 + $0x160] sm:$0xff]  ;;  %v6608_v44 = vpack.c.bf16 %v499_v34, %v495_v33  ;;  %v496_v45 = vld [vmem:[#allocation8 + $0x150] sm:$0xff]  ;;  %v6693_v30 = vshrl.u32 %v169_v28, 7 }
  0x81   :  { %372 = vmatprep.mubr.f32.mxu1 %v6424_v0  ;;  %4797 = vmatprep.subr.bf16.mxu0 %v6553_v53  ;;  %v500_v46 = vld [vmem:[#allocation8 + $0x170] sm:$0xff]  ;;  %v6611_v48 = vpack.c.bf16 %v501_v39, %v497_v37  ;;  %v503_v49 = vld [vmem:[#allocation8 + $0x188] sm:$0xff]  ;;  %v6614_v54 = vpack.c.bf16 %v498_v43, %v494_v42  ;;  %v505_v55 = vld [vmem:[#allocation8 + $0x198] sm:$0xff] }
  0x82   :  { %260 = vmatmul.mubr.f32.gmra.mrb[2].mxu0 %v96_v59  ;;  %4829 = vmatprep.subr.bf16.mxu1 %v6555_v56  ;;  %v507_v51 = vld [vmem:[#allocation8 + $0x1a8] sm:$0xff]  ;;  %v509_v57 = vld [vmem:[#allocation8 + $0x1b8] sm:$0xff]  ;;  %v6618_v58 = vpack.c.bf16 %v500_v46, %v496_v45  ;;  %v506_v61 = vld [vmem:[#allocation8 + $0x1a0] sm:$0xff]  ;;  %v171_v31 = vsub.s32 0, %v6693_v30  ;;  %v175_v34 = vsub.s32 1, %v6693_v30  ;;  %v183_v37 = vsub.s32 3, %v6693_v30 }
  0x83   :  { %373 = vmatmul.mubr.f32.gmra.mrb[2].mxu1 %v96_v59  ;;  %4799 = vmatpush1.bf16.msra.mxu0 %v6558_v60  ;;  %v100_v52 = vld [vmem:[#allocation3 + $0x28] sm:$0xff]  ;;  %v502_v59 = vld [vmem:[#allocation8 + $0x180] sm:$0xff]  ;;  %v6622_v62 = vpack.c.bf16 %v507_v51, %v503_v49  ;;  %v504_v1 = vld [vmem:[#allocation8 + $0x190] sm:$0xff]  ;;  %v6625_v4 = vpack.c.bf16 %v509_v57, %v505_v55  ;;  %v179_v55 = vsub.s32 2, %v6693_v30 }
  0x84   :  { %4831 = vmatpush1.bf16.msra.mxu1 %v6562_v63  ;;  %265 = vmatprep.mubr.f32.mxu0 %v6424_v0  ;;  %v508_v2 = vld [vmem:[#allocation8 + $0x1b0] sm:$0xff]  ;;  %v511_v5 = vld [vmem:[#allocation8 + $0x1c8] sm:$0xff]  ;;  %v513_v11 = vld [vmem:[#allocation8 + $0x1d8] sm:$0xff] }
  0x85   :  { %378 = vmatprep.mubr.f32.mxu1 %v6424_v0  ;;  %4801 = vmatprep.subr.bf16.mxu0 %v6566_v3  ;;  %v515_v7 = vld [vmem:[#allocation8 + $0x1e8] sm:$0xff]  ;;  %v101_v8 = vld [vmem:[#allocation3 + $0x30] sm:$0xff]  ;;  %v517_v12 = vld [vmem:[#allocation8 + $0x1f8] sm:$0xff]  ;;  %v6632_v14 = vpack.c.bf16 %v508_v2, %v504_v1 }
  0x86   :  { %266 = vmatmul.mubr.f32.gmra.mrb[4].mxu0 %v97_v9  ;;  %4833 = vmatprep.subr.bf16.mxu1 %v6569_v6  ;;  %v510_v15 = vld [vmem:[#allocation8 + $0x1c0] sm:$0xff]  ;;  %v6636_v18 = vpack.c.bf16 %v515_v7, %v511_v5  ;;  %v512_v20 = vld [vmem:[#allocation8 + $0x1d0] sm:$0xff]  ;;  %v102_v24 = vld [vmem:[#allocation3 + $0x38] sm:$0xff] }
  0x87   :  { %379 = vmatmul.mubr.f32.gmra.mrb[4].mxu1 %v97_v9  ;;  %4803 = vmatpush1.bf16.msra.mxu0 %v6572_v10  ;;  %v6628_v9 = vpack.c.bf16 %v506_v61, %v502_v59  ;;  %v514_v17 = vld [vmem:[#allocation8 + $0x1e0] sm:$0xff]  ;;  %v516_v21 = vld [vmem:[#allocation8 + $0x1f0] sm:$0xff] }
  0x88   :  { %4835 = vmatpush1.bf16.msra.mxu1 %v6576_v13  ;;  %271 = vmatprep.mubr.f32.mxu0 %v6424_v0  ;;  %v6642_v25 = vpack.c.bf16 %v514_v17, %v510_v15  ;;  %v6646_v27 = vpack.c.bf16 %v516_v21, %v512_v20  ;;  %v167_v33 = vld [vmem:[%s7565_s3] sm:$0xf] }
  0x89   :  { %384 = vmatprep.mubr.f32.mxu1 %v6424_v0  ;;  %4805 = vmatprep.subr.bf16.mxu0 %v6580_v16  ;;  %v6719_v59 = vrot.slane %v167_v33, %v179_v55 }
  0x8a   :  { %272 = vmatmul.mubr.f32.gmra.mrb[6].mxu0 %v98_v22  ;;  %4837 = vmatprep.subr.bf16.mxu1 %v6583_v19 }
  0x8b   :  { %385 = vmatmul.mubr.f32.gmra.mrb[6].mxu1 %v98_v22  ;;  %4807 = vmatpush1.bf16.msra.mxu0 %v6586_v23  ;;  %v6639_v22 = vpack.c.bf16 %v517_v12, %v513_v11 }
  0x8c   :  { %4839 = vmatpush1.bf16.msra.mxu1 %v6590_v26  ;;  %277 = vmatprep.mubr.f32.mxu0 %v6424_v0 }
  0x8d   :  { %390 = vmatprep.mubr.f32.mxu1 %v6424_v0  ;;  %4809 = vmatprep.subr.bf16.mxu0 %v6594_v29 }
  0x8e   :  { %278 = vmatmul.mubr.f32.gmra.mrb[8].mxu0 %v99_v35  ;;  %4841 = vmatprep.subr.bf16.mxu1 %v6597_v32 }
  0x8f   :  { %391 = vmatmul.mubr.f32.gmra.mrb[8].mxu1 %v99_v35  ;;  %4811 = vmatpush1.bf16.msra.mxu0 %v6600_v36  ;;  %v6702_v35 = vrot.slane %v167_v33, %v171_v31 }
  0x90   :  { %4843 = vmatpush1.bf16.msra.mxu1 %v6604_v40  ;;  %283 = vmatprep.mubr.f32.mxu0 %v6424_v0 }
  0x91   :  { %396 = vmatprep.mubr.f32.mxu1 %v6424_v0  ;;  %4813 = vmatprep.subr.bf16.mxu0 %v6608_v44 }
  0x92   :  { %284 = vmatmul.mubr.f32.gmra.mrb[10].mxu0 %v100_v52  ;;  %4845 = vmatprep.subr.bf16.mxu1 %v6611_v48 }
  0x93   :  { %397 = vmatmul.mubr.f32.gmra.mrb[10].mxu1 %v100_v52  ;;  %4815 = vmatpush1.bf16.msra.mxu0 %v6614_v54  ;;  %v6713_v52 = vrot.slane %v167_v33, %v183_v37 }
  0x94   :  { %4847 = vmatpush1.bf16.msra.mxu1 %v6618_v58  ;;  %289 = vmatprep.mubr.f32.mxu0 %v6424_v0 }
  0x95   :  { %402 = vmatprep.mubr.f32.mxu1 %v6424_v0  ;;  %4817 = vmatprep.subr.bf16.mxu0 %v6622_v62 }
  0x96   :  { %290 = vmatmul.mubr.f32.gmra.mrb[12].mxu0 %v101_v8  ;;  %4849 = vmatprep.subr.bf16.mxu1 %v6625_v4 }
  0x97   :  { %403 = vmatmul.mubr.f32.gmra.mrb[12].mxu1 %v101_v8  ;;  %4819 = vmatpush1.bf16.msra.mxu0 %v6628_v9 }
  0x98   :  { %4851 = vmatpush1.bf16.msra.mxu1 %v6632_v14  ;;  %295 = vmatprep.mubr.f32.mxu0 %v6424_v0 }
  0x99   :  { %408 = vmatprep.mubr.f32.mxu1 %v6424_v0  ;;  %4821 = vmatprep.subr.bf16.mxu0 %v6636_v18 }
  0x9a   :  { %296 = vmatmul.mubr.f32.gmra.mrb[14].mxu0 %v102_v24  ;;  %4853 = vmatprep.subr.bf16.mxu1 %v6639_v22 }
  0x9b   :  { %409 = vmatmul.mubr.f32.gmra.mrb[14].mxu1 %v102_v24  ;;  %4823 = vmatpush1.bf16.msra.mxu0 %v6642_v25 }
  0x9c   :  { %4855 = vmatpush1.bf16.msra.mxu1 %v6646_v27  ;;  %582 = vmatprep.mubr.f32.mxu0 %v6424_v0 }
  0x9d   :  { %653 = vmatprep.mubr.f32.mxu1 %v6424_v0  ;;  %4857 = vmatprep.subr.bf16.mxu0 %v6543_v38 }
  0x9e   :  { %583 = vmatmul.mubr.f32.vlgmr.msra.gmra.mrb[0].mxu0 %v6424_v0  ;;  %4889 = vmatprep.subr.bf16.mxu1 %v6545_v41 }
  0x9f   :  { %654 = vmatmul.mubr.f32.vlgmr.msra.gmra.mrb[0].mxu1 %v6424_v0  ;;  %4859 = vmatpush1.bf16.msra.mxu0 %v6547_v47 }
  0xa0   :  { %4891 = vmatpush1.bf16.msra.mxu1 %v6550_v50  ;;  %4861 = vmatprep.subr.bf16.mxu0 %v6553_v53 }
  0xa1   :  { %4893 = vmatprep.subr.bf16.mxu1 %v6555_v56  ;;  %824 = vmatprep.mubr.f32.mxu0 %v6424_v0 }
  0xa2   :  { %895 = vmatprep.mubr.f32.mxu1 %v6424_v0 }
  0xa3   :  { %4863 = vmatpush1.bf16.msra.mxu0 %v6558_v60 }
  0xa4   :  { %4895 = vmatpush1.bf16.msra.mxu1 %v6562_v63  ;;  %4865 = vmatprep.subr.bf16.mxu0 %v6566_v3 }
  0xa5   :  { %4897 = vmatprep.subr.bf16.mxu1 %v6569_v6 }
  0xa7   :  { %4867 = vmatpush1.bf16.msra.mxu0 %v6572_v10 }
  0xa8   :  { %4899 = vmatpush1.bf16.msra.mxu1 %v6576_v13  ;;  %4869 = vmatprep.subr.bf16.mxu0 %v6580_v16 }
  0xa9   :  { %4901 = vmatprep.subr.bf16.mxu1 %v6583_v19 }
  0xab   :  { %4871 = vmatpush1.bf16.msra.mxu0 %v6586_v23 }
  0xac   :  { %4903 = vmatpush1.bf16.msra.mxu1 %v6590_v26  ;;  %4873 = vmatprep.subr.bf16.mxu0 %v6594_v29 }
  0xad   :  { %4905 = vmatprep.subr.bf16.mxu1 %v6597_v32 }
  0xaf   :  { %4875 = vmatpush1.bf16.msra.mxu0 %v6600_v36 }
  0xb0   :  { %4907 = vmatpush1.bf16.msra.mxu1 %v6604_v40  ;;  %4877 = vmatprep.subr.bf16.mxu0 %v6608_v44 }
  0xb1   :  { %4909 = vmatprep.subr.bf16.mxu1 %v6611_v48 }
  0xb3   :  { %4879 = vmatpush1.bf16.msra.mxu0 %v6614_v54 }
  0xb4   :  { %4911 = vmatpush1.bf16.msra.mxu1 %v6618_v58  ;;  %4881 = vmatprep.subr.bf16.mxu0 %v6622_v62 }
  0xb5   :  { %4913 = vmatprep.subr.bf16.mxu1 %v6625_v4 }
  0xb7   :  { %4883 = vmatpush1.bf16.msra.mxu0 %v6628_v9 }
  0xb8   :  { %4915 = vmatpush1.bf16.msra.mxu1 %v6632_v14  ;;  %4885 = vmatprep.subr.bf16.mxu0 %v6636_v18 }
  0xb9   :  { %4917 = vmatprep.subr.bf16.mxu1 %v6639_v22 }
  0xbb   :  { %4887 = vmatpush1.bf16.msra.mxu0 %v6642_v25 }
  0xbc   :  { %4919 = vmatpush1.bf16.msra.mxu1 %v6646_v27  ;;  %4921 = vmatprep.subr.bf16.mxu0 %v6543_v38  ;;  %v6706_v38 = vrot.slane %v167_v33, %v175_v34 }
  0xbd   :  { %4953 = vmatprep.subr.bf16.mxu1 %v6545_v41 }
 0x171   :  { %v584_v41 = vpop.f32.mrb[0].mxu0 }
 0x172   :  { %v5880_v39 = vadd.f32 %v584_v41, %v6702_v35  ;;  %v655_v42 = vpop.f32.mrb[0].mxu1  ;;  %v586_v43 = vpop.f32.mrb[1].mxu0 }
 0x173   :  { %v5881_v45 = vadd.f32 %v586_v43, %v6706_v38  ;;  %v657_v46 = vpop.f32.mrb[1].mxu1  ;;  %v5896_v1 = vadd.f32 %v655_v42, %v6719_v59 }
 0x174   :  { %v4680_v49 = vmul.f32 -1.442695, %v5880_v39  ;;  %v5897_v57 = vadd.f32 %v657_v46, %v6713_v52 }
 0x175   :  { %v4681_v51 = vmul.f32 -1.442695, %v5881_v45 }
 0x176   :  { %6019 = vpow2.f32 %v4680_v49  ;;  %v4682_v61 = vmul.f32 -1.442695, %v5897_v57 }
 0x177   :  { %6021 = vpow2.f32 %v4681_v51 }
 0x178   :  { %6023 = vpow2.f32 %v4682_v61 }
 0x179   :  { %6025 = vtanh.f32 %v5896_v1 }
 0x180   :  { %v6020_v2 = vpop.eup %6019 }
 0x181   :  { %v6022_v5 = vpop.eup %6021  ;;  %v667_v7 = vadd.f32 1.0, %v6020_v2 }
 0x182   :  { %v673_v8 = vadd.f32 1.0, %v6022_v5  ;;  %v6024_v11 = vpop.eup %6023 }
 0x183   :  { %6027 = vrcp.f32 %v667_v7  ;;  %v6026_v12 = vpop.eup %6025  ;;  %v680_v21 = vadd.f32 1.0, %v6024_v11 }
 0x184   :  { %6029 = vrcp.f32 %v673_v8 }
 0x185   :  { %6031 = vrcp.f32 %v680_v21 }
 0x18d   :  { %v6028_v15 = vpop.eup %6027 }
 0x18e   :  { %v6030_v17 = vpop.eup %6029  ;;  %v684_v20 = vmul.f32 %v6028_v15, %v6026_v12 }
 0x18f   :  { %v683_v24 = vmul.f32 0.0, %v6030_v17  ;;  %v6032_v33 = vpop.eup %6031 }
 0x191   :  { %v6722_v28 = vadd.f32 %v684_v20, %v683_v24 }
 0x193   :  { %6033 = vtanh.f32 %v6722_v28 }
 0x19d   :  { %v6034_v41 = vpop.eup %6033 }
 0x19e   :  { %v687_v39 = vmul.f32 %v6034_v41, %v6032_v33  ;;  %v1183_v33 = vld [vmem:[#allocation8 + $0x8] sm:$0xff] }
 0x19f   :  { %v1187_v41 = vld [vmem:[#allocation8 + $0x28] sm:$0xff] }
 0x1a0   :  { %688 = vst [vmem:[#allocation12] sm:$0xff] %v687_v39  ;;  %825 = vmatmul.mubr.f32.vlgmr.msra.gmra.mrb[2].mxu0 %v687_v39  ;;  %896 = vmatmul.mubr.f32.vlgmr.msra.gmra.mrb[2].mxu1 %v687_v39  ;;  %v1185_v39 = vld [vmem:[#allocation8 + $0x18] sm:$0xff] }
 0x1a1   :  { %4923 = vmatpush1.bf16.msra.mxu0 %v6547_v47  ;;  %4955 = vmatpush1.bf16.msra.mxu1 %v6550_v50 }
 0x1a2   :  { %4925 = vmatprep.subr.bf16.mxu0 %v6553_v53  ;;  %4957 = vmatprep.subr.bf16.mxu1 %v6555_v56 }
 0x1a3   :  { %1067 = vmatprep.mubr.f32.mxu0 %v6424_v0  ;;  %1138 = vmatprep.mubr.f32.mxu1 %v6424_v0 }
 0x1a5   :  { %4927 = vmatpush1.bf16.msra.mxu0 %v6558_v60  ;;  %4959 = vmatpush1.bf16.msra.mxu1 %v6562_v63 }
 0x1a6   :  { %4929 = vmatprep.subr.bf16.mxu0 %v6566_v3  ;;  %4961 = vmatprep.subr.bf16.mxu1 %v6569_v6 }
 0x1a9   :  { %4931 = vmatpush1.bf16.msra.mxu0 %v6572_v10  ;;  %4963 = vmatpush1.bf16.msra.mxu1 %v6576_v13 }
 0x1aa   :  { %4933 = vmatprep.subr.bf16.mxu0 %v6580_v16  ;;  %4965 = vmatprep.subr.bf16.mxu1 %v6583_v19 }
 0x1ad   :  { %4935 = vmatpush1.bf16.msra.mxu0 %v6586_v23  ;;  %4967 = vmatpush1.bf16.msra.mxu1 %v6590_v26 }
 0x1ae   :  { %4937 = vmatprep.subr.bf16.mxu0 %v6594_v29  ;;  %4969 = vmatprep.subr.bf16.mxu1 %v6597_v32 }
 0x1b1   :  { %4939 = vmatpush1.bf16.msra.mxu0 %v6600_v36  ;;  %4971 = vmatpush1.bf16.msra.mxu1 %v6604_v40 }
 0x1b2   :  { %4941 = vmatprep.subr.bf16.mxu0 %v6608_v44  ;;  %4973 = vmatprep.subr.bf16.mxu1 %v6611_v48 }
 0x1b5   :  { %4943 = vmatpush1.bf16.msra.mxu0 %v6614_v54  ;;  %4975 = vmatpush1.bf16.msra.mxu1 %v6618_v58 }
 0x1b6   :  { %4945 = vmatprep.subr.bf16.mxu0 %v6622_v62  ;;  %4977 = vmatprep.subr.bf16.mxu1 %v6625_v4 }
 0x1b9   :  { %4947 = vmatpush1.bf16.msra.mxu0 %v6628_v9  ;;  %4979 = vmatpush1.bf16.msra.mxu1 %v6632_v14 }
 0x1ba   :  { %4949 = vmatprep.subr.bf16.mxu0 %v6636_v18  ;;  %4981 = vmatprep.subr.bf16.mxu1 %v6639_v22 }
 0x1bd   :  { %4951 = vmatpush1.bf16.msra.mxu0 %v6642_v25  ;;  %4983 = vmatpush1.bf16.msra.mxu1 %v6646_v27 }
 0x273   :  { %v826_v47 = vpop.f32.mrb[2].mxu0  ;;  %v897_v50 = vpop.f32.mrb[2].mxu1 }
 0x274   :  { %v5882_v53 = vadd.f32 %v826_v47, %v6702_v35  ;;  %v828_v56 = vpop.f32.mrb[3].mxu0  ;;  %v899_v60 = vpop.f32.mrb[3].mxu1  ;;  %v5898_v49 = vadd.f32 %v897_v50, %v6719_v59  ;;  %v6767_v47 = vpack.c.bf16 %v1187_v41, %v1183_v33  ;;  %v1182_v50 = vld [vmem:[#allocation8] sm:$0xff]  ;;  %v1448_v33 = vld [vmem:[#allocation8 + $0xb8] sm:$0xff] }
 0x275   :  { %v5883_v63 = vadd.f32 %v828_v56, %v6706_v38  ;;  %v5899_v45 = vadd.f32 %v899_v60, %v6713_v52  ;;  %v1441_v41 = vld [vmem:[#allocation8 + $0x80] sm:$0xff] }
 0x276   :  { %v4683_v42 = vmul.f32 -1.442695, %v5882_v53  ;;  %v1186_v53 = vld [vmem:[#allocation8 + $0x20] sm:$0xff]  ;;  %4985 = vmatprep.subr.bf16.mxu0 %v6767_v47 }
 0x277   :  { %v4684_v43 = vmul.f32 -1.442695, %v5883_v63  ;;  %v4685_v46 = vmul.f32 -1.442695, %v5899_v45  ;;  %v6771_v60 = vpack.c.bf16 %v1186_v53, %v1182_v50  ;;  %v1184_v63 = vld [vmem:[#allocation8 + $0x10] sm:$0xff]  ;;  %v1191_v45 = vld [vmem:[#allocation8 + $0x48] sm:$0xff] }
 0x278   :  { %6035 = vpow2.f32 %v4683_v42  ;;  %v1188_v42 = vld [vmem:[#allocation8 + $0x30] sm:$0xff] }
 0x279   :  { %6037 = vpow2.f32 %v4684_v43  ;;  %v6774_v43 = vpack.c.bf16 %v1188_v42, %v1184_v63  ;;  %v1443_v53 = vld [vmem:[#allocation8 + $0x90] sm:$0xff] }
 0x27a   :  { %6039 = vpow2.f32 %v4685_v46  ;;  %v1195_v46 = vld [vmem:[#allocation8 + $0x68] sm:$0xff]  ;;  %v1447_v63 = vld [vmem:[#allocation8 + $0xb0] sm:$0xff] }
 0x27b   :  { %6041 = vtanh.f32 %v5898_v49  ;;  %v1193_v49 = vld [vmem:[#allocation8 + $0x58] sm:$0xff]  ;;  %v6840_v42 = vpack.c.bf16 %v1447_v63, %v1443_v53 }
 0x27c   :  { %v1480_v53 = vld [vmem:[#allocation8 + $0x1b8] sm:$0xff] }
 0x282   :  { %v6036_v51 = vpop.eup %6035 }
 0x283   :  { %v6038_v57 = vpop.eup %6037  ;;  %v909_v61 = vadd.f32 1.0, %v6036_v51  ;;  %v6779_v51 = vpack.c.bf16 %v1195_v46, %v1191_v45  ;;  %v1450_v45 = vld [vmem:[#allocation8 + $0xc8] sm:$0xff] }
 0x284   :  { %v915_v1 = vadd.f32 1.0, %v6038_v57  ;;  %v6040_v2 = vpop.eup %6039  ;;  %v1197_v57 = vld [vmem:[#allocation8 + $0x78] sm:$0xff]  ;;  %v1454_v46 = vld [vmem:[#allocation8 + $0xe8] sm:$0xff] }
 0x285   :  { %6043 = vrcp.f32 %v909_v61  ;;  %v6042_v5 = vpop.eup %6041  ;;  %v922_v12 = vadd.f32 1.0, %v6040_v2  ;;  %v1190_v61 = vld [vmem:[#allocation8 + $0x40] sm:$0xff]  ;;  %v6781_v2 = vpack.c.bf16 %v1197_v57, %v1193_v49  ;;  %v1452_v49 = vld [vmem:[#allocation8 + $0xd8] sm:$0xff]  ;;  %v6845_v57 = vpack.c.bf16 %v1454_v46, %v1450_v45 }
 0x286   :  { %6045 = vrcp.f32 %v915_v1  ;;  %v1194_v1 = vld [vmem:[#allocation8 + $0x60] sm:$0xff] }
 0x287   :  { %6047 = vrcp.f32 %v922_v12  ;;  %v1473_v46 = vld [vmem:[#allocation8 + $0x180] sm:$0xff] }
 0x28f   :  { %v6044_v7 = vpop.eup %6043 }
 0x290   :  { %v6046_v8 = vpop.eup %6045  ;;  %v926_v11 = vmul.f32 %v6044_v7, %v6042_v5  ;;  %v6783_v5 = vpack.c.bf16 %v1194_v1, %v1190_v61  ;;  %v1192_v7 = vld [vmem:[#allocation8 + $0x50] sm:$0xff]  ;;  %v1456_v61 = vld [vmem:[#allocation8 + $0xf8] sm:$0xff]  ;;  %v1449_v1 = vld [vmem:[#allocation8 + $0xc0] sm:$0xff] }
 0x291   :  { %v925_v15 = vmul.f32 %v6046_v8, %v6722_v28  ;;  %v6048_v20 = vpop.eup %6047  ;;  %v1189_v28 = vld [vmem:[#allocation8 + $0x38] sm:$0xff]  ;;  %v1196_v8 = vld [vmem:[#allocation8 + $0x70] sm:$0xff] }
 0x292   :  { %v6769_v56 = vpack.c.bf16 %v1189_v28, %v1185_v39  ;;  %v1445_v39 = vld [vmem:[#allocation8 + $0xa0] sm:$0xff] }
 0x293   :  { %v6762_v17 = vadd.f32 %v926_v11, %v925_v15  ;;  %v6786_v11 = vpack.c.bf16 %v1196_v8, %v1192_v7  ;;  %v6837_v50 = vpack.c.bf16 %v1445_v39, %v1441_v41  ;;  %v1453_v7 = vld [vmem:[#allocation8 + $0xe0] sm:$0xff]  ;;  %v6847_v8 = vpack.c.bf16 %v1456_v61, %v1452_v49  ;;  %v1478_v41 = vld [vmem:[#allocation8 + $0x1a8] sm:$0xff]  ;;  %v1476_v39 = vld [vmem:[#allocation8 + $0x198] sm:$0xff] }
 0x294   :  { %5017 = vmatprep.subr.bf16.mxu1 %v6769_v56  ;;  %v6881_v45 = vpack.c.bf16 %v1480_v53, %v1476_v39  ;;  %v1477_v49 = vld [vmem:[#allocation8 + $0x1a0] sm:$0xff]  ;;  %v1475_v61 = vld [vmem:[#allocation8 + $0x190] sm:$0xff] }
 0x295   :  { %6049 = vtanh.f32 %v6762_v17 }
 0x29f   :  { %v6050_v21 = vpop.eup %6049 }
 0x2a0   :  { %v929_v24 = vmul.f32 %v6050_v21, %v6048_v20  ;;  %v1446_v20 = vld [vmem:[#allocation8 + $0xa8] sm:$0xff]  ;;  %v1444_v21 = vld [vmem:[#allocation8 + $0x98] sm:$0xff] }
 0x2a1   :  { %v6835_v28 = vpack.c.bf16 %v1448_v33, %v1444_v21  ;;  %v1474_v21 = vld [vmem:[#allocation8 + $0x188] sm:$0xff] }
 0x2a2   :  { %931 = vst [vmem:[#allocation12 + $0x8] sm:$0xff] %v929_v24  ;;  %1068 = vmatmul.mubr.f32.vlgmr.msra.gmra.mrb[4].mxu0 %v929_v24  ;;  %1139 = vmatmul.mubr.f32.vlgmr.msra.gmra.mrb[4].mxu1 %v929_v24  ;;  %v6879_v63 = vpack.c.bf16 %v1478_v41, %v1474_v21 }
 0x2a3   :  { %1310 = vmatprep.mubr.f32.mxu0 %v6424_v0  ;;  %1381 = vmatprep.mubr.f32.mxu1 %v6424_v0 }
 0x2a4   :  { %4987 = vmatpush1.bf16.msra.mxu0 %v6771_v60  ;;  %5019 = vmatpush1.bf16.msra.mxu1 %v6774_v43 }
 0x2a5   :  { %4989 = vmatprep.subr.bf16.mxu0 %v6779_v51  ;;  %5021 = vmatprep.subr.bf16.mxu1 %v6781_v2 }
 0x2a8   :  { %4991 = vmatpush1.bf16.msra.mxu0 %v6783_v5  ;;  %5023 = vmatpush1.bf16.msra.mxu1 %v6786_v11 }
 0x2a9   :  { %4993 = vmatprep.subr.bf16.mxu0 %v6566_v3  ;;  %5025 = vmatprep.subr.bf16.mxu1 %v6569_v6 }
 0x2ac   :  { %4995 = vmatpush1.bf16.msra.mxu0 %v6572_v10  ;;  %5027 = vmatpush1.bf16.msra.mxu1 %v6576_v13 }
 0x2ad   :  { %4997 = vmatprep.subr.bf16.mxu0 %v6580_v16  ;;  %5029 = vmatprep.subr.bf16.mxu1 %v6583_v19 }
 0x2b0   :  { %4999 = vmatpush1.bf16.msra.mxu0 %v6586_v23  ;;  %5031 = vmatpush1.bf16.msra.mxu1 %v6590_v26 }
 0x2b1   :  { %5001 = vmatprep.subr.bf16.mxu0 %v6594_v29  ;;  %5033 = vmatprep.subr.bf16.mxu1 %v6597_v32 }
 0x2b4   :  { %5003 = vmatpush1.bf16.msra.mxu0 %v6600_v36  ;;  %5035 = vmatpush1.bf16.msra.mxu1 %v6604_v40 }
 0x2b5   :  { %5005 = vmatprep.subr.bf16.mxu0 %v6608_v44  ;;  %5037 = vmatprep.subr.bf16.mxu1 %v6611_v48 }
 0x2b8   :  { %5007 = vmatpush1.bf16.msra.mxu0 %v6614_v54  ;;  %5039 = vmatpush1.bf16.msra.mxu1 %v6618_v58 }
 0x2b9   :  { %5009 = vmatprep.subr.bf16.mxu0 %v6622_v62  ;;  %5041 = vmatprep.subr.bf16.mxu1 %v6625_v4 }
 0x2bc   :  { %5011 = vmatpush1.bf16.msra.mxu0 %v6628_v9  ;;  %5043 = vmatpush1.bf16.msra.mxu1 %v6632_v14 }
 0x2bd   :  { %5013 = vmatprep.subr.bf16.mxu0 %v6636_v18  ;;  %5045 = vmatprep.subr.bf16.mxu1 %v6639_v22 }
 0x2c0   :  { %5015 = vmatpush1.bf16.msra.mxu0 %v6642_v25  ;;  %5047 = vmatpush1.bf16.msra.mxu1 %v6646_v27 }
 0x2c1   :  { %5049 = vmatprep.subr.bf16.mxu0 %v6767_v47  ;;  %5081 = vmatprep.subr.bf16.mxu1 %v6769_v56 }
 0x375   :  { %v1069_v3 = vpop.f32.mrb[4].mxu0  ;;  %v1140_v6 = vpop.f32.mrb[4].mxu1 }
 0x376   :  { %v5884_v10 = vadd.f32 %v1069_v3, %v6702_v35  ;;  %v1071_v13 = vpop.f32.mrb[5].mxu0  ;;  %v1142_v16 = vpop.f32.mrb[5].mxu1  ;;  %v5900_v36 = vadd.f32 %v1140_v6, %v6719_v59  ;;  %v6849_v3 = vpack.c.bf16 %v1453_v7, %v1449_v1  ;;  %v1451_v6 = vld [vmem:[#allocation8 + $0xd0] sm:$0xff]  ;;  %v6884_v1 = vpack.c.bf16 %v1477_v49, %v1473_v46 }
 0x377   :  { %v5885_v19 = vadd.f32 %v1071_v13, %v6706_v38  ;;  %v5901_v29 = vadd.f32 %v1142_v16, %v6713_v52  ;;  %v1458_v16 = vld [vmem:[#allocation8 + $0x108] sm:$0xff]  ;;  %v1479_v7 = vld [vmem:[#allocation8 + $0x1b0] sm:$0xff] }
 0x378   :  { %v4686_v23 = vmul.f32 -1.442695, %v5884_v10  ;;  %v1455_v10 = vld [vmem:[#allocation8 + $0xf0] sm:$0xff] }
 0x379   :  { %v4687_v26 = vmul.f32 -1.442695, %v5885_v19  ;;  %v4688_v32 = vmul.f32 -1.442695, %v5901_v29  ;;  %v6852_v13 = vpack.c.bf16 %v1455_v10, %v1451_v6  ;;  %v1462_v19 = vld [vmem:[#allocation8 + $0x128] sm:$0xff]  ;;  %v1464_v29 = vld [vmem:[#allocation8 + $0x138] sm:$0xff] }
 0x37a   :  { %6051 = vpow2.f32 %v4686_v23  ;;  %v1460_v23 = vld [vmem:[#allocation8 + $0x118] sm:$0xff]  ;;  %v1482_v6 = vld [vmem:[#allocation8 + $0x1c8] sm:$0xff] }
 0x37b   :  { %6053 = vpow2.f32 %v4687_v26  ;;  %v6857_v26 = vpack.c.bf16 %v1462_v19, %v1458_v16  ;;  %v1486_v10 = vld [vmem:[#allocation8 + $0x1e8] sm:$0xff]  ;;  %v6888_v16 = vpack.c.bf16 %v1479_v7, %v1475_v61 }
 0x37c   :  { %6055 = vpow2.f32 %v4688_v32  ;;  %v1457_v32 = vld [vmem:[#allocation8 + $0x100] sm:$0xff]  ;;  %v6890_v19 = vpack.c.bf16 %v1486_v10, %v1482_v6 }
 0x37d   :  { %6057 = vtanh.f32 %v5900_v36  ;;  %v1461_v36 = vld [vmem:[#allocation8 + $0x120] sm:$0xff] }
 0x384   :  { %v6052_v40 = vpop.eup %6051 }
 0x385   :  { %v6054_v44 = vpop.eup %6053  ;;  %v1152_v48 = vadd.f32 1.0, %v6052_v40  ;;  %v6859_v40 = vpack.c.bf16 %v1464_v29, %v1460_v23  ;;  %v1484_v23 = vld [vmem:[#allocation8 + $0x1d8] sm:$0xff] }
 0x386   :  { %v1158_v54 = vadd.f32 1.0, %v6054_v44  ;;  %v6056_v58 = vpop.eup %6055  ;;  %v6861_v44 = vpack.c.bf16 %v1461_v36, %v1457_v32  ;;  %v1488_v29 = vld [vmem:[#allocation8 + $0x1f8] sm:$0xff]  ;;  %v1481_v32 = vld [vmem:[#allocation8 + $0x1c0] sm:$0xff] }
 0x387   :  { %6059 = vrcp.f32 %v1152_v48  ;;  %v6058_v62 = vpop.eup %6057  ;;  %v1165_v18 = vadd.f32 1.0, %v6056_v58  ;;  %v1459_v48 = vld [vmem:[#allocation8 + $0x110] sm:$0xff]  ;;  %v6893_v36 = vpack.c.bf16 %v1488_v29, %v1484_v23 }
 0x388   :  { %6061 = vrcp.f32 %v1158_v54  ;;  %v1463_v54 = vld [vmem:[#allocation8 + $0x130] sm:$0xff] }
 0x389   :  { %6063 = vrcp.f32 %v1165_v18  ;;  %v6864_v58 = vpack.c.bf16 %v1463_v54, %v1459_v48  ;;  %v1472_v18 = vld [vmem:[#allocation8 + $0x178] sm:$0xff]  ;;  %v1485_v48 = vld [vmem:[#allocation8 + $0x1e0] sm:$0xff]  ;;  %v1483_v54 = vld [vmem:[#allocation8 + $0x1d0] sm:$0xff] }
 0x391   :  { %v6060_v4 = vpop.eup %6059 }
 0x392   :  { %v6062_v9 = vpop.eup %6061  ;;  %v1169_v14 = vmul.f32 %v6060_v4, %v6058_v62  ;;  %v1466_v62 = vld [vmem:[#allocation8 + $0x148] sm:$0xff] }
 0x393   :  { %v1168_v22 = vmul.f32 %v6062_v9, %v6762_v17  ;;  %v6064_v27 = vpop.eup %6063  ;;  %v1442_v17 = vld [vmem:[#allocation8 + $0x88] sm:$0xff]  ;;  %v1468_v9 = vld [vmem:[#allocation8 + $0x158] sm:$0xff] }
 0x394   :  { %v6833_v24 = vpack.c.bf16 %v1446_v20, %v1442_v17  ;;  %v1470_v4 = vld [vmem:[#allocation8 + $0x168] sm:$0xff]  ;;  %v1467_v17 = vld [vmem:[#allocation8 + $0x150] sm:$0xff] }
 0x395   :  { %v6822_v25 = vadd.f32 %v1169_v14, %v1168_v22  ;;  %v6868_v14 = vpack.c.bf16 %v1470_v4, %v1466_v62  ;;  %v1465_v22 = vld [vmem:[#allocation8 + $0x140] sm:$0xff]  ;;  %v1471_v20 = vld [vmem:[#allocation8 + $0x170] sm:$0xff]  ;;  %v6896_v4 = vpack.c.bf16 %v1485_v48, %v1481_v32 }
 0x396   :  { %v6876_v33 = vpack.c.bf16 %v1471_v20, %v1467_v17  ;;  %v1487_v62 = vld [vmem:[#allocation8 + $0x1f0] sm:$0xff] }
 0x397   :  { %6065 = vtanh.f32 %v6822_v25 }
 0x3a1   :  { %v6066_v12 = vpop.eup %6065 }
 0x3a2   :  { %v1172_v15 = vmul.f32 %v6066_v12, %v6064_v27  ;;  %v1469_v27 = vld [vmem:[#allocation8 + $0x160] sm:$0xff]  ;;  %v6871_v12 = vpack.c.bf16 %v1472_v18, %v1468_v9  ;;  %v6900_v9 = vpack.c.bf16 %v1487_v62, %v1483_v54 }
 0x3a4   :  { %1174 = vst [vmem:[#allocation12 + $0x10] sm:$0xff] %v1172_v15  ;;  %1311 = vmatmul.mubr.f32.vlgmr.msra.gmra.mrb[6].mxu0 %v1172_v15  ;;  %1382 = vmatmul.mubr.f32.vlgmr.msra.gmra.mrb[6].mxu1 %v1172_v15  ;;  %v6873_v15 = vpack.c.bf16 %v1469_v27, %v1465_v22 }
 0x3a5   :  { %5051 = vmatpush1.bf16.msra.mxu0 %v6771_v60  ;;  %5083 = vmatpush1.bf16.msra.mxu1 %v6774_v43 }
 0x3a6   :  { %5053 = vmatprep.subr.bf16.mxu0 %v6779_v51  ;;  %5085 = vmatprep.subr.bf16.mxu1 %v6781_v2 }
 0x3a7   :  { %1553 = vmatprep.mubr.f32.mxu0 %v6424_v0  ;;  %1624 = vmatprep.mubr.f32.mxu1 %v6424_v0 }
 0x3a9   :  { %5055 = vmatpush1.bf16.msra.mxu0 %v6783_v5  ;;  %5087 = vmatpush1.bf16.msra.mxu1 %v6786_v11 }
 0x3aa   :  { %5057 = vmatprep.subr.bf16.mxu0 %v6833_v24  ;;  %5089 = vmatprep.subr.bf16.mxu1 %v6835_v28 }
 0x3ad   :  { %5059 = vmatpush1.bf16.msra.mxu0 %v6837_v50  ;;  %5091 = vmatpush1.bf16.msra.mxu1 %v6840_v42 }
 0x3ae   :  { %5061 = vmatprep.subr.bf16.mxu0 %v6845_v57  ;;  %5093 = vmatprep.subr.bf16.mxu1 %v6847_v8 }
 0x3b1   :  { %5063 = vmatpush1.bf16.msra.mxu0 %v6849_v3  ;;  %5095 = vmatpush1.bf16.msra.mxu1 %v6852_v13 }
 0x3b2   :  { %5065 = vmatprep.subr.bf16.mxu0 %v6857_v26  ;;  %5097 = vmatprep.subr.bf16.mxu1 %v6859_v40 }
 0x3b5   :  { %5067 = vmatpush1.bf16.msra.mxu0 %v6861_v44  ;;  %5099 = vmatpush1.bf16.msra.mxu1 %v6864_v58 }
 0x3b6   :  { %5069 = vmatprep.subr.bf16.mxu0 %v6868_v14  ;;  %5101 = vmatprep.subr.bf16.mxu1 %v6871_v12 }
 0x3b9   :  { %5071 = vmatpush1.bf16.msra.mxu0 %v6873_v15  ;;  %5103 = vmatpush1.bf16.msra.mxu1 %v6876_v33 }
 0x3ba   :  { %5073 = vmatprep.subr.bf16.mxu0 %v6879_v63  ;;  %5105 = vmatprep.subr.bf16.mxu1 %v6881_v45 }
 0x3bd   :  { %5075 = vmatpush1.bf16.msra.mxu0 %v6884_v1  ;;  %5107 = vmatpush1.bf16.msra.mxu1 %v6888_v16 }
 0x3be   :  { %5077 = vmatprep.subr.bf16.mxu0 %v6890_v19  ;;  %5109 = vmatprep.subr.bf16.mxu1 %v6893_v36 }
 0x3c1   :  { %5079 = vmatpush1.bf16.msra.mxu0 %v6896_v4  ;;  %5111 = vmatpush1.bf16.msra.mxu1 %v6900_v9 }
 0x3c2   :  { %5113 = vmatprep.subr.bf16.mxu0 %v6767_v47  ;;  %5145 = vmatprep.subr.bf16.mxu1 %v6769_v56 }
 0x477   :  { %v1312_v18 = vpop.f32.mrb[6].mxu0  ;;  %v1383_v22 = vpop.f32.mrb[6].mxu1 }
 0x478   :  { %v5886_v27 = vadd.f32 %v1312_v18, %v6702_v35  ;;  %v1314_v17 = vpop.f32.mrb[7].mxu0  ;;  %v1385_v20 = vpop.f32.mrb[7].mxu1  ;;  %v5902_v49 = vadd.f32 %v1383_v22, %v6719_v59 }
 0x479   :  { %v5887_v21 = vadd.f32 %v1314_v17, %v6706_v38  ;;  %v5903_v53 = vadd.f32 %v1385_v20, %v6713_v52 }
 0x47a   :  { %v4689_v41 = vmul.f32 -1.442695, %v5886_v27 }
 0x47b   :  { %v4690_v39 = vmul.f32 -1.442695, %v5887_v21  ;;  %v4691_v46 = vmul.f32 -1.442695, %v5903_v53 }
 0x47c   :  { %6067 = vpow2.f32 %v4689_v41 }
 0x47d   :  { %6069 = vpow2.f32 %v4690_v39 }
 0x47e   :  { %6071 = vpow2.f32 %v4691_v46 }
 0x47f   :  { %6073 = vtanh.f32 %v5902_v49 }
 0x486   :  { %v6068_v61 = vpop.eup %6067 }
 0x487   :  { %v6070_v7 = vpop.eup %6069  ;;  %v1395_v6 = vadd.f32 1.0, %v6068_v61 }
 0x488   :  { %v1401_v10 = vadd.f32 1.0, %v6070_v7  ;;  %v6072_v23 = vpop.eup %6071 }
 0x489   :  { %6075 = vrcp.f32 %v1395_v6  ;;  %v6074_v29 = vpop.eup %6073  ;;  %v1408_v62 = vadd.f32 1.0, %v6072_v23 }
 0x48a   :  { %6077 = vrcp.f32 %v1401_v10 }
 0x48b   :  { %6079 = vrcp.f32 %v1408_v62 }
 0x493   :  { %v6076_v32 = vpop.eup %6075 }
 0x494   :  { %v6078_v48 = vpop.eup %6077  ;;  %v1412_v54 = vmul.f32 %v6076_v32, %v6074_v29 }
 0x495   :  { %v1411_v18 = vmul.f32 %v6078_v48, %v6822_v25  ;;  %v6080_v22 = vpop.eup %6079 }
 0x497   :  { %v6912_v27 = vadd.f32 %v1412_v54, %v1411_v18 }
 0x499   :  { %6081 = vtanh.f32 %v6912_v27 }
 0x4a3   :  { %v6082_v17 = vpop.eup %6081 }
 0x4a4   :  { %v1415_v20 = vmul.f32 %v6082_v17, %v6080_v22 }
 0x4a6   :  { %1417 = vst [vmem:[#allocation12 + $0x18] sm:$0xff] %v1415_v20  ;;  %1554 = vmatmul.mubr.f32.vlgmr.msra.gmra.mrb[8].mxu0 %v1415_v20  ;;  %1625 = vmatmul.mubr.f32.vlgmr.msra.gmra.mrb[8].mxu1 %v1415_v20 }
 0x4a7   :  { %5115 = vmatpush1.bf16.msra.mxu0 %v6771_v60  ;;  %5147 = vmatpush1.bf16.msra.mxu1 %v6774_v43 }
 0x4a8   :  { %5117 = vmatprep.subr.bf16.mxu0 %v6779_v51  ;;  %5149 = vmatprep.subr.bf16.mxu1 %v6781_v2 }
 0x4a9   :  { %1796 = vmatprep.mubr.f32.mxu0 %v6424_v0  ;;  %1867 = vmatprep.mubr.f32.mxu1 %v6424_v0 }
 0x4ab   :  { %5119 = vmatpush1.bf16.msra.mxu0 %v6783_v5  ;;  %5151 = vmatpush1.bf16.msra.mxu1 %v6786_v11 }
 0x4ac   :  { %5121 = vmatprep.subr.bf16.mxu0 %v6833_v24  ;;  %5153 = vmatprep.subr.bf16.mxu1 %v6835_v28 }
 0x4af   :  { %5123 = vmatpush1.bf16.msra.mxu0 %v6837_v50  ;;  %5155 = vmatpush1.bf16.msra.mxu1 %v6840_v42 }
 0x4b0   :  { %5125 = vmatprep.subr.bf16.mxu0 %v6845_v57  ;;  %5157 = vmatprep.subr.bf16.mxu1 %v6847_v8 }
 0x4b3   :  { %5127 = vmatpush1.bf16.msra.mxu0 %v6849_v3  ;;  %5159 = vmatpush1.bf16.msra.mxu1 %v6852_v13 }
 0x4b4   :  { %5129 = vmatprep.subr.bf16.mxu0 %v6857_v26  ;;  %5161 = vmatprep.subr.bf16.mxu1 %v6859_v40 }
 0x4b7   :  { %5131 = vmatpush1.bf16.msra.mxu0 %v6861_v44  ;;  %5163 = vmatpush1.bf16.msra.mxu1 %v6864_v58 }
 0x4b8   :  { %5133 = vmatprep.subr.bf16.mxu0 %v6868_v14  ;;  %5165 = vmatprep.subr.bf16.mxu1 %v6871_v12 }
 0x4bb   :  { %5135 = vmatpush1.bf16.msra.mxu0 %v6873_v15  ;;  %5167 = vmatpush1.bf16.msra.mxu1 %v6876_v33 }
 0x4bc   :  { %5137 = vmatprep.subr.bf16.mxu0 %v6879_v63  ;;  %5169 = vmatprep.subr.bf16.mxu1 %v6881_v45 }
 0x4bf   :  { %5139 = vmatpush1.bf16.msra.mxu0 %v6884_v1  ;;  %5171 = vmatpush1.bf16.msra.mxu1 %v6888_v16 }
 0x4c0   :  { %5141 = vmatprep.subr.bf16.mxu0 %v6890_v19  ;;  %5173 = vmatprep.subr.bf16.mxu1 %v6893_v36 }
 0x4c3   :  { %5143 = vmatpush1.bf16.msra.mxu0 %v6896_v4  ;;  %5175 = vmatpush1.bf16.msra.mxu1 %v6900_v9 }
 0x4c4   :  { %5177 = vmatprep.subr.bf16.mxu0 %v6767_v47  ;;  %5209 = vmatprep.subr.bf16.mxu1 %v6769_v56 }
 0x579   :  { %v1555_v25 = vpop.f32.mrb[8].mxu0  ;;  %v1626_v21 = vpop.f32.mrb[8].mxu1 }
 0x57a   :  { %v5888_v41 = vadd.f32 %v1555_v25, %v6702_v35  ;;  %v1557_v39 = vpop.f32.mrb[9].mxu0  ;;  %v1628_v53 = vpop.f32.mrb[9].mxu1  ;;  %v5904_v10 = vadd.f32 %v1626_v21, %v6719_v59 }
 0x57b   :  { %v5889_v46 = vadd.f32 %v1557_v39, %v6706_v38  ;;  %v5905_v7 = vadd.f32 %v1628_v53, %v6713_v52 }
 0x57c   :  { %v4692_v49 = vmul.f32 -1.442695, %v5888_v41 }
 0x57d   :  { %v4693_v61 = vmul.f32 -1.442695, %v5889_v46  ;;  %v4694_v6 = vmul.f32 -1.442695, %v5905_v7 }
 0x57e   :  { %6083 = vpow2.f32 %v4692_v49 }
 0x57f   :  { %6085 = vpow2.f32 %v4693_v61 }
 0x580   :  { %6087 = vpow2.f32 %v4694_v6 }
 0x581   :  { %6089 = vtanh.f32 %v5904_v10 }
 0x588   :  { %v6084_v47 = vpop.eup %6083 }
 0x589   :  { %v6086_v23 = vpop.eup %6085  ;;  %v1638_v56 = vadd.f32 1.0, %v6084_v47 }
 0x58a   :  { %v1644_v29 = vadd.f32 1.0, %v6086_v23  ;;  %v6088_v32 = vpop.eup %6087 }
 0x58b   :  { %6091 = vrcp.f32 %v1638_v56  ;;  %v6090_v48 = vpop.eup %6089  ;;  %v1651_v22 = vadd.f32 1.0, %v6088_v32 }
 0x58c   :  { %6093 = vrcp.f32 %v1644_v29 }
 0x58d   :  { %6095 = vrcp.f32 %v1651_v22 }
 0x595   :  { %v6092_v54 = vpop.eup %6091 }
 0x596   :  { %v6094_v62 = vpop.eup %6093  ;;  %v1655_v18 = vmul.f32 %v6092_v54, %v6090_v48 }
 0x597   :  { %v1654_v17 = vmul.f32 %v6094_v62, %v6912_v27  ;;  %v6096_v25 = vpop.eup %6095 }
 0x599   :  { %v6954_v20 = vadd.f32 %v1655_v18, %v1654_v17 }
 0x59b   :  { %6097 = vtanh.f32 %v6954_v20 }
 0x5a5   :  { %v6098_v21 = vpop.eup %6097 }
 0x5a6   :  { %v6957_v41 = vmul.f32 %v6098_v21, %v6096_v25  ;;  %v2155_v25 = vld [vmem:[#allocation8 + $0x8] sm:$0xff] }
 0x5a7   :  { %v2159_v21 = vld [vmem:[#allocation8 + $0x28] sm:$0xff] }
 0x5a8   :  { %1797 = vmatmul.mubr.f32.vlgmr.msra.gmra.mrb[10].mxu0 %v6957_v41  ;;  %1868 = vmatmul.mubr.f32.vlgmr.msra.gmra.mrb[10].mxu1 %v6957_v41 }
 0x5a9   :  { %5179 = vmatpush1.bf16.msra.mxu0 %v6771_v60  ;;  %5211 = vmatpush1.bf16.msra.mxu1 %v6774_v43 }
 0x5aa   :  { %5181 = vmatprep.subr.bf16.mxu0 %v6779_v51  ;;  %5213 = vmatprep.subr.bf16.mxu1 %v6781_v2 }
 0x5ab   :  { %2039 = vmatprep.mubr.f32.mxu0 %v6424_v0  ;;  %2110 = vmatprep.mubr.f32.mxu1 %v6424_v0 }
 0x5ad   :  { %5183 = vmatpush1.bf16.msra.mxu0 %v6783_v5  ;;  %5215 = vmatpush1.bf16.msra.mxu1 %v6786_v11 }
 0x5ae   :  { %5185 = vmatprep.subr.bf16.mxu0 %v6833_v24  ;;  %5217 = vmatprep.subr.bf16.mxu1 %v6835_v28 }
 0x5b1   :  { %5187 = vmatpush1.bf16.msra.mxu0 %v6837_v50  ;;  %5219 = vmatpush1.bf16.msra.mxu1 %v6840_v42 }
 0x5b2   :  { %5189 = vmatprep.subr.bf16.mxu0 %v6845_v57  ;;  %5221 = vmatprep.subr.bf16.mxu1 %v6847_v8 }
 0x5b5   :  { %5191 = vmatpush1.bf16.msra.mxu0 %v6849_v3  ;;  %5223 = vmatpush1.bf16.msra.mxu1 %v6852_v13 }
 0x5b6   :  { %5193 = vmatprep.subr.bf16.mxu0 %v6857_v26  ;;  %5225 = vmatprep.subr.bf16.mxu1 %v6859_v40 }
 0x5b9   :  { %5195 = vmatpush1.bf16.msra.mxu0 %v6861_v44  ;;  %5227 = vmatpush1.bf16.msra.mxu1 %v6864_v58 }
 0x5ba   :  { %5197 = vmatprep.subr.bf16.mxu0 %v6868_v14  ;;  %5229 = vmatprep.subr.bf16.mxu1 %v6871_v12 }
 0x5bd   :  { %5199 = vmatpush1.bf16.msra.mxu0 %v6873_v15  ;;  %5231 = vmatpush1.bf16.msra.mxu1 %v6876_v33 }
 0x5be   :  { %5201 = vmatprep.subr.bf16.mxu0 %v6879_v63  ;;  %5233 = vmatprep.subr.bf16.mxu1 %v6881_v45 }
 0x5c1   :  { %5203 = vmatpush1.bf16.msra.mxu0 %v6884_v1  ;;  %5235 = vmatpush1.bf16.msra.mxu1 %v6888_v16 }
 0x5c2   :  { %5205 = vmatprep.subr.bf16.mxu0 %v6890_v19  ;;  %5237 = vmatprep.subr.bf16.mxu1 %v6893_v36 }
 0x5c5   :  { %5207 = vmatpush1.bf16.msra.mxu0 %v6896_v4  ;;  %5239 = vmatpush1.bf16.msra.mxu1 %v6900_v9 }
 0x67b   :  { %v1798_v60 = vpop.f32.mrb[10].mxu0  ;;  %v1869_v43 = vpop.f32.mrb[10].mxu1 }
 0x67c   :  { %v5890_v51 = vadd.f32 %v1798_v60, %v6702_v35  ;;  %v1800_v2 = vpop.f32.mrb[11].mxu0  ;;  %v1871_v5 = vpop.f32.mrb[11].mxu1  ;;  %v5906_v49 = vadd.f32 %v1869_v43, %v6719_v59  ;;  %v5240_v60 = vpack.c.bf16 %v2159_v21, %v2155_v25  ;;  %v2161_v43 = vld [vmem:[#allocation8 + $0x38] sm:$0xff] }
 0x67d   :  { %v5891_v11 = vadd.f32 %v1800_v2, %v6706_v38  ;;  %v5907_v53 = vadd.f32 %v1871_v5, %v6713_v52  ;;  %v2158_v2 = vld [vmem:[#allocation8 + $0x20] sm:$0xff] }
 0x67e   :  { %v4695_v27 = vmul.f32 -1.442695, %v5890_v51  ;;  %v2154_v51 = vld [vmem:[#allocation8] sm:$0xff]  ;;  %5241 = vmatprep.subr.bf16.mxu0 %v5240_v60 }
 0x67f   :  { %v4696_v39 = vmul.f32 -1.442695, %v5891_v11  ;;  %v4697_v46 = vmul.f32 -1.442695, %v5907_v53  ;;  %v5242_v11 = vpack.c.bf16 %v2158_v2, %v2154_v51  ;;  %v2402_v60 = vld [vmem:[#allocation9 + $0x20] sm:$0xff]  ;;  %v2404_v51 = vld [vmem:[#allocation9 + $0x30] sm:$0xff] }
 0x680   :  { %6099 = vpow2.f32 %v4695_v27  ;;  %v2156_v27 = vld [vmem:[#allocation8 + $0x10] sm:$0xff]  ;;  %v2407_v2 = vld [vmem:[#allocation9 + $0x48] sm:$0xff] }
 0x681   :  { %6101 = vpow2.f32 %v4696_v39  ;;  %v2160_v39 = vld [vmem:[#allocation8 + $0x30] sm:$0xff] }
 0x682   :  { %6103 = vpow2.f32 %v4697_v46  ;;  %v5274_v53 = vpack.c.bf16 %v2160_v39, %v2156_v27  ;;  %v2163_v46 = vld [vmem:[#allocation8 + $0x48] sm:$0xff]  ;;  %v2413_v27 = vld [vmem:[#allocation9 + $0x78] sm:$0xff] }
 0x683   :  { %6105 = vtanh.f32 %v5906_v49  ;;  %v2167_v49 = vld [vmem:[#allocation8 + $0x68] sm:$0xff] }
 0x68a   :  { %v6100_v61 = vpop.eup %6099 }
 0x68b   :  { %v6102_v7 = vpop.eup %6101  ;;  %v1881_v6 = vadd.f32 1.0, %v6100_v61  ;;  %v2165_v61 = vld [vmem:[#allocation8 + $0x58] sm:$0xff] }
 0x68c   :  { %v1887_v10 = vadd.f32 1.0, %v6102_v7  ;;  %v6104_v47 = vpop.eup %6103  ;;  %v5244_v7 = vpack.c.bf16 %v2167_v49, %v2163_v46 }
 0x68d   :  { %6107 = vrcp.f32 %v1881_v6  ;;  %v6106_v23 = vpop.eup %6105  ;;  %v1894_v48 = vadd.f32 1.0, %v6104_v47  ;;  %v2169_v6 = vld [vmem:[#allocation8 + $0x78] sm:$0xff]  ;;  %v2166_v47 = vld [vmem:[#allocation8 + $0x60] sm:$0xff] }
 0x68e   :  { %6109 = vrcp.f32 %v1887_v10  ;;  %v2162_v10 = vld [vmem:[#allocation8 + $0x40] sm:$0xff] }
 0x68f   :  { %6111 = vrcp.f32 %v1894_v48 }
 0x697   :  { %v6108_v56 = vpop.eup %6107 }
 0x698   :  { %v6110_v29 = vpop.eup %6109  ;;  %v1898_v32 = vmul.f32 %v6108_v56, %v6106_v23  ;;  %v5276_v23 = vpack.c.bf16 %v2169_v6, %v2165_v61  ;;  %v5246_v56 = vpack.c.bf16 %v2166_v47, %v2162_v10  ;;  %v2406_v61 = vld [vmem:[#allocation9 + $0x40] sm:$0xff]  ;;  %v2408_v47 = vld [vmem:[#allocation9 + $0x50] sm:$0xff] }
 0x699   :  { %v1897_v54 = vmul.f32 %v6110_v29, %v6954_v20  ;;  %v6112_v18 = vpop.eup %6111  ;;  %v2157_v20 = vld [vmem:[#allocation8 + $0x18] sm:$0xff]  ;;  %v2164_v29 = vld [vmem:[#allocation8 + $0x50] sm:$0xff] }
 0x69a   :  { %v5272_v5 = vpack.c.bf16 %v2161_v43, %v2157_v20  ;;  %v2398_v20 = vld [vmem:[#allocation9] sm:$0xff]  ;;  %v2400_v43 = vld [vmem:[#allocation9 + $0x10] sm:$0xff] }
 0x69b   :  { %v6998_v62 = vadd.f32 %v1898_v32, %v1897_v54  ;;  %v2168_v32 = vld [vmem:[#allocation8 + $0x70] sm:$0xff]  ;;  %v5306_v46 = vpack.c.bf16 %v2402_v60, %v2398_v20  ;;  %v5338_v49 = vpack.c.bf16 %v2404_v51, %v2400_v43 }
 0x69c   :  { %5273 = vmatprep.subr.bf16.mxu1 %v5272_v5  ;;  %v5278_v48 = vpack.c.bf16 %v2168_v32, %v2164_v29  ;;  %v2411_v5 = vld [vmem:[#allocation9 + $0x68] sm:$0xff]  ;;  %v2417_v32 = vld [vmem:[#allocation9 + $0x98] sm:$0xff]  ;;  %v2432_v43 = vld [vmem:[#allocation9 + $0x110] sm:$0xff] }
 0x69d   :  { %6113 = vtanh.f32 %v6998_v62  ;;  %v5308_v6 = vpack.c.bf16 %v2411_v5, %v2407_v2  ;;  %v2419_v29 = vld [vmem:[#allocation9 + $0xa8] sm:$0xff]  ;;  %v2436_v51 = vld [vmem:[#allocation9 + $0x130] sm:$0xff] }
 0x69e   :  { %v2439_v2 = vld [vmem:[#allocation9 + $0x148] sm:$0xff] }
 0x69f   :  { %v2443_v5 = vld [vmem:[#allocation9 + $0x168] sm:$0xff] }
 0x6a7   :  { %v6114_v22 = vpop.eup %6113 }
 0x6a8   :  { %v7001_v17 = vmul.f32 %v6114_v22, %v6112_v18 }
 0x6aa   :  { %2040 = vmatmul.mubr.f32.vlgmr.msra.gmra.mrb[12].mxu0 %v7001_v17  ;;  %2111 = vmatmul.mubr.f32.vlgmr.msra.gmra.mrb[12].mxu1 %v7001_v17 }
 0x6ab   :  { %2282 = vmatprep.mubr.f32.mxu0 %v6424_v0  ;;  %2353 = vmatprep.mubr.f32.mxu1 %v6424_v0 }
 0x6ac   :  { %5243 = vmatpush1.bf16.msra.mxu0 %v5242_v11  ;;  %5275 = vmatpush1.bf16.msra.mxu1 %v5274_v53  ;;  %v2409_v11 = vld [vmem:[#allocation9 + $0x58] sm:$0xff] }
 0x6ad   :  { %5245 = vmatprep.subr.bf16.mxu0 %v5244_v7  ;;  %5277 = vmatprep.subr.bf16.mxu1 %v5276_v23  ;;  %v2410_v7 = vld [vmem:[#allocation9 + $0x60] sm:$0xff]  ;;  %v5340_v10 = vpack.c.bf16 %v2413_v27, %v2409_v11  ;;  %v2412_v23 = vld [vmem:[#allocation9 + $0x70] sm:$0xff]  ;;  %v2441_v11 = vld [vmem:[#allocation9 + $0x158] sm:$0xff] }
 0x6ae   :  { %v2445_v27 = vld [vmem:[#allocation9 + $0x178] sm:$0xff] }
 0x6b0   :  { %5247 = vmatpush1.bf16.msra.mxu0 %v5246_v56  ;;  %5279 = vmatpush1.bf16.msra.mxu1 %v5278_v48  ;;  %v2415_v56 = vld [vmem:[#allocation9 + $0x88] sm:$0xff]  ;;  %v2421_v48 = vld [vmem:[#allocation9 + $0xb8] sm:$0xff] }
 0x6b1   :  { %5249 = vmatprep.subr.bf16.mxu0 %v6833_v24  ;;  %5281 = vmatprep.subr.bf16.mxu1 %v6835_v28  ;;  %v2399_v24 = vld [vmem:[#allocation9 + $0x8] sm:$0xff] }
 0x6b2   :  { %v2403_v28 = vld [vmem:[#allocation9 + $0x28] sm:$0xff] }
 0x6b4   :  { %5251 = vmatpush1.bf16.msra.mxu0 %v6837_v50  ;;  %5283 = vmatpush1.bf16.msra.mxu1 %v6840_v42  ;;  %v2401_v50 = vld [vmem:[#allocation9 + $0x18] sm:$0xff] }
 0x6b5   :  { %5253 = vmatprep.subr.bf16.mxu0 %v6845_v57  ;;  %5285 = vmatprep.subr.bf16.mxu1 %v6847_v8  ;;  %v2405_v42 = vld [vmem:[#allocation9 + $0x38] sm:$0xff]  ;;  %v5304_v57 = vpack.c.bf16 %v2403_v28, %v2399_v24  ;;  %v5310_v24 = vpack.c.bf16 %v2410_v7, %v2406_v61  ;;  %v5342_v28 = vpack.c.bf16 %v2412_v23, %v2408_v47  ;;  %v2447_v47 = vld [vmem:[#allocation9 + $0x188] sm:$0xff] }
 0x6b6   :  { %v5336_v8 = vpack.c.bf16 %v2405_v42, %v2401_v50  ;;  %v2414_v50 = vld [vmem:[#allocation9 + $0x80] sm:$0xff]  ;;  %v5324_v61 = vpack.c.bf16 %v2443_v5, %v2439_v2  ;;  %v5356_v7 = vpack.c.bf16 %v2445_v27, %v2441_v11  ;;  %v2451_v23 = vld [vmem:[#allocation9 + $0x1a8] sm:$0xff]  ;;  %v2752_v2 = vld [vmem:[#allocation11 + $0x30] sm:$0xff] }
 0x6b7   :  { %v2418_v42 = vld [vmem:[#allocation9 + $0xa0] sm:$0xff]  ;;  %v2755_v5 = vld [vmem:[#allocation11 + $0x48] sm:$0xff]  ;;  %v2757_v27 = vld [vmem:[#allocation11 + $0x58] sm:$0xff] }
 0x6b8   :  { %5255 = vmatpush1.bf16.msra.mxu0 %v6849_v3  ;;  %5287 = vmatpush1.bf16.msra.mxu1 %v6852_v13  ;;  %v2759_v11 = vld [vmem:[#allocation11 + $0x68] sm:$0xff] }
 0x6b9   :  { %5257 = vmatprep.subr.bf16.mxu0 %v6857_v26  ;;  %5289 = vmatprep.subr.bf16.mxu1 %v6859_v40 }
 0x6bc   :  { %5259 = vmatpush1.bf16.msra.mxu0 %v6861_v44  ;;  %5291 = vmatpush1.bf16.msra.mxu1 %v6864_v58 }
 0x6bd   :  { %5261 = vmatprep.subr.bf16.mxu0 %v6868_v14  ;;  %5293 = vmatprep.subr.bf16.mxu1 %v6871_v12 }
 0x6c0   :  { %5263 = vmatpush1.bf16.msra.mxu0 %v6873_v15  ;;  %5295 = vmatpush1.bf16.msra.mxu1 %v6876_v33 }
 0x6c1   :  { %5265 = vmatprep.subr.bf16.mxu0 %v6879_v63  ;;  %5297 = vmatprep.subr.bf16.mxu1 %v6881_v45 }
 0x6c4   :  { %5267 = vmatpush1.bf16.msra.mxu0 %v6884_v1  ;;  %5299 = vmatpush1.bf16.msra.mxu1 %v6888_v16 }
 0x6c5   :  { %5269 = vmatprep.subr.bf16.mxu0 %v6890_v19  ;;  %5301 = vmatprep.subr.bf16.mxu1 %v6893_v36 }
 0x6c8   :  { %5271 = vmatpush1.bf16.msra.mxu0 %v6896_v4  ;;  %5303 = vmatpush1.bf16.msra.mxu1 %v6900_v9 }
 0x6c9   :  { %5305 = vmatprep.subr.bf16.mxu0 %v5304_v57  ;;  %5337 = vmatprep.subr.bf16.mxu1 %v5336_v8  ;;  %v5312_v57 = vpack.c.bf16 %v2419_v29, %v2415_v56  ;;  %v5344_v8 = vpack.c.bf16 %v2421_v48, %v2417_v32  ;;  %v2449_v56 = vld [vmem:[#allocation9 + $0x198] sm:$0xff] }
 0x6ca   :  { %v2453_v29 = vld [vmem:[#allocation9 + $0x1b8] sm:$0xff] }
 0x77d   :  { %v2041_v3 = vpop.f32.mrb[12].mxu0  ;;  %v2112_v13 = vpop.f32.mrb[12].mxu1 }
 0x77e   :  { %v5892_v26 = vadd.f32 %v2041_v3, %v6702_v35  ;;  %v2043_v40 = vpop.f32.mrb[13].mxu0  ;;  %v2114_v44 = vpop.f32.mrb[13].mxu1  ;;  %v5908_v63 = vadd.f32 %v2112_v13, %v6719_v59  ;;  %v2416_v3 = vld [vmem:[#allocation9 + $0x90] sm:$0xff] }
 0x77f   :  { %v5893_v58 = vadd.f32 %v2043_v40, %v6706_v38  ;;  %v5909_v15 = vadd.f32 %v2114_v44, %v6713_v52  ;;  %v2420_v13 = vld [vmem:[#allocation9 + $0xb0] sm:$0xff]  ;;  %v2427_v40 = vld [vmem:[#allocation9 + $0xe8] sm:$0xff]  ;;  %v2425_v44 = vld [vmem:[#allocation9 + $0xd8] sm:$0xff] }
 0x780   :  { %v4698_v14 = vmul.f32 -1.442695, %v5892_v26  ;;  %v2423_v26 = vld [vmem:[#allocation9 + $0xc8] sm:$0xff] }
 0x781   :  { %v4699_v12 = vmul.f32 -1.442695, %v5893_v58  ;;  %v4700_v33 = vmul.f32 -1.442695, %v5909_v15  ;;  %v2429_v58 = vld [vmem:[#allocation9 + $0xf8] sm:$0xff]  ;;  %v2422_v15 = vld [vmem:[#allocation9 + $0xc0] sm:$0xff] }
 0x782   :  { %6115 = vpow2.f32 %v4698_v14  ;;  %v5314_v14 = vpack.c.bf16 %v2418_v42, %v2414_v50  ;;  %v5328_v50 = vpack.c.bf16 %v2451_v23, %v2447_v47  ;;  %v5360_v42 = vpack.c.bf16 %v2453_v29, %v2449_v56  ;;  %v2763_v23 = vld [vmem:[#allocation11 + $0x88] sm:$0xff]  ;;  %v2765_v29 = vld [vmem:[#allocation11 + $0x98] sm:$0xff] }
 0x783   :  { %6117 = vpow2.f32 %v4699_v12  ;;  %v5346_v12 = vpack.c.bf16 %v2420_v13, %v2416_v3  ;;  %v2455_v3 = vld [vmem:[#allocation9 + $0x1c8] sm:$0xff] }
 0x784   :  { %6119 = vpow2.f32 %v4700_v33  ;;  %v2426_v33 = vld [vmem:[#allocation9 + $0xe0] sm:$0xff]  ;;  %v2459_v13 = vld [vmem:[#allocation9 + $0x1e8] sm:$0xff] }
 0x785   :  { %6121 = vtanh.f32 %v5908_v63  ;;  %v5316_v63 = vpack.c.bf16 %v2427_v40, %v2423_v26  ;;  %v2457_v26 = vld [vmem:[#allocation9 + $0x1d8] sm:$0xff]  ;;  %v2767_v56 = vld [vmem:[#allocation11 + $0xa8] sm:$0xff] }
 0x786   :  { %v2461_v40 = vld [vmem:[#allocation9 + $0x1f8] sm:$0xff] }
 0x78c   :  { %v6116_v45 = vpop.eup %6115 }
 0x78d   :  { %v6118_v1 = vpop.eup %6117  ;;  %v2124_v16 = vadd.f32 1.0, %v6116_v45  ;;  %v5348_v45 = vpack.c.bf16 %v2429_v58, %v2425_v44 }
 0x78e   :  { %v2130_v19 = vadd.f32 1.0, %v6118_v1  ;;  %v6120_v36 = vpop.eup %6119  ;;  %v2424_v1 = vld [vmem:[#allocation9 + $0xd0] sm:$0xff] }
 0x78f   :  { %6123 = vrcp.f32 %v2124_v16  ;;  %v6122_v4 = vpop.eup %6121  ;;  %v2137_v22 = vadd.f32 1.0, %v6120_v36  ;;  %v2428_v16 = vld [vmem:[#allocation9 + $0xf0] sm:$0xff]  ;;  %v2435_v36 = vld [vmem:[#allocation9 + $0x128] sm:$0xff] }
 0x790   :  { %6125 = vrcp.f32 %v2130_v19  ;;  %v2431_v19 = vld [vmem:[#allocation9 + $0x108] sm:$0xff] }
 0x791   :  { %6127 = vrcp.f32 %v2137_v22  ;;  %v2430_v22 = vld [vmem:[#allocation9 + $0x100] sm:$0xff]  ;;  %v5320_v20 = vpack.c.bf16 %v2435_v36, %v2431_v19  ;;  %v2391_v36 = vld [vmem:[#allocation12 + $0x8] sm:$0xff] }
 0x792   :  { %v2390_v19 = vld [vmem:[#allocation12] sm:$0xff] }
 0x799   :  { %v6124_v9 = vpop.eup %6123 }
 0x79a   :  { %v6126_v54 = vpop.eup %6125  ;;  %v2141_v18 = vmul.f32 %v6124_v9, %v6122_v4  ;;  %v2433_v4 = vld [vmem:[#allocation9 + $0x118] sm:$0xff] }
 0x79b   :  { %v2140_v25 = vmul.f32 %v6126_v54, %v6998_v62  ;;  %v6128_v39 = vpop.eup %6127  ;;  %v2437_v9 = vld [vmem:[#allocation9 + $0x138] sm:$0xff]  ;;  %v5318_v54 = vpack.c.bf16 %v2426_v33, %v2422_v15  ;;  %v5364_v15 = vpack.c.bf16 %v2461_v40, %v2457_v26  ;;  %v2458_v33 = vld [vmem:[#allocation9 + $0x1e0] sm:$0xff]  ;;  %v2775_v26 = vld [vmem:[#allocation11 + $0xe8] sm:$0xff] }
 0x79c   :  { %v5352_v60 = vpack.c.bf16 %v2437_v9, %v2433_v4  ;;  %v2392_v4 = vld [vmem:[#allocation12 + $0x10] sm:$0xff]  ;;  %v2393_v9 = vld [vmem:[#allocation12 + $0x18] sm:$0xff] }
 0x79d   :  { %v7036_v21 = vadd.f32 %v2141_v18, %v2140_v25  ;;  %v5350_v18 = vpack.c.bf16 %v2428_v16, %v2424_v1  ;;  %v2434_v25 = vld [vmem:[#allocation9 + $0x120] sm:$0xff]  ;;  %v2773_v40 = vld [vmem:[#allocation11 + $0xd8] sm:$0xff] }
 0x79f   :  { %6129 = vtanh.f32 %v7036_v21 }
 0x7a9   :  { %v6130_v53 = vpop.eup %6129 }
 0x7aa   :  { %v7039_v62 = vmul.f32 %v6130_v53, %v6128_v39  ;;  %v5322_v39 = vpack.c.bf16 %v2434_v25, %v2430_v22  ;;  %v5354_v53 = vpack.c.bf16 %v2436_v51, %v2432_v43  ;;  %v2753_v25 = vld [vmem:[#allocation11 + $0x38] sm:$0xff]  ;;  %v2748_v51 = vld [vmem:[#allocation11 + $0x10] sm:$0xff] }
 0x7ac   :  { %2283 = vmatmul.mubr.f32.vlgmr.msra.gmra.mrb[14].mxu0 %v7039_v62  ;;  %2354 = vmatmul.mubr.f32.vlgmr.msra.gmra.mrb[14].mxu1 %v7039_v62 }
 0x7ad   :  { %5307 = vmatpush1.bf16.msra.mxu0 %v5306_v46  ;;  %5339 = vmatpush1.bf16.msra.mxu1 %v5338_v49  ;;  %v2438_v46 = vld [vmem:[#allocation9 + $0x140] sm:$0xff] }
 0x7ae   :  { %5309 = vmatprep.subr.bf16.mxu0 %v5308_v6  ;;  %5341 = vmatprep.subr.bf16.mxu1 %v5340_v10  ;;  %v2442_v49 = vld [vmem:[#allocation9 + $0x160] sm:$0xff]  ;;  %v2440_v6 = vld [vmem:[#allocation9 + $0x150] sm:$0xff] }
 0x7af   :  { %2548 = vmatprep.mubr.f32.mxu0 %v6424_v0  ;;  %2661 = vmatprep.mubr.f32.mxu1 %v6424_v0  ;;  %v2444_v10 = vld [vmem:[#allocation9 + $0x170] sm:$0xff]  ;;  %v5326_v32 = vpack.c.bf16 %v2442_v49, %v2438_v46  ;;  %v2754_v46 = vld [vmem:[#allocation11 + $0x40] sm:$0xff] }
 0x7b0   :  { %v5358_v48 = vpack.c.bf16 %v2444_v10, %v2440_v6  ;;  %v2758_v49 = vld [vmem:[#allocation11 + $0x60] sm:$0xff]  ;;  %v2756_v6 = vld [vmem:[#allocation11 + $0x50] sm:$0xff] }
 0x7b1   :  { %5311 = vmatpush1.bf16.msra.mxu0 %v5310_v24  ;;  %5343 = vmatpush1.bf16.msra.mxu1 %v5342_v28  ;;  %v2446_v24 = vld [vmem:[#allocation9 + $0x180] sm:$0xff]  ;;  %v2760_v10 = vld [vmem:[#allocation11 + $0x70] sm:$0xff] }
 0x7b2   :  { %5313 = vmatprep.subr.bf16.mxu0 %v5312_v57  ;;  %5345 = vmatprep.subr.bf16.mxu1 %v5344_v8  ;;  %v2450_v28 = vld [vmem:[#allocation9 + $0x1a0] sm:$0xff]  ;;  %v2448_v57 = vld [vmem:[#allocation9 + $0x190] sm:$0xff]  ;;  %v7084_v47 = vpack.c.bf16 %v2760_v10, %v2756_v6 }
 0x7b3   :  { %v2452_v8 = vld [vmem:[#allocation9 + $0x1b0] sm:$0xff]  ;;  %v5330_v44 = vpack.c.bf16 %v2450_v28, %v2446_v24  ;;  %v2762_v24 = vld [vmem:[#allocation11 + $0x80] sm:$0xff] }
 0x7b4   :  { %v5362_v58 = vpack.c.bf16 %v2452_v8, %v2448_v57  ;;  %v2766_v28 = vld [vmem:[#allocation11 + $0xa0] sm:$0xff]  ;;  %v2764_v57 = vld [vmem:[#allocation11 + $0x90] sm:$0xff] }
 0x7b5   :  { %5315 = vmatpush1.bf16.msra.mxu0 %v5314_v14  ;;  %5347 = vmatpush1.bf16.msra.mxu1 %v5346_v12  ;;  %v2454_v14 = vld [vmem:[#allocation9 + $0x1c0] sm:$0xff]  ;;  %v5332_v12 = vpack.c.bf16 %v2459_v13, %v2455_v3  ;;  %v2768_v8 = vld [vmem:[#allocation11 + $0xb0] sm:$0xff]  ;;  %v2771_v13 = vld [vmem:[#allocation11 + $0xc8] sm:$0xff] }
 0x7b6   :  { %5317 = vmatprep.subr.bf16.mxu0 %v5316_v63  ;;  %5349 = vmatprep.subr.bf16.mxu1 %v5348_v45  ;;  %v2456_v63 = vld [vmem:[#allocation9 + $0x1d0] sm:$0xff]  ;;  %v5334_v1 = vpack.c.bf16 %v2458_v33, %v2454_v14  ;;  %v7096_v3 = vpack.c.bf16 %v2768_v8, %v2764_v57  ;;  %v2770_v14 = vld [vmem:[#allocation11 + $0xc0] sm:$0xff]  ;;  %v2801_v8 = vld [vmem:[#allocation11 + $0x1b8] sm:$0xff] }
 0x7b7   :  { %v2460_v45 = vld [vmem:[#allocation9 + $0x1f0] sm:$0xff] }
 0x7b8   :  { %v5366_v16 = vpack.c.bf16 %v2460_v45, %v2456_v63  ;;  %v2772_v63 = vld [vmem:[#allocation11 + $0xd0] sm:$0xff] }
 0x7b9   :  { %5319 = vmatpush1.bf16.msra.mxu0 %v5318_v54  ;;  %5351 = vmatpush1.bf16.msra.mxu1 %v5350_v18  ;;  %v2751_v54 = vld [vmem:[#allocation11 + $0x28] sm:$0xff]  ;;  %v2749_v18 = vld [vmem:[#allocation11 + $0x18] sm:$0xff]  ;;  %v2776_v45 = vld [vmem:[#allocation11 + $0xf0] sm:$0xff] }
 0x7ba   :  { %5321 = vmatprep.subr.bf16.mxu0 %v5320_v20  ;;  %5353 = vmatprep.subr.bf16.mxu1 %v5352_v60  ;;  %v2746_v20 = vld [vmem:[#allocation11] sm:$0xff]  ;;  %v7067_v60 = vpack.c.bf16 %v2753_v25, %v2749_v18 }
 0x7bd   :  { %5323 = vmatpush1.bf16.msra.mxu0 %v5322_v39  ;;  %5355 = vmatpush1.bf16.msra.mxu1 %v5354_v53  ;;  %v7077_v39 = vpack.c.bf16 %v2759_v11, %v2755_v5  ;;  %v2761_v53 = vld [vmem:[#allocation11 + $0x78] sm:$0xff]  ;;  %v2791_v5 = vld [vmem:[#allocation11 + $0x168] sm:$0xff] }
 0x7be   :  { %5325 = vmatprep.subr.bf16.mxu0 %v5324_v61  ;;  %5357 = vmatprep.subr.bf16.mxu1 %v5356_v7  ;;  %v7079_v61 = vpack.c.bf16 %v2761_v53, %v2757_v27  ;;  %v7081_v7 = vpack.c.bf16 %v2758_v49, %v2754_v46  ;;  %v2789_v11 = vld [vmem:[#allocation11 + $0x158] sm:$0xff]  ;;  %v2786_v46 = vld [vmem:[#allocation11 + $0x140] sm:$0xff] }
 0x7bf   :  { %v2793_v53 = vld [vmem:[#allocation11 + $0x178] sm:$0xff]  ;;  %v2790_v49 = vld [vmem:[#allocation11 + $0x160] sm:$0xff] }
 0x7c0   :  { %v7127_v6 = vpack.c.bf16 %v2793_v53, %v2789_v11  ;;  %v7129_v10 = vpack.c.bf16 %v2790_v49, %v2786_v46 }
 0x7c1   :  { %5327 = vmatpush1.bf16.msra.mxu0 %v5326_v32  ;;  %5359 = vmatpush1.bf16.msra.mxu1 %v5358_v48  ;;  %v7089_v32 = vpack.c.bf16 %v2767_v56, %v2763_v23  ;;  %v2769_v48 = vld [vmem:[#allocation11 + $0xb8] sm:$0xff]  ;;  %v2788_v23 = vld [vmem:[#allocation11 + $0x150] sm:$0xff] }
 0x7c2   :  { %5329 = vmatprep.subr.bf16.mxu0 %v5328_v50  ;;  %5361 = vmatprep.subr.bf16.mxu1 %v5360_v42  ;;  %v7091_v50 = vpack.c.bf16 %v2769_v48, %v2765_v29  ;;  %v7093_v42 = vpack.c.bf16 %v2766_v28, %v2762_v24  ;;  %v2792_v56 = vld [vmem:[#allocation11 + $0x170] sm:$0xff]  ;;  %v2795_v48 = vld [vmem:[#allocation11 + $0x188] sm:$0xff]  ;;  %v2797_v28 = vld [vmem:[#allocation11 + $0x198] sm:$0xff] }
 0x7c3   :  { %v7132_v29 = vpack.c.bf16 %v2792_v56, %v2788_v23  ;;  %v2799_v24 = vld [vmem:[#allocation11 + $0x1a8] sm:$0xff] }
 0x7c4   :  { %v7137_v57 = vpack.c.bf16 %v2799_v24, %v2795_v48 }
 0x7c5   :  { %5331 = vmatpush1.bf16.msra.mxu0 %v5330_v44  ;;  %5363 = vmatpush1.bf16.msra.mxu1 %v5362_v58  ;;  %v7101_v44 = vpack.c.bf16 %v2775_v26, %v2771_v13  ;;  %v2777_v58 = vld [vmem:[#allocation11 + $0xf8] sm:$0xff]  ;;  %v2794_v13 = vld [vmem:[#allocation11 + $0x180] sm:$0xff] }
 0x7c6   :  { %5333 = vmatprep.subr.bf16.mxu0 %v5332_v12  ;;  %5365 = vmatprep.subr.bf16.mxu1 %v5364_v15  ;;  %v2774_v12 = vld [vmem:[#allocation11 + $0xe0] sm:$0xff]  ;;  %v7103_v15 = vpack.c.bf16 %v2777_v58, %v2773_v40  ;;  %v7139_v40 = vpack.c.bf16 %v2801_v8, %v2797_v28 }
 0x7c7   :  { %v7105_v33 = vpack.c.bf16 %v2774_v12, %v2770_v14  ;;  %v2798_v26 = vld [vmem:[#allocation11 + $0x1a0] sm:$0xff]  ;;  %v2796_v14 = vld [vmem:[#allocation11 + $0x190] sm:$0xff] }
 0x7c8   :  { %v7141_v58 = vpack.c.bf16 %v2798_v26, %v2794_v13  ;;  %v2800_v12 = vld [vmem:[#allocation11 + $0x1b0] sm:$0xff] }
 0x7c9   :  { %5335 = vmatpush1.bf16.msra.mxu0 %v5334_v1  ;;  %5367 = vmatpush1.bf16.msra.mxu1 %v5366_v16  ;;  %v7108_v1 = vpack.c.bf16 %v2776_v45, %v2772_v63  ;;  %v2779_v16 = vld [vmem:[#allocation11 + $0x108] sm:$0xff]  ;;  %v7144_v63 = vpack.c.bf16 %v2800_v12, %v2796_v14 }
 0x7ca   :  { %5401 = vmatprep.subr.bf16.mxu1 %v7067_v60  ;;  %v2803_v45 = vld [vmem:[#allocation11 + $0x1c8] sm:$0xff] }
 0x7cc   :  { %2549 = vmatmul.mubr.f32.vlgmr.msra.gmra.mrb[16].mxu0 %v2390_v19  ;;  %2662 = vmatmul.mubr.f32.vlgmr.msra.gmra.mrb[16].mxu1 %v2390_v19  ;;  %v2783_v19 = vld [vmem:[#allocation11 + $0x128] sm:$0xff] }
 0x7cd   :  { %2554 = vmatprep.mubr.f32.mxu0 %v6424_v0  ;;  %2667 = vmatprep.mubr.f32.mxu1 %v6424_v0 }
 0x7d0   :  { %2555 = vmatmul.mubr.f32.gmra.mrb[18].mxu0 %v2391_v36  ;;  %2668 = vmatmul.mubr.f32.gmra.mrb[18].mxu1 %v2391_v36  ;;  %v2781_v36 = vld [vmem:[#allocation11 + $0x118] sm:$0xff] }
 0x7d1   :  { %2560 = vmatprep.mubr.f32.mxu0 %v6424_v0  ;;  %2673 = vmatprep.mubr.f32.mxu1 %v6424_v0 }
 0x7d4   :  { %2561 = vmatmul.mubr.f32.gmra.mrb[20].mxu0 %v2392_v4  ;;  %2674 = vmatmul.mubr.f32.gmra.mrb[20].mxu1 %v2392_v4  ;;  %v7113_v4 = vpack.c.bf16 %v2783_v19, %v2779_v16  ;;  %v2807_v16 = vld [vmem:[#allocation11 + $0x1e8] sm:$0xff]  ;;  %v2805_v19 = vld [vmem:[#allocation11 + $0x1d8] sm:$0xff] }
 0x7d5   :  { %2566 = vmatprep.mubr.f32.mxu0 %v6424_v0  ;;  %2679 = vmatprep.mubr.f32.mxu1 %v6424_v0 }
 0x7d8   :  { %2567 = vmatmul.mubr.f32.gmra.mrb[22].mxu0 %v2393_v9  ;;  %2680 = vmatmul.mubr.f32.gmra.mrb[22].mxu1 %v2393_v9  ;;  %v2785_v9 = vld [vmem:[#allocation11 + $0x138] sm:$0xff] }
 0x7d9   :  { %2572 = vmatprep.mubr.f32.mxu0 %v6424_v0  ;;  %2685 = vmatprep.mubr.f32.mxu1 %v6424_v0  ;;  %v7115_v18 = vpack.c.bf16 %v2785_v9, %v2781_v36  ;;  %v7149_v36 = vpack.c.bf16 %v2807_v16, %v2803_v45  ;;  %v2809_v9 = vld [vmem:[#allocation11 + $0x1f8] sm:$0xff] }
 0x7dc   :  { %2573 = vmatmul.mubr.f32.gmra.mrb[24].mxu0 %v6957_v41  ;;  %2686 = vmatmul.mubr.f32.gmra.mrb[24].mxu1 %v6957_v41  ;;  %v2747_v41 = vld [vmem:[#allocation11 + $0x8] sm:$0xff] }
 0x7dd   :  { %2578 = vmatprep.mubr.f32.mxu0 %v6424_v0  ;;  %2691 = vmatprep.mubr.f32.mxu1 %v6424_v0  ;;  %v7065_v22 = vpack.c.bf16 %v2751_v54, %v2747_v41  ;;  %v2778_v41 = vld [vmem:[#allocation11 + $0x100] sm:$0xff] }
 0x7de   :  { %v2782_v54 = vld [vmem:[#allocation11 + $0x120] sm:$0xff] }
 0x7df   :  { %5369 = vmatprep.subr.bf16.mxu0 %v7065_v22  ;;  %v7117_v25 = vpack.c.bf16 %v2782_v54, %v2778_v41  ;;  %v2802_v41 = vld [vmem:[#allocation11 + $0x1c0] sm:$0xff] }
 0x7e0   :  { %2579 = vmatmul.mubr.f32.gmra.mrb[26].mxu0 %v7001_v17  ;;  %2692 = vmatmul.mubr.f32.gmra.mrb[26].mxu1 %v7001_v17  ;;  %v2750_v17 = vld [vmem:[#allocation11 + $0x20] sm:$0xff] }
 0x7e1   :  { %2584 = vmatprep.mubr.f32.mxu0 %v6424_v0  ;;  %2697 = vmatprep.mubr.f32.mxu1 %v6424_v0  ;;  %v7069_v43 = vpack.c.bf16 %v2750_v17, %v2746_v20  ;;  %v2780_v20 = vld [vmem:[#allocation11 + $0x110] sm:$0xff]  ;;  %v2806_v54 = vld [vmem:[#allocation11 + $0x1e0] sm:$0xff] }
 0x7e2   :  { %v2784_v17 = vld [vmem:[#allocation11 + $0x130] sm:$0xff] }
 0x7e3   :  { %5371 = vmatpush1.bf16.msra.mxu0 %v7069_v43 }
 0x7e4   :  { %2585 = vmatmul.mubr.f32.gmra.mrb[28].mxu0 %v7039_v62  ;;  %2698 = vmatmul.mubr.f32.gmra.mrb[28].mxu1 %v7039_v62  ;;  %v7072_v62 = vpack.c.bf16 %v2752_v2, %v2748_v51  ;;  %v7120_v51 = vpack.c.bf16 %v2784_v17, %v2780_v20  ;;  %v2787_v2 = vld [vmem:[#allocation11 + $0x148] sm:$0xff]  ;;  %v7151_v20 = vpack.c.bf16 %v2809_v9, %v2805_v19 }
 0x7e5   :  { %2590 = vmatprep.mubr.f32.mxu0 %v6424_v0  ;;  %2703 = vmatprep.mubr.f32.mxu1 %v6424_v0  ;;  %v7125_v27 = vpack.c.bf16 %v2791_v5, %v2787_v2  ;;  %v7153_v17 = vpack.c.bf16 %v2806_v54, %v2802_v41  ;;  %v2804_v2 = vld [vmem:[#allocation11 + $0x1d0] sm:$0xff] }
 0x7e6   :  { %5403 = vmatpush1.bf16.msra.mxu1 %v7072_v62  ;;  %5373 = vmatprep.subr.bf16.mxu0 %v7077_v39  ;;  %v2808_v5 = vld [vmem:[#allocation11 + $0x1f0] sm:$0xff] }
 0x7e7   :  { %5405 = vmatprep.subr.bf16.mxu1 %v7079_v61  ;;  %5375 = vmatpush1.bf16.msra.mxu0 %v7081_v7  ;;  %v7156_v11 = vpack.c.bf16 %v2808_v5, %v2804_v2 }
 0x7e8   :  { %5377 = vmatprep.subr.bf16.mxu0 %v7089_v32 }
 0x7ea   :  { %5407 = vmatpush1.bf16.msra.mxu1 %v7084_v47 }
 0x7eb   :  { %5409 = vmatprep.subr.bf16.mxu1 %v7091_v50  ;;  %5379 = vmatpush1.bf16.msra.mxu0 %v7093_v42 }
 0x7ec   :  { %5381 = vmatprep.subr.bf16.mxu0 %v7101_v44 }
 0x7ee   :  { %5411 = vmatpush1.bf16.msra.mxu1 %v7096_v3 }
 0x7ef   :  { %5413 = vmatprep.subr.bf16.mxu1 %v7103_v15  ;;  %5383 = vmatpush1.bf16.msra.mxu0 %v7105_v33 }
 0x7f0   :  { %5385 = vmatprep.subr.bf16.mxu0 %v7113_v4 }
 0x7f2   :  { %5415 = vmatpush1.bf16.msra.mxu1 %v7108_v1 }
 0x7f3   :  { %5417 = vmatprep.subr.bf16.mxu1 %v7115_v18  ;;  %5387 = vmatpush1.bf16.msra.mxu0 %v7117_v25 }
 0x7f4   :  { %5389 = vmatprep.subr.bf16.mxu0 %v7125_v27 }
 0x7f6   :  { %5419 = vmatpush1.bf16.msra.mxu1 %v7120_v51 }
 0x7f7   :  { %5421 = vmatprep.subr.bf16.mxu1 %v7127_v6  ;;  %5391 = vmatpush1.bf16.msra.mxu0 %v7129_v10 }
 0x7f8   :  { %5393 = vmatprep.subr.bf16.mxu0 %v7137_v57 }
 0x7fa   :  { %5423 = vmatpush1.bf16.msra.mxu1 %v7132_v29 }
 0x7fb   :  { %5425 = vmatprep.subr.bf16.mxu1 %v7139_v40  ;;  %5395 = vmatpush1.bf16.msra.mxu0 %v7141_v58 }
 0x7fc   :  { %5397 = vmatprep.subr.bf16.mxu0 %v7149_v36 }
 0x7fe   :  { %5427 = vmatpush1.bf16.msra.mxu1 %v7144_v63 }
 0x7ff   :  { %5429 = vmatprep.subr.bf16.mxu1 %v7151_v20  ;;  %5399 = vmatpush1.bf16.msra.mxu0 %v7153_v17 }
 0x800   :  { %5433 = vmatprep.subr.bf16.mxu0 %v7065_v22 }
 0x802   :  { %5431 = vmatpush1.bf16.msra.mxu1 %v7156_v11 }
 0x803   :  { %5465 = vmatprep.subr.bf16.mxu1 %v7067_v60 }
 0x87f   :  { %v2284_v53 = vpop.f32.mrb[14].mxu0  ;;  %v2355_v46 = vpop.f32.mrb[14].mxu1 }
 0x880   :  { %v5894_v49 = vadd.f32 %v2284_v53, %v6702_v35  ;;  %v2286_v23 = vpop.f32.mrb[15].mxu0  ;;  %v2357_v56 = vpop.f32.mrb[15].mxu1  ;;  %v5910_v26 = vadd.f32 %v2355_v46, %v6719_v59 }
 0x881   :  { %v5895_v48 = vadd.f32 %v2286_v23, %v6706_v38  ;;  %v5911_v8 = vadd.f32 %v2357_v56, %v6713_v52 }
 0x882   :  { %v4701_v24 = vmul.f32 -1.442695, %v5894_v49 }
 0x883   :  { %v4702_v28 = vmul.f32 -1.442695, %v5895_v48  ;;  %v4703_v13 = vmul.f32 -1.442695, %v5911_v8 }
 0x884   :  { %6131 = vpow2.f32 %v4701_v24 }
 0x885   :  { %6133 = vpow2.f32 %v4702_v28 }
 0x886   :  { %6135 = vpow2.f32 %v4703_v13 }
 0x887   :  { %6137 = vtanh.f32 %v5910_v26 }
 0x88e   :  { %v6132_v14 = vpop.eup %6131 }
 0x88f   :  { %v6134_v12 = vpop.eup %6133  ;;  %v2367_v45 = vadd.f32 1.0, %v6132_v14 }
 0x890   :  { %v2373_v16 = vadd.f32 1.0, %v6134_v12  ;;  %v6136_v35 = vpop.eup %6135 }
 0x891   :  { %6139 = vrcp.f32 %v2367_v45  ;;  %v6138_v19 = vpop.eup %6137  ;;  %v2380_v54 = vadd.f32 1.0, %v6136_v35 }
 0x892   :  { %6141 = vrcp.f32 %v2373_v16 }
 0x893   :  { %6143 = vrcp.f32 %v2380_v54 }
 0x89b   :  { %v6140_v38 = vpop.eup %6139 }
 0x89c   :  { %v6142_v9 = vpop.eup %6141  ;;  %v2384_v41 = vmul.f32 %v6140_v38, %v6138_v19 }
 0x89d   :  { %v2383_v2 = vmul.f32 %v6142_v9, %v7036_v21  ;;  %v6144_v59 = vpop.eup %6143  ;;  %v2462_v21 = vld [vmem:[%s7568_s6] sm:$0xf]  ;;  %s6425_s6 = smov [#allocation12]  }
 0x89e   :  { %v7211_v46 = vrot.slane %v2462_v21, %v171_v31  ;;  %v7215_v49 = vrot.slane %v2462_v21, %v175_v34  ;;  %v7221_v14 = vrot.slane %v2462_v21, %v183_v37  ;;  %v7226_v34 = vrot.slane %v2462_v21, %v179_v55  ;;  %s4659_s20 = sshll.u32 %s6425_s6, 4  ;;  %s4660_s20 = int_to_ptr.vmem [resolvable:$true] %s4659_s20 }
 0x89f   :  { %v2385_v52 = vadd.f32 %v2384_v41, %v2383_v2  ;;  %s6385_s21 = scalar_lea.vmem %s4660_s20, 1024  ;;  %p6390_p13 = scmp.lt.s32.totalorder %s4660_s20, %s4660_s20 }
 0x8a0   :  { %p6386_p12 = scmp.ne.s32.totalorder %s4660_s20, %s6385_s21  ;;  %p6391_p0 = scmp.lt.s32.totalorder %s6385_s21, %s6385_s21 }
 0x8a1   :  { %6145 = vtanh.f32 %v2385_v52 }
 0x8a2   :  { %p6392_p1 = por %p6391_p0, %p6390_p13 }
 0x8a4   :  { %p6393_p2 = pnand %p6392_p1, %p6386_p12 }
 0x8ab   :  { %v6146_v5 = vpop.eup %6145 }
 0x8ac   :  { %v2387_v53 = vmul.f32 %v6146_v5, %v6144_v59 }
 0x8ae   :  { %2591 = vmatmul.mubr.f32.gmra.mrb[30].mxu0 %v2387_v53  ;;  %2704 = vmatmul.mubr.f32.gmra.mrb[30].mxu1 %v2387_v53 }
 0x8af   :  { %2874 = vmatprep.mubr.f32.mxu0 %v6424_v0  ;;  %2945 = vmatprep.mubr.f32.mxu1 %v6424_v0 }
 0x8b2   :  { %2875 = vmatmul.mubr.f32.vlgmr.msra.gmra.mrb[16].mxu0 %v6424_v0  ;;  %2946 = vmatmul.mubr.f32.vlgmr.msra.gmra.mrb[16].mxu1 %v6424_v0 }
 0x8b3   :  { %5435 = vmatpush1.bf16.msra.mxu0 %v7069_v43  ;;  %5467 = vmatpush1.bf16.msra.mxu1 %v7072_v62 }
 0x8b4   :  { %5437 = vmatprep.subr.bf16.mxu0 %v7077_v39  ;;  %5469 = vmatprep.subr.bf16.mxu1 %v7079_v61 }
 0x8b5   :  { %3113 = vmatprep.mubr.f32.mxu0 %v6424_v0  ;;  %3184 = vmatprep.mubr.f32.mxu1 %v6424_v0 }
 0x8b7   :  { %5439 = vmatpush1.bf16.msra.mxu0 %v7081_v7  ;;  %5471 = vmatpush1.bf16.msra.mxu1 %v7084_v47 }
 0x8b8   :  { %5441 = vmatprep.subr.bf16.mxu0 %v7089_v32  ;;  %5473 = vmatprep.subr.bf16.mxu1 %v7091_v50 }
 0x8bb   :  { %5443 = vmatpush1.bf16.msra.mxu0 %v7093_v42  ;;  %5475 = vmatpush1.bf16.msra.mxu1 %v7096_v3 }
 0x8bc   :  { %5445 = vmatprep.subr.bf16.mxu0 %v7101_v44  ;;  %5477 = vmatprep.subr.bf16.mxu1 %v7103_v15 }
 0x8bf   :  { %5447 = vmatpush1.bf16.msra.mxu0 %v7105_v33  ;;  %5479 = vmatpush1.bf16.msra.mxu1 %v7108_v1 }
 0x8c0   :  { %5449 = vmatprep.subr.bf16.mxu0 %v7113_v4  ;;  %5481 = vmatprep.subr.bf16.mxu1 %v7115_v18 }
 0x8c3   :  { %5451 = vmatpush1.bf16.msra.mxu0 %v7117_v25  ;;  %5483 = vmatpush1.bf16.msra.mxu1 %v7120_v51 }
 0x8c4   :  { %5453 = vmatprep.subr.bf16.mxu0 %v7125_v27  ;;  %5485 = vmatprep.subr.bf16.mxu1 %v7127_v6 }
 0x8c7   :  { %5455 = vmatpush1.bf16.msra.mxu0 %v7129_v10  ;;  %5487 = vmatpush1.bf16.msra.mxu1 %v7132_v29 }
 0x8c8   :  { %5457 = vmatprep.subr.bf16.mxu0 %v7137_v57  ;;  %5489 = vmatprep.subr.bf16.mxu1 %v7139_v40 }
 0x8cb   :  { %5459 = vmatpush1.bf16.msra.mxu0 %v7141_v58  ;;  %5491 = vmatpush1.bf16.msra.mxu1 %v7144_v63 }
 0x8cc   :  { %5461 = vmatprep.subr.bf16.mxu0 %v7149_v36  ;;  %5493 = vmatprep.subr.bf16.mxu1 %v7151_v20 }
 0x8cf   :  { %5463 = vmatpush1.bf16.msra.mxu0 %v7153_v17  ;;  %5495 = vmatpush1.bf16.msra.mxu1 %v7156_v11 }
 0x8d0   :  { %5497 = vmatprep.subr.bf16.mxu0 %v7065_v22  ;;  %5529 = vmatprep.subr.bf16.mxu1 %v7067_v60 }
 0x985   :  { %v2876_v23 = vpop.f32.mrb[16].mxu0  ;;  %v2947_v56 = vpop.f32.mrb[16].mxu1 }
 0x986   :  { %v5912_v48 = vadd.f32 %v2876_v23, %v7211_v46  ;;  %v2878_v24 = vpop.f32.mrb[17].mxu0  ;;  %v2949_v28 = vpop.f32.mrb[17].mxu1  ;;  %v5928_v45 = vadd.f32 %v2947_v56, %v7226_v34 }
 0x987   :  { %v5913_v8 = vadd.f32 %v2878_v24, %v7215_v49  ;;  %v5929_v31 = vadd.f32 %v2949_v28, %v7221_v14 }
 0x988   :  { %v4704_v13 = vmul.f32 -1.442695, %v5912_v48 }
 0x989   :  { %v4705_v26 = vmul.f32 -1.442695, %v5913_v8  ;;  %v4706_v12 = vmul.f32 -1.442695, %v5929_v31 }
 0x98a   :  { %6147 = vpow2.f32 %v4704_v13 }
 0x98b   :  { %6149 = vpow2.f32 %v4705_v26 }
 0x98c   :  { %6151 = vpow2.f32 %v4706_v12 }
 0x98d   :  { %6153 = vtanh.f32 %v5928_v45 }
 0x994   :  { %v6148_v16 = vpop.eup %6147 }
 0x995   :  { %v6150_v35 = vpop.eup %6149  ;;  %v2959_v19 = vadd.f32 1.0, %v6148_v16 }
 0x996   :  { %v2965_v38 = vadd.f32 1.0, %v6150_v35  ;;  %v6152_v37 = vpop.eup %6151 }
 0x997   :  { %6155 = vrcp.f32 %v2959_v19  ;;  %v6154_v9 = vpop.eup %6153  ;;  %v2972_v52 = vadd.f32 1.0, %v6152_v37 }
 0x998   :  { %6157 = vrcp.f32 %v2965_v38 }
 0x999   :  { %6159 = vrcp.f32 %v2972_v52 }
 0x9a1   :  { %v6156_v41 = vpop.eup %6155 }
 0x9a2   :  { %v6158_v54 = vpop.eup %6157  ;;  %v2976_v2 = vmul.f32 %v6156_v41, %v6154_v9 }
 0x9a3   :  { %v2975_v30 = vmul.f32 0.0, %v6158_v54  ;;  %v6160_v59 = vpop.eup %6159 }
 0x9a5   :  { %v7229_v55 = vadd.f32 %v2976_v2, %v2975_v30 }
 0x9a7   :  { %6161 = vtanh.f32 %v7229_v55 }
 0x9b1   :  { %v6162_v5 = vpop.eup %6161 }
 0x9b2   :  { %v2979_v53 = vmul.f32 %v6162_v5, %v6160_v59  ;;  %v3702_v5 = vld [vmem:[#allocation11] sm:$0xff] }
 0x9b4   :  { %2980 = vst [vmem:[#allocation12] sm:$0xff] %v2979_v53  ;;  %3114 = vmatmul.mubr.f32.vlgmr.msra.gmra.mrb[18].mxu0 %v2979_v53  ;;  %3185 = vmatmul.mubr.f32.vlgmr.msra.gmra.mrb[18].mxu1 %v2979_v53  ;;  %v3706_v53 = vld [vmem:[#allocation11 + $0x20] sm:$0xff] }
 0x9b5   :  { %5499 = vmatpush1.bf16.msra.mxu0 %v7069_v43  ;;  %5531 = vmatpush1.bf16.msra.mxu1 %v7072_v62 }
 0x9b6   :  { %5501 = vmatprep.subr.bf16.mxu0 %v7077_v39  ;;  %5533 = vmatprep.subr.bf16.mxu1 %v7079_v61 }
 0x9b7   :  { %3352 = vmatprep.mubr.f32.mxu0 %v6424_v0  ;;  %3423 = vmatprep.mubr.f32.mxu1 %v6424_v0 }
 0x9b9   :  { %5503 = vmatpush1.bf16.msra.mxu0 %v7081_v7  ;;  %5535 = vmatpush1.bf16.msra.mxu1 %v7084_v47 }
 0x9ba   :  { %5505 = vmatprep.subr.bf16.mxu0 %v7089_v32  ;;  %5537 = vmatprep.subr.bf16.mxu1 %v7091_v50 }
 0x9bd   :  { %5507 = vmatpush1.bf16.msra.mxu0 %v7093_v42  ;;  %5539 = vmatpush1.bf16.msra.mxu1 %v7096_v3 }
 0x9be   :  { %5509 = vmatprep.subr.bf16.mxu0 %v7101_v44  ;;  %5541 = vmatprep.subr.bf16.mxu1 %v7103_v15 }
 0x9c1   :  { %5511 = vmatpush1.bf16.msra.mxu0 %v7105_v33  ;;  %5543 = vmatpush1.bf16.msra.mxu1 %v7108_v1 }
 0x9c2   :  { %5513 = vmatprep.subr.bf16.mxu0 %v7113_v4  ;;  %5545 = vmatprep.subr.bf16.mxu1 %v7115_v18 }
 0x9c5   :  { %5515 = vmatpush1.bf16.msra.mxu0 %v7117_v25  ;;  %5547 = vmatpush1.bf16.msra.mxu1 %v7120_v51 }
 0x9c6   :  { %5517 = vmatprep.subr.bf16.mxu0 %v7125_v27  ;;  %5549 = vmatprep.subr.bf16.mxu1 %v7127_v6 }
 0x9c9   :  { %5519 = vmatpush1.bf16.msra.mxu0 %v7129_v10  ;;  %5551 = vmatpush1.bf16.msra.mxu1 %v7132_v29 }
 0x9ca   :  { %5521 = vmatprep.subr.bf16.mxu0 %v7137_v57  ;;  %5553 = vmatprep.subr.bf16.mxu1 %v7139_v40 }
 0x9cd   :  { %5523 = vmatpush1.bf16.msra.mxu0 %v7141_v58  ;;  %5555 = vmatpush1.bf16.msra.mxu1 %v7144_v63 }
 0x9ce   :  { %5525 = vmatprep.subr.bf16.mxu0 %v7149_v36  ;;  %5557 = vmatprep.subr.bf16.mxu1 %v7151_v20 }
 0x9d1   :  { %5527 = vmatpush1.bf16.msra.mxu0 %v7153_v17  ;;  %5559 = vmatpush1.bf16.msra.mxu1 %v7156_v11 }
 0x9d2   :  { %5561 = vmatprep.subr.bf16.mxu0 %v7065_v22  ;;  %5593 = vmatprep.subr.bf16.mxu1 %v7067_v60 }
 0xa87   :  { %v3115_v21 = vpop.f32.mrb[18].mxu0  ;;  %v3186_v23 = vpop.f32.mrb[18].mxu1 }
 0xa88   :  { %v5914_v56 = vadd.f32 %v3115_v21, %v7211_v46  ;;  %v3117_v48 = vpop.f32.mrb[19].mxu0  ;;  %v3188_v24 = vpop.f32.mrb[19].mxu1  ;;  %v5930_v12 = vadd.f32 %v3186_v23, %v7226_v34  ;;  %v7320_v23 = vpack.c.bf16 %v3706_v53, %v3702_v5  ;;  %v3745_v5 = vld [vmem:[#allocation11 + $0x158] sm:$0xff] }
 0xa89   :  { %v5915_v28 = vadd.f32 %v3117_v48, %v7215_v49  ;;  %v5931_v26 = vadd.f32 %v3188_v24, %v7221_v14  ;;  %v3708_v48 = vld [vmem:[#allocation11 + $0x30] sm:$0xff] }
 0xa8a   :  { %v4707_v8 = vmul.f32 -1.442695, %v5914_v56  ;;  %v3704_v56 = vld [vmem:[#allocation11 + $0x10] sm:$0xff] }
 0xa8b   :  { %v4708_v13 = vmul.f32 -1.442695, %v5915_v28  ;;  %v4709_v31 = vmul.f32 -1.442695, %v5931_v26  ;;  %v7323_v24 = vpack.c.bf16 %v3708_v48, %v3704_v56  ;;  %v3711_v28 = vld [vmem:[#allocation11 + $0x48] sm:$0xff]  ;;  %v3749_v56 = vld [vmem:[#allocation11 + $0x178] sm:$0xff] }
 0xa8c   :  { %6163 = vpow2.f32 %v4707_v8  ;;  %v3715_v8 = vld [vmem:[#allocation11 + $0x68] sm:$0xff]  ;;  %v3742_v48 = vld [vmem:[#allocation11 + $0x140] sm:$0xff] }
 0xa8d   :  { %6165 = vpow2.f32 %v4708_v13  ;;  %v3713_v13 = vld [vmem:[#allocation11 + $0x58] sm:$0xff]  ;;  %v7328_v26 = vpack.c.bf16 %v3715_v8, %v3711_v28  ;;  %v3746_v28 = vld [vmem:[#allocation11 + $0x160] sm:$0xff]  ;;  %v7378_v8 = vpack.c.bf16 %v3749_v56, %v3745_v5 }
 0xa8e   :  { %6167 = vpow2.f32 %v4709_v31  ;;  %v3717_v31 = vld [vmem:[#allocation11 + $0x78] sm:$0xff] }
 0xa8f   :  { %6169 = vtanh.f32 %v5930_v12  ;;  %v3710_v12 = vld [vmem:[#allocation11 + $0x40] sm:$0xff] }
 0xa96   :  { %v6164_v22 = vpop.eup %6163 }
 0xa97   :  { %v6166_v45 = vpop.eup %6165  ;;  %v3198_v60 = vadd.f32 1.0, %v6164_v22  ;;  %v3714_v22 = vld [vmem:[#allocation11 + $0x60] sm:$0xff] }
 0xa98   :  { %v3204_v16 = vadd.f32 1.0, %v6166_v45  ;;  %v6168_v35 = vpop.eup %6167  ;;  %v7330_v45 = vpack.c.bf16 %v3717_v31, %v3713_v13  ;;  %v7380_v13 = vpack.c.bf16 %v3746_v28, %v3742_v48  ;;  %v3744_v31 = vld [vmem:[#allocation11 + $0x150] sm:$0xff] }
 0xa99   :  { %6171 = vrcp.f32 %v3198_v60  ;;  %v6170_v19 = vpop.eup %6169  ;;  %v3211_v41 = vadd.f32 1.0, %v6168_v35  ;;  %v7332_v60 = vpack.c.bf16 %v3714_v22, %v3710_v12  ;;  %v3716_v35 = vld [vmem:[#allocation11 + $0x70] sm:$0xff]  ;;  %v3751_v22 = vld [vmem:[#allocation11 + $0x188] sm:$0xff] }
 0xa9a   :  { %6173 = vrcp.f32 %v3204_v16  ;;  %v3712_v16 = vld [vmem:[#allocation11 + $0x50] sm:$0xff] }
 0xa9b   :  { %6175 = vrcp.f32 %v3211_v41  ;;  %v3748_v12 = vld [vmem:[#allocation11 + $0x170] sm:$0xff] }
 0xaa3   :  { %v6172_v38 = vpop.eup %6171 }
 0xaa4   :  { %v6174_v37 = vpop.eup %6173  ;;  %v3215_v9 = vmul.f32 %v6172_v38, %v6170_v19  ;;  %v7335_v19 = vpack.c.bf16 %v3716_v35, %v3712_v16  ;;  %v3719_v38 = vld [vmem:[#allocation11 + $0x88] sm:$0xff]  ;;  %v7383_v16 = vpack.c.bf16 %v3748_v12, %v3744_v31 }
 0xaa5   :  { %v3214_v54 = vmul.f32 %v6174_v37, %v7229_v55  ;;  %v6176_v52 = vpop.eup %6175  ;;  %v3709_v55 = vld [vmem:[#allocation11 + $0x38] sm:$0xff]  ;;  %v3723_v37 = vld [vmem:[#allocation11 + $0xa8] sm:$0xff] }
 0xaa6   :  { %v7340_v41 = vpack.c.bf16 %v3723_v37, %v3719_v38  ;;  %v3755_v35 = vld [vmem:[#allocation11 + $0x1a8] sm:$0xff]  ;;  %v3753_v38 = vld [vmem:[#allocation11 + $0x198] sm:$0xff] }
 0xaa7   :  { %v7271_v2 = vadd.f32 %v3215_v9, %v3214_v54  ;;  %v3721_v9 = vld [vmem:[#allocation11 + $0x98] sm:$0xff] }
 0xaa8   :  { %v3725_v54 = vld [vmem:[#allocation11 + $0xb8] sm:$0xff] }
 0xaa9   :  { %6177 = vtanh.f32 %v7271_v2  ;;  %v3757_v37 = vld [vmem:[#allocation11 + $0x1b8] sm:$0xff] }
 0xab3   :  { %v6178_v30 = vpop.eup %6177 }
 0xab4   :  { %v3218_v59 = vmul.f32 %v6178_v30, %v6176_v52  ;;  %v3722_v52 = vld [vmem:[#allocation11 + $0xa0] sm:$0xff]  ;;  %v7342_v30 = vpack.c.bf16 %v3725_v54, %v3721_v9  ;;  %v7386_v9 = vpack.c.bf16 %v3755_v35, %v3751_v22  ;;  %v7388_v54 = vpack.c.bf16 %v3757_v37, %v3753_v38 }
 0xab6   :  { %3219 = vst [vmem:[#allocation12 + $0x8] sm:$0xff] %v3218_v59  ;;  %3353 = vmatmul.mubr.f32.vlgmr.msra.gmra.mrb[20].mxu0 %v3218_v59  ;;  %3424 = vmatmul.mubr.f32.vlgmr.msra.gmra.mrb[20].mxu1 %v3218_v59 }
 0xab7   :  { %5563 = vmatpush1.bf16.msra.mxu0 %v7069_v43  ;;  %5595 = vmatpush1.bf16.msra.mxu1 %v7072_v62 }
 0xab8   :  { %5565 = vmatprep.subr.bf16.mxu0 %v7077_v39  ;;  %5597 = vmatprep.subr.bf16.mxu1 %v7079_v61 }
 0xab9   :  { %3591 = vmatprep.mubr.f32.mxu0 %v6424_v0  ;;  %3662 = vmatprep.mubr.f32.mxu1 %v6424_v0 }
 0xabb   :  { %5567 = vmatpush1.bf16.msra.mxu0 %v7081_v7  ;;  %5599 = vmatpush1.bf16.msra.mxu1 %v7084_v47 }
 0xabc   :  { %5569 = vmatprep.subr.bf16.mxu0 %v7089_v32  ;;  %5601 = vmatprep.subr.bf16.mxu1 %v7091_v50 }
 0xabf   :  { %5571 = vmatpush1.bf16.msra.mxu0 %v7093_v42  ;;  %5603 = vmatpush1.bf16.msra.mxu1 %v7096_v3 }
 0xac0   :  { %5573 = vmatprep.subr.bf16.mxu0 %v7101_v44  ;;  %5605 = vmatprep.subr.bf16.mxu1 %v7103_v15 }
 0xac3   :  { %5575 = vmatpush1.bf16.msra.mxu0 %v7105_v33  ;;  %5607 = vmatpush1.bf16.msra.mxu1 %v7108_v1 }
 0xac4   :  { %5577 = vmatprep.subr.bf16.mxu0 %v7113_v4  ;;  %5609 = vmatprep.subr.bf16.mxu1 %v7115_v18 }
 0xac7   :  { %5579 = vmatpush1.bf16.msra.mxu0 %v7117_v25  ;;  %5611 = vmatpush1.bf16.msra.mxu1 %v7120_v51 }
 0xac8   :  { %5581 = vmatprep.subr.bf16.mxu0 %v7125_v27  ;;  %5613 = vmatprep.subr.bf16.mxu1 %v7127_v6 }
 0xacb   :  { %5583 = vmatpush1.bf16.msra.mxu0 %v7129_v10  ;;  %5615 = vmatpush1.bf16.msra.mxu1 %v7132_v29 }
 0xacc   :  { %5585 = vmatprep.subr.bf16.mxu0 %v7137_v57  ;;  %5617 = vmatprep.subr.bf16.mxu1 %v7139_v40 }
 0xacf   :  { %5587 = vmatpush1.bf16.msra.mxu0 %v7141_v58  ;;  %5619 = vmatpush1.bf16.msra.mxu1 %v7144_v63 }
 0xad0   :  { %5589 = vmatprep.subr.bf16.mxu0 %v7149_v36  ;;  %5621 = vmatprep.subr.bf16.mxu1 %v7151_v20  ;;  %v3703_v36 = vld [vmem:[#allocation11 + $0x8] sm:$0xff] }
 0xad1   :  { %v3707_v20 = vld [vmem:[#allocation11 + $0x28] sm:$0xff] }
 0xad3   :  { %5591 = vmatpush1.bf16.msra.mxu0 %v7153_v17  ;;  %5623 = vmatpush1.bf16.msra.mxu1 %v7156_v11  ;;  %v3705_v17 = vld [vmem:[#allocation11 + $0x18] sm:$0xff]  ;;  %v7316_v11 = vpack.c.bf16 %v3707_v20, %v3703_v36  ;;  %v3740_v36 = vld [vmem:[#allocation11 + $0x130] sm:$0xff] }
 0xad4   :  { %v7318_v21 = vpack.c.bf16 %v3709_v55, %v3705_v17  ;;  %v3743_v17 = vld [vmem:[#allocation11 + $0x148] sm:$0xff] }
 0xad5   :  { %5625 = vmatprep.subr.bf16.mxu0 %v7316_v11  ;;  %v3747_v55 = vld [vmem:[#allocation11 + $0x168] sm:$0xff] }
 0xad6   :  { %5657 = vmatprep.subr.bf16.mxu1 %v7318_v21  ;;  %v7375_v53 = vpack.c.bf16 %v3747_v55, %v3743_v17 }
 0xb89   :  { %v3354_v43 = vpop.f32.mrb[20].mxu0  ;;  %v3425_v62 = vpop.f32.mrb[20].mxu1 }
 0xb8a   :  { %v5916_v39 = vadd.f32 %v3354_v43, %v7211_v46  ;;  %v3356_v61 = vpop.f32.mrb[21].mxu0  ;;  %v3427_v7 = vpop.f32.mrb[21].mxu1  ;;  %v5932_v44 = vadd.f32 %v3425_v62, %v7226_v34  ;;  %v3720_v43 = vld [vmem:[#allocation11 + $0x90] sm:$0xff] }
 0xb8b   :  { %v5917_v47 = vadd.f32 %v3356_v61, %v7215_v49  ;;  %v5933_v42 = vadd.f32 %v3427_v7, %v7221_v14  ;;  %v3724_v62 = vld [vmem:[#allocation11 + $0xb0] sm:$0xff]  ;;  %v3727_v61 = vld [vmem:[#allocation11 + $0xc8] sm:$0xff] }
 0xb8c   :  { %v4710_v32 = vmul.f32 -1.442695, %v5916_v39  ;;  %v7347_v39 = vpack.c.bf16 %v3724_v62, %v3720_v43  ;;  %v3731_v7 = vld [vmem:[#allocation11 + $0xe8] sm:$0xff]  ;;  %v3752_v43 = vld [vmem:[#allocation11 + $0x190] sm:$0xff] }
 0xb8d   :  { %v4711_v50 = vmul.f32 -1.442695, %v5917_v47  ;;  %v4712_v3 = vmul.f32 -1.442695, %v5933_v42  ;;  %v3729_v47 = vld [vmem:[#allocation11 + $0xd8] sm:$0xff]  ;;  %v3726_v42 = vld [vmem:[#allocation11 + $0xc0] sm:$0xff] }
 0xb8e   :  { %6179 = vpow2.f32 %v4710_v32  ;;  %v7352_v32 = vpack.c.bf16 %v3731_v7, %v3727_v61  ;;  %v3756_v61 = vld [vmem:[#allocation11 + $0x1b0] sm:$0xff]  ;;  %v3759_v7 = vld [vmem:[#allocation11 + $0x1c8] sm:$0xff] }
 0xb8f   :  { %6181 = vpow2.f32 %v4711_v50  ;;  %v3733_v50 = vld [vmem:[#allocation11 + $0xf8] sm:$0xff] }
 0xb90   :  { %6183 = vpow2.f32 %v4712_v3  ;;  %v3730_v3 = vld [vmem:[#allocation11 + $0xe0] sm:$0xff] }
 0xb91   :  { %6185 = vtanh.f32 %v5932_v44  ;;  %v7354_v44 = vpack.c.bf16 %v3733_v50, %v3729_v47  ;;  %v3763_v47 = vld [vmem:[#allocation11 + $0x1e8] sm:$0xff]  ;;  %v7395_v50 = vpack.c.bf16 %v3756_v61, %v3752_v43 }
 0xb98   :  { %v6180_v15 = vpop.eup %6179 }
 0xb99   :  { %v6182_v33 = vpop.eup %6181  ;;  %v3437_v1 = vadd.f32 1.0, %v6180_v15  ;;  %v7356_v15 = vpack.c.bf16 %v3730_v3, %v3726_v42  ;;  %v7397_v42 = vpack.c.bf16 %v3763_v47, %v3759_v7  ;;  %v3761_v3 = vld [vmem:[#allocation11 + $0x1d8] sm:$0xff] }
 0xb9a   :  { %v3443_v4 = vadd.f32 1.0, %v6182_v33  ;;  %v6184_v18 = vpop.eup %6183  ;;  %v3728_v33 = vld [vmem:[#allocation11 + $0xd0] sm:$0xff] }
 0xb9b   :  { %6187 = vrcp.f32 %v3437_v1  ;;  %v6186_v25 = vpop.eup %6185  ;;  %v3450_v10 = vadd.f32 1.0, %v6184_v18  ;;  %v3732_v1 = vld [vmem:[#allocation11 + $0xf0] sm:$0xff]  ;;  %v3735_v18 = vld [vmem:[#allocation11 + $0x108] sm:$0xff] }
 0xb9c   :  { %6189 = vrcp.f32 %v3443_v4  ;;  %v7359_v4 = vpack.c.bf16 %v3732_v1, %v3728_v33  ;;  %v3765_v33 = vld [vmem:[#allocation11 + $0x1f8] sm:$0xff]  ;;  %v3758_v1 = vld [vmem:[#allocation11 + $0x1c0] sm:$0xff] }
 0xb9d   :  { %6191 = vrcp.f32 %v3450_v10  ;;  %v3734_v10 = vld [vmem:[#allocation11 + $0x100] sm:$0xff] }
 0xba5   :  { %v6188_v51 = vpop.eup %6187 }
 0xba6   :  { %v6190_v27 = vpop.eup %6189  ;;  %v3454_v6 = vmul.f32 %v6188_v51, %v6186_v25  ;;  %v3739_v25 = vld [vmem:[#allocation11 + $0x128] sm:$0xff]  ;;  %v3737_v51 = vld [vmem:[#allocation11 + $0x118] sm:$0xff] }
 0xba7   :  { %v3453_v29 = vmul.f32 %v6190_v27, %v7271_v2  ;;  %v6192_v40 = vpop.eup %6191  ;;  %v3718_v2 = vld [vmem:[#allocation11 + $0x80] sm:$0xff]  ;;  %v7364_v27 = vpack.c.bf16 %v3739_v25, %v3735_v18  ;;  %v7400_v18 = vpack.c.bf16 %v3765_v33, %v3761_v3 }
 0xba8   :  { %v7344_v59 = vpack.c.bf16 %v3722_v52, %v3718_v2  ;;  %v3750_v2 = vld [vmem:[#allocation11 + $0x180] sm:$0xff] }
 0xba9   :  { %v7311_v57 = vadd.f32 %v3454_v6, %v3453_v29  ;;  %v3741_v6 = vld [vmem:[#allocation11 + $0x138] sm:$0xff]  ;;  %v3738_v29 = vld [vmem:[#allocation11 + $0x120] sm:$0xff] }
 0xbaa   :  { %v3754_v52 = vld [vmem:[#allocation11 + $0x1a0] sm:$0xff] }
 0xbab   :  { %6193 = vtanh.f32 %v7311_v57  ;;  %v7391_v62 = vpack.c.bf16 %v3754_v52, %v3750_v2  ;;  %v3762_v25 = vld [vmem:[#allocation11 + $0x1e0] sm:$0xff] }
 0xbb5   :  { %v6194_v58 = vpop.eup %6193 }
 0xbb6   :  { %v3457_v63 = vmul.f32 %v6194_v58, %v6192_v40  ;;  %v7366_v40 = vpack.c.bf16 %v3741_v6, %v3737_v51  ;;  %v7368_v58 = vpack.c.bf16 %v3738_v29, %v3734_v10  ;;  %v3760_v51 = vld [vmem:[#allocation11 + $0x1d0] sm:$0xff]  ;;  %v7403_v10 = vpack.c.bf16 %v3762_v25, %v3758_v1 }
 0xbb7   :  { %v3764_v6 = vld [vmem:[#allocation11 + $0x1f0] sm:$0xff] }
 0xbb8   :  { %3458 = vst [vmem:[#allocation12 + $0x10] sm:$0xff] %v3457_v63  ;;  %3592 = vmatmul.mubr.f32.vlgmr.msra.gmra.mrb[22].mxu0 %v3457_v63  ;;  %3663 = vmatmul.mubr.f32.vlgmr.msra.gmra.mrb[22].mxu1 %v3457_v63  ;;  %v3736_v63 = vld [vmem:[#allocation11 + $0x110] sm:$0xff]  ;;  %v7407_v29 = vpack.c.bf16 %v3764_v6, %v3760_v51 }
 0xbb9   :  { %3830 = vmatprep.mubr.f32.mxu0 %v6424_v0  ;;  %3901 = vmatprep.mubr.f32.mxu1 %v6424_v0  ;;  %v7371_v20 = vpack.c.bf16 %v3740_v36, %v3736_v63 }
 0xbba   :  { %5627 = vmatpush1.bf16.msra.mxu0 %v7320_v23  ;;  %5659 = vmatpush1.bf16.msra.mxu1 %v7323_v24 }
 0xbbb   :  { %5629 = vmatprep.subr.bf16.mxu0 %v7328_v26  ;;  %5661 = vmatprep.subr.bf16.mxu1 %v7330_v45 }
 0xbbe   :  { %5631 = vmatpush1.bf16.msra.mxu0 %v7332_v60  ;;  %5663 = vmatpush1.bf16.msra.mxu1 %v7335_v19 }
 0xbbf   :  { %5633 = vmatprep.subr.bf16.mxu0 %v7340_v41  ;;  %5665 = vmatprep.subr.bf16.mxu1 %v7342_v30 }
 0xbc2   :  { %5635 = vmatpush1.bf16.msra.mxu0 %v7344_v59  ;;  %5667 = vmatpush1.bf16.msra.mxu1 %v7347_v39 }
 0xbc3   :  { %5637 = vmatprep.subr.bf16.mxu0 %v7352_v32  ;;  %5669 = vmatprep.subr.bf16.mxu1 %v7354_v44 }
 0xbc6   :  { %5639 = vmatpush1.bf16.msra.mxu0 %v7356_v15  ;;  %5671 = vmatpush1.bf16.msra.mxu1 %v7359_v4 }
 0xbc7   :  { %5641 = vmatprep.subr.bf16.mxu0 %v7364_v27  ;;  %5673 = vmatprep.subr.bf16.mxu1 %v7366_v40 }
 0xbca   :  { %5643 = vmatpush1.bf16.msra.mxu0 %v7368_v58  ;;  %5675 = vmatpush1.bf16.msra.mxu1 %v7371_v20 }
 0xbcb   :  { %5645 = vmatprep.subr.bf16.mxu0 %v7375_v53  ;;  %5677 = vmatprep.subr.bf16.mxu1 %v7378_v8 }
 0xbce   :  { %5647 = vmatpush1.bf16.msra.mxu0 %v7380_v13  ;;  %5679 = vmatpush1.bf16.msra.mxu1 %v7383_v16 }
 0xbcf   :  { %5649 = vmatprep.subr.bf16.mxu0 %v7386_v9  ;;  %5681 = vmatprep.subr.bf16.mxu1 %v7388_v54 }
 0xbd2   :  { %5651 = vmatpush1.bf16.msra.mxu0 %v7391_v62  ;;  %5683 = vmatpush1.bf16.msra.mxu1 %v7395_v50 }
 0xbd3   :  { %5653 = vmatprep.subr.bf16.mxu0 %v7397_v42  ;;  %5685 = vmatprep.subr.bf16.mxu1 %v7400_v18 }
 0xbd6   :  { %5655 = vmatpush1.bf16.msra.mxu0 %v7403_v10  ;;  %5687 = vmatpush1.bf16.msra.mxu1 %v7407_v29 }
 0xbd7   :  { %5689 = vmatprep.subr.bf16.mxu0 %v7316_v11  ;;  %5721 = vmatprep.subr.bf16.mxu1 %v7318_v21 }
 0xc8b   :  { %v3593_v63 = vpop.f32.mrb[22].mxu0  ;;  %v3664_v36 = vpop.f32.mrb[22].mxu1 }
 0xc8c   :  { %v5918_v17 = vadd.f32 %v3593_v63, %v7211_v46  ;;  %v3595_v55 = vpop.f32.mrb[23].mxu0  ;;  %v3666_v5 = vpop.f32.mrb[23].mxu1  ;;  %v5934_v22 = vadd.f32 %v3664_v36, %v7226_v34 }
 0xc8d   :  { %v5919_v56 = vadd.f32 %v3595_v55, %v7215_v49  ;;  %v5935_v31 = vadd.f32 %v3666_v5, %v7221_v14 }
 0xc8e   :  { %v4713_v48 = vmul.f32 -1.442695, %v5918_v17 }
 0xc8f   :  { %v4714_v28 = vmul.f32 -1.442695, %v5919_v56  ;;  %v4715_v12 = vmul.f32 -1.442695, %v5935_v31 }
 0xc90   :  { %6195 = vpow2.f32 %v4713_v48 }
 0xc91   :  { %6197 = vpow2.f32 %v4714_v28 }
 0xc92   :  { %6199 = vpow2.f32 %v4715_v12 }
 0xc93   :  { %6201 = vtanh.f32 %v5934_v22 }
 0xc9a   :  { %v6196_v35 = vpop.eup %6195 }
 0xc9b   :  { %v6198_v38 = vpop.eup %6197  ;;  %v3676_v37 = vadd.f32 1.0, %v6196_v35 }
 0xc9c   :  { %v3682_v2 = vadd.f32 1.0, %v6198_v38  ;;  %v6200_v52 = vpop.eup %6199 }
 0xc9d   :  { %6203 = vrcp.f32 %v3676_v37  ;;  %v6202_v43 = vpop.eup %6201  ;;  %v3689_v3 = vadd.f32 1.0, %v6200_v52 }
 0xc9e   :  { %6205 = vrcp.f32 %v3682_v2 }
 0xc9f   :  { %6207 = vrcp.f32 %v3689_v3 }
 0xca7   :  { %v6204_v61 = vpop.eup %6203 }
 0xca8   :  { %v6206_v7 = vpop.eup %6205  ;;  %v3693_v47 = vmul.f32 %v6204_v61, %v6202_v43 }
 0xca9   :  { %v3692_v33 = vmul.f32 %v6206_v7, %v7311_v57  ;;  %v6208_v25 = vpop.eup %6207 }
 0xcab   :  { %v7419_v1 = vadd.f32 %v3693_v47, %v3692_v33 }
 0xcad   :  { %6209 = vtanh.f32 %v7419_v1 }
 0xcb7   :  { %v6210_v51 = vpop.eup %6209 }
 0xcb8   :  { %v3696_v6 = vmul.f32 %v6210_v51, %v6208_v25 }
 0xcba   :  { %3697 = vst [vmem:[#allocation12 + $0x18] sm:$0xff] %v3696_v6  ;;  %3831 = vmatmul.mubr.f32.vlgmr.msra.gmra.mrb[24].mxu0 %v3696_v6  ;;  %3902 = vmatmul.mubr.f32.vlgmr.msra.gmra.mrb[24].mxu1 %v3696_v6 }
 0xcbb   :  { %5691 = vmatpush1.bf16.msra.mxu0 %v7320_v23  ;;  %5723 = vmatpush1.bf16.msra.mxu1 %v7323_v24 }
 0xcbc   :  { %5693 = vmatprep.subr.bf16.mxu0 %v7328_v26  ;;  %5725 = vmatprep.subr.bf16.mxu1 %v7330_v45 }
 0xcbd   :  { %4069 = vmatprep.mubr.f32.mxu0 %v6424_v0  ;;  %4140 = vmatprep.mubr.f32.mxu1 %v6424_v0 }
 0xcbf   :  { %5695 = vmatpush1.bf16.msra.mxu0 %v7332_v60  ;;  %5727 = vmatpush1.bf16.msra.mxu1 %v7335_v19 }
 0xcc0   :  { %5697 = vmatprep.subr.bf16.mxu0 %v7340_v41  ;;  %5729 = vmatprep.subr.bf16.mxu1 %v7342_v30 }
 0xcc3   :  { %5699 = vmatpush1.bf16.msra.mxu0 %v7344_v59  ;;  %5731 = vmatpush1.bf16.msra.mxu1 %v7347_v39 }
 0xcc4   :  { %5701 = vmatprep.subr.bf16.mxu0 %v7352_v32  ;;  %5733 = vmatprep.subr.bf16.mxu1 %v7354_v44 }
 0xcc7   :  { %5703 = vmatpush1.bf16.msra.mxu0 %v7356_v15  ;;  %5735 = vmatpush1.bf16.msra.mxu1 %v7359_v4 }
 0xcc8   :  { %5705 = vmatprep.subr.bf16.mxu0 %v7364_v27  ;;  %5737 = vmatprep.subr.bf16.mxu1 %v7366_v40 }
 0xccb   :  { %5707 = vmatpush1.bf16.msra.mxu0 %v7368_v58  ;;  %5739 = vmatpush1.bf16.msra.mxu1 %v7371_v20 }
 0xccc   :  { %5709 = vmatprep.subr.bf16.mxu0 %v7375_v53  ;;  %5741 = vmatprep.subr.bf16.mxu1 %v7378_v8 }
 0xccf   :  { %5711 = vmatpush1.bf16.msra.mxu0 %v7380_v13  ;;  %5743 = vmatpush1.bf16.msra.mxu1 %v7383_v16 }
 0xcd0   :  { %5713 = vmatprep.subr.bf16.mxu0 %v7386_v9  ;;  %5745 = vmatprep.subr.bf16.mxu1 %v7388_v54 }
 0xcd3   :  { %5715 = vmatpush1.bf16.msra.mxu0 %v7391_v62  ;;  %5747 = vmatpush1.bf16.msra.mxu1 %v7395_v50 }
 0xcd4   :  { %5717 = vmatprep.subr.bf16.mxu0 %v7397_v42  ;;  %5749 = vmatprep.subr.bf16.mxu1 %v7400_v18 }
 0xcd7   :  { %5719 = vmatpush1.bf16.msra.mxu0 %v7403_v10  ;;  %5751 = vmatpush1.bf16.msra.mxu1 %v7407_v29 }
 0xcd8   :  { %5753 = vmatprep.subr.bf16.mxu0 %v7316_v11  ;;  %5785 = vmatprep.subr.bf16.mxu1 %v7318_v21 }
 0xd8d   :  { %v3832_v57 = vpop.f32.mrb[24].mxu0  ;;  %v3903_v63 = vpop.f32.mrb[24].mxu1 }
 0xd8e   :  { %v5920_v36 = vadd.f32 %v3832_v57, %v7211_v46  ;;  %v3834_v17 = vpop.f32.mrb[25].mxu0  ;;  %v3905_v55 = vpop.f32.mrb[25].mxu1  ;;  %v5936_v12 = vadd.f32 %v3903_v63, %v7226_v34 }
 0xd8f   :  { %v5921_v5 = vadd.f32 %v3834_v17, %v7215_v49  ;;  %v5937_v28 = vadd.f32 %v3905_v55, %v7221_v14 }
 0xd90   :  { %v4716_v56 = vmul.f32 -1.442695, %v5920_v36 }
 0xd91   :  { %v4717_v48 = vmul.f32 -1.442695, %v5921_v5  ;;  %v4718_v31 = vmul.f32 -1.442695, %v5937_v28 }
 0xd92   :  { %6211 = vpow2.f32 %v4716_v56 }
 0xd93   :  { %6213 = vpow2.f32 %v4717_v48 }
 0xd94   :  { %6215 = vpow2.f32 %v4718_v31 }
 0xd95   :  { %6217 = vtanh.f32 %v5936_v12 }
 0xd9c   :  { %v6212_v22 = vpop.eup %6211 }
 0xd9d   :  { %v6214_v35 = vpop.eup %6213  ;;  %v3915_v38 = vadd.f32 1.0, %v6212_v22 }
 0xd9e   :  { %v3921_v37 = vadd.f32 1.0, %v6214_v35  ;;  %v6216_v2 = vpop.eup %6215 }
 0xd9f   :  { %6219 = vrcp.f32 %v3915_v38  ;;  %v6218_v52 = vpop.eup %6217  ;;  %v3928_v47 = vadd.f32 1.0, %v6216_v2 }
 0xda0   :  { %6221 = vrcp.f32 %v3921_v37 }
 0xda1   :  { %6223 = vrcp.f32 %v3928_v47 }
 0xda9   :  { %v6220_v43 = vpop.eup %6219 }
 0xdaa   :  { %v6222_v61 = vpop.eup %6221  ;;  %v3932_v7 = vmul.f32 %v6220_v43, %v6218_v52 }
 0xdab   :  { %v3931_v3 = vmul.f32 %v6222_v61, %v7419_v1  ;;  %v6224_v25 = vpop.eup %6223 }
 0xdad   :  { %v7461_v33 = vadd.f32 %v3932_v7, %v3931_v3 }
 0xdaf   :  { %6225 = vtanh.f32 %v7461_v33 }
 0xdb9   :  { %v6226_v51 = vpop.eup %6225 }
 0xdba   :  { %v3935_v6 = vmul.f32 %v6226_v51, %v6224_v25 }
 0xdbc   :  { %3936 = vst [vmem:[#allocation12 + $0x20] sm:$0xff] %v3935_v6  ;;  %4070 = vmatmul.mubr.f32.vlgmr.msra.gmra.mrb[26].mxu0 %v3935_v6  ;;  %4141 = vmatmul.mubr.f32.vlgmr.msra.gmra.mrb[26].mxu1 %v3935_v6 }
 0xdbd   :  { %5755 = vmatpush1.bf16.msra.mxu0 %v7320_v23  ;;  %5787 = vmatpush1.bf16.msra.mxu1 %v7323_v24 }
 0xdbe   :  { %5757 = vmatprep.subr.bf16.mxu0 %v7328_v26  ;;  %5789 = vmatprep.subr.bf16.mxu1 %v7330_v45 }
 0xdbf   :  { %4308 = vmatprep.mubr.f32.mxu0 %v6424_v0  ;;  %4379 = vmatprep.mubr.f32.mxu1 %v6424_v0 }
 0xdc1   :  { %5759 = vmatpush1.bf16.msra.mxu0 %v7332_v60  ;;  %5791 = vmatpush1.bf16.msra.mxu1 %v7335_v19 }
 0xdc2   :  { %5761 = vmatprep.subr.bf16.mxu0 %v7340_v41  ;;  %5793 = vmatprep.subr.bf16.mxu1 %v7342_v30 }
 0xdc5   :  { %5763 = vmatpush1.bf16.msra.mxu0 %v7344_v59  ;;  %5795 = vmatpush1.bf16.msra.mxu1 %v7347_v39 }
 0xdc6   :  { %5765 = vmatprep.subr.bf16.mxu0 %v7352_v32  ;;  %5797 = vmatprep.subr.bf16.mxu1 %v7354_v44 }
 0xdc9   :  { %5767 = vmatpush1.bf16.msra.mxu0 %v7356_v15  ;;  %5799 = vmatpush1.bf16.msra.mxu1 %v7359_v4 }
 0xdca   :  { %5769 = vmatprep.subr.bf16.mxu0 %v7364_v27  ;;  %5801 = vmatprep.subr.bf16.mxu1 %v7366_v40 }
 0xdcd   :  { %5771 = vmatpush1.bf16.msra.mxu0 %v7368_v58  ;;  %5803 = vmatpush1.bf16.msra.mxu1 %v7371_v20 }
 0xdce   :  { %5773 = vmatprep.subr.bf16.mxu0 %v7375_v53  ;;  %5805 = vmatprep.subr.bf16.mxu1 %v7378_v8 }
 0xdd1   :  { %5775 = vmatpush1.bf16.msra.mxu0 %v7380_v13  ;;  %5807 = vmatpush1.bf16.msra.mxu1 %v7383_v16 }
 0xdd2   :  { %5777 = vmatprep.subr.bf16.mxu0 %v7386_v9  ;;  %5809 = vmatprep.subr.bf16.mxu1 %v7388_v54 }
 0xdd5   :  { %5779 = vmatpush1.bf16.msra.mxu0 %v7391_v62  ;;  %5811 = vmatpush1.bf16.msra.mxu1 %v7395_v50 }
 0xdd6   :  { %5781 = vmatprep.subr.bf16.mxu0 %v7397_v42  ;;  %5813 = vmatprep.subr.bf16.mxu1 %v7400_v18 }
 0xdd9   :  { %5783 = vmatpush1.bf16.msra.mxu0 %v7403_v10  ;;  %5815 = vmatpush1.bf16.msra.mxu1 %v7407_v29 }
 0xdda   :  { %5817 = vmatprep.subr.bf16.mxu0 %v7316_v11  ;;  %5849 = vmatprep.subr.bf16.mxu1 %v7318_v21 }
 0xe8f   :  { %v4071_v1 = vpop.f32.mrb[26].mxu0  ;;  %v4142_v57 = vpop.f32.mrb[26].mxu1 }
 0xe90   :  { %v5922_v63 = vadd.f32 %v4071_v1, %v7211_v46  ;;  %v4073_v36 = vpop.f32.mrb[27].mxu0  ;;  %v4144_v17 = vpop.f32.mrb[27].mxu1  ;;  %v5938_v31 = vadd.f32 %v4142_v57, %v7226_v34 }
 0xe91   :  { %v5923_v55 = vadd.f32 %v4073_v36, %v7215_v49  ;;  %v5939_v48 = vadd.f32 %v4144_v17, %v7221_v14 }
 0xe92   :  { %v4719_v5 = vmul.f32 -1.442695, %v5922_v63 }
 0xe93   :  { %v4720_v56 = vmul.f32 -1.442695, %v5923_v55  ;;  %v4721_v28 = vmul.f32 -1.442695, %v5939_v48 }
 0xe94   :  { %6227 = vpow2.f32 %v4719_v5 }
 0xe95   :  { %6229 = vpow2.f32 %v4720_v56 }
 0xe96   :  { %6231 = vpow2.f32 %v4721_v28 }
 0xe97   :  { %6233 = vtanh.f32 %v5938_v31 }
 0xe9e   :  { %v6228_v11 = vpop.eup %6227 }
 0xe9f   :  { %v6230_v12 = vpop.eup %6229  ;;  %v4154_v21 = vadd.f32 1.0, %v6228_v11 }
 0xea0   :  { %v4160_v22 = vadd.f32 1.0, %v6230_v12  ;;  %v6232_v35 = vpop.eup %6231 }
 0xea1   :  { %6235 = vrcp.f32 %v4154_v21  ;;  %v6234_v38 = vpop.eup %6233  ;;  %v4167_v43 = vadd.f32 1.0, %v6232_v35 }
 0xea2   :  { %6237 = vrcp.f32 %v4160_v22 }
 0xea3   :  { %6239 = vrcp.f32 %v4167_v43 }
 0xeab   :  { %v6236_v37 = vpop.eup %6235 }
 0xeac   :  { %v6238_v2 = vpop.eup %6237  ;;  %v4171_v52 = vmul.f32 %v6236_v37, %v6234_v38 }
 0xead   :  { %v4170_v61 = vmul.f32 %v6238_v2, %v7461_v33  ;;  %v6240_v47 = vpop.eup %6239 }
 0xeaf   :  { %v7503_v7 = vadd.f32 %v4171_v52, %v4170_v61 }
 0xeb1   :  { %6241 = vtanh.f32 %v7503_v7 }
 0xebb   :  { %v6242_v3 = vpop.eup %6241 }
 0xebc   :  { %v4174_v25 = vmul.f32 %v6242_v3, %v6240_v47 }
 0xebe   :  { %4175 = vst [vmem:[#allocation12 + $0x28] sm:$0xff] %v4174_v25  ;;  %4309 = vmatmul.mubr.f32.vlgmr.msra.gmra.mrb[28].mxu0 %v4174_v25  ;;  %4380 = vmatmul.mubr.f32.vlgmr.msra.gmra.mrb[28].mxu1 %v4174_v25 }
 0xebf   :  { %5819 = vmatpush1.bf16.msra.mxu0 %v7320_v23  ;;  %5851 = vmatpush1.bf16.msra.mxu1 %v7323_v24 }
 0xec0   :  { %5821 = vmatprep.subr.bf16.mxu0 %v7328_v26  ;;  %5853 = vmatprep.subr.bf16.mxu1 %v7330_v45 }
 0xec1   :  { %4547 = vmatprep.mubr.f32.mxu0 %v6424_v0  ;;  %4618 = vmatprep.mubr.f32.mxu1 %v6424_v0 }
 0xec3   :  { %5823 = vmatpush1.bf16.msra.mxu0 %v7332_v60  ;;  %5855 = vmatpush1.bf16.msra.mxu1 %v7335_v19 }
 0xec4   :  { %5825 = vmatprep.subr.bf16.mxu0 %v7340_v41  ;;  %5857 = vmatprep.subr.bf16.mxu1 %v7342_v30 }
 0xec7   :  { %5827 = vmatpush1.bf16.msra.mxu0 %v7344_v59  ;;  %5859 = vmatpush1.bf16.msra.mxu1 %v7347_v39 }
 0xec8   :  { %5829 = vmatprep.subr.bf16.mxu0 %v7352_v32  ;;  %5861 = vmatprep.subr.bf16.mxu1 %v7354_v44 }
 0xecb   :  { %5831 = vmatpush1.bf16.msra.mxu0 %v7356_v15  ;;  %5863 = vmatpush1.bf16.msra.mxu1 %v7359_v4 }
 0xecc   :  { %5833 = vmatprep.subr.bf16.mxu0 %v7364_v27  ;;  %5865 = vmatprep.subr.bf16.mxu1 %v7366_v40 }
 0xecf   :  { %5835 = vmatpush1.bf16.msra.mxu0 %v7368_v58  ;;  %5867 = vmatpush1.bf16.msra.mxu1 %v7371_v20 }
 0xed0   :  { %5837 = vmatprep.subr.bf16.mxu0 %v7375_v53  ;;  %5869 = vmatprep.subr.bf16.mxu1 %v7378_v8 }
 0xed3   :  { %5839 = vmatpush1.bf16.msra.mxu0 %v7380_v13  ;;  %5871 = vmatpush1.bf16.msra.mxu1 %v7383_v16 }
 0xed4   :  { %5841 = vmatprep.subr.bf16.mxu0 %v7386_v9  ;;  %5873 = vmatprep.subr.bf16.mxu1 %v7388_v54 }
 0xed7   :  { %5843 = vmatpush1.bf16.msra.mxu0 %v7391_v62  ;;  %5875 = vmatpush1.bf16.msra.mxu1 %v7395_v50 }
 0xed8   :  { %5845 = vmatprep.subr.bf16.mxu0 %v7397_v42  ;;  %5877 = vmatprep.subr.bf16.mxu1 %v7400_v18 }
 0xedb   :  { %5847 = vmatpush1.bf16.msra.mxu0 %v7403_v10  ;;  %5879 = vmatpush1.bf16.msra.mxu1 %v7407_v29 }
 0xf91   :  { %v4310_v0 = vpop.f32.mrb[28].mxu0  ;;  %v4381_v23 = vpop.f32.mrb[28].mxu1 }
 0xf92   :  { %v5924_v24 = vadd.f32 %v4310_v0, %v7211_v46  ;;  %v4312_v26 = vpop.f32.mrb[29].mxu0  ;;  %v4383_v45 = vpop.f32.mrb[29].mxu1  ;;  %v5940_v39 = vadd.f32 %v4381_v23, %v7226_v34 }
 0xf93   :  { %v5925_v60 = vadd.f32 %v4312_v26, %v7215_v49  ;;  %v5941_v30 = vadd.f32 %v4383_v45, %v7221_v14 }
 0xf94   :  { %v4722_v19 = vmul.f32 -1.442695, %v5924_v24 }
 0xf95   :  { %v4723_v41 = vmul.f32 -1.442695, %v5925_v60  ;;  %v4724_v59 = vmul.f32 -1.442695, %v5941_v30 }
 0xf96   :  { %6243 = vpow2.f32 %v4722_v19 }
 0xf97   :  { %6245 = vpow2.f32 %v4723_v41 }
 0xf98   :  { %6247 = vpow2.f32 %v4724_v59 }
 0xf99   :  { %6249 = vtanh.f32 %v5940_v39 }
 0xfa0   :  { %v6244_v32 = vpop.eup %6243 }
 0xfa1   :  { %v6246_v44 = vpop.eup %6245  ;;  %v4393_v15 = vadd.f32 1.0, %v6244_v32 }
 0xfa2   :  { %v4399_v4 = vadd.f32 1.0, %v6246_v44  ;;  %v6248_v27 = vpop.eup %6247 }
 0xfa3   :  { %6251 = vrcp.f32 %v4393_v15  ;;  %v6250_v40 = vpop.eup %6249  ;;  %v4406_v8 = vadd.f32 1.0, %v6248_v27 }
 0xfa4   :  { %6253 = vrcp.f32 %v4399_v4 }
 0xfa5   :  { %6255 = vrcp.f32 %v4406_v8 }
 0xfad   :  { %v6252_v58 = vpop.eup %6251 }
 0xfae   :  { %v6254_v20 = vpop.eup %6253  ;;  %v4410_v53 = vmul.f32 %v6252_v58, %v6250_v40 }
 0xfaf   :  { %v4409_v13 = vmul.f32 %v6254_v20, %v7503_v7  ;;  %v6256_v9 = vpop.eup %6255 }
 0xfb1   :  { %v4411_v16 = vadd.f32 %v4410_v53, %v4409_v13 }
 0xfb3   :  { %6257 = vtanh.f32 %v4411_v16 }
 0xfbd   :  { %v6258_v54 = vpop.eup %6257 }
 0xfbe   :  { %v4413_v62 = vmul.f32 %v6258_v54, %v6256_v9 }
 0xfc0   :  { %4414 = vst [vmem:[#allocation12 + $0x30] sm:$0xff] %v4413_v62  ;;  %4548 = vmatmul.mubr.f32.vlgmr.msra.gmra.mrb[30].mxu0 %v4413_v62  ;;  %4619 = vmatmul.mubr.f32.vlgmr.msra.gmra.mrb[30].mxu1 %v4413_v62 }
0x1093   :  { %v4549_v50 = vpop.f32.mrb[30].mxu0  ;;  %v4620_v42 = vpop.f32.mrb[30].mxu1 }
0x1094   :  { %v5926_v18 = vadd.f32 %v4549_v50, %v7211_v46  ;;  %v4551_v10 = vpop.f32.mrb[31].mxu0  ;;  %v4622_v29 = vpop.f32.mrb[31].mxu1  ;;  %v5942_v63 = vadd.f32 %v4620_v42, %v7226_v34 }
0x1095   :  { %v5927_v33 = vadd.f32 %v4551_v10, %v7215_v49  ;;  %v5943_v1 = vadd.f32 %v4622_v29, %v7221_v14 }
0x1096   :  { %v4725_v51 = vmul.f32 -1.442695, %v5926_v18 }
0x1097   :  { %v4726_v6 = vmul.f32 -1.442695, %v5927_v33  ;;  %v4727_v57 = vmul.f32 -1.442695, %v5943_v1 }
0x1098   :  { %6259 = vpow2.f32 %v4725_v51 }
0x1099   :  { %6261 = vpow2.f32 %v4726_v6 }
0x109a   :  { %6263 = vpow2.f32 %v4727_v57 }
0x109b   :  { %6265 = vtanh.f32 %v5942_v63 }
0x10a2   :  { %v6260_v36 = vpop.eup %6259 }
0x10a3   :  { %v6262_v17 = vpop.eup %6261  ;;  %v4632_v55 = vadd.f32 1.0, %v6260_v36 }
0x10a4   :  { %v4638_v5 = vadd.f32 1.0, %v6262_v17  ;;  %v6264_v46 = vpop.eup %6263 }
0x10a5   :  { %6267 = vrcp.f32 %v4632_v55  ;;  %v6266_v56 = vpop.eup %6265  ;;  %v4645_v31 = vadd.f32 1.0, %v6264_v46 }
0x10a6   :  { %6269 = vrcp.f32 %v4638_v5 }
0x10a7   :  { %6271 = vrcp.f32 %v4645_v31 }
0x10af   :  { %v6268_v49 = vpop.eup %6267 }
0x10b0   :  { %v6270_v48 = vpop.eup %6269  ;;  %v4649_v28 = vmul.f32 %v6268_v49, %v6266_v56 }
0x10b1   :  { %v4648_v11 = vmul.f32 %v6270_v48, %v4411_v16  ;;  %v6272_v14 = vpop.eup %6271 }
0x10b3   :  { %v4650_v12 = vadd.f32 %v4649_v28, %v4648_v11 }
0x10b5   :  { %6273 = vtanh.f32 %v4650_v12 }
0x10bf   :  { %v6274_v34 = vpop.eup %6273 }
0x10c0   :  { %v4652_v21 = vmul.f32 %v6274_v34, %v6272_v14 }
0x10c2   :  { %4653 = vst [vmem:[#allocation12 + $0x38] sm:$0xff] %v4652_v21 }
0x10c3   :  { %6396 = shalt.err (!%p6393_p2)
}
0x10c4   :  { %s6397_s24 = scalar_lea.hbm %s7569_s7, 1024 }
0x10c5   :  { %p6398_p3 = scmp.ne.s32.totalorder %s7569_s7, %s6397_s24  ;;  %p6401_p4 = scmp.lt.u32.totalorder %s6397_s24, %s7569_s7 }
0x10c7   :  { %p6403_p5 = pnand %p6401_p4, %p6398_p3 }
0x10c9   :  { %6406 = shalt.err (!%p6403_p5)
}
0x10ca   :  { %4665 = dma.vmem_to_hbm [thread:$0]  %s4660_s20, 1024, %s7569_s7, [#allocation5], %s6420_s4, %s6420_s4, %s6421_s15  }
0x10cb   :  { %6413 = dma.done.wait [#allocation5], 1024  }
0x10cc   :  { %6414 = vsyncadd [#allocation5], 4294966272 }
0x10cd   :  { %4669 = vsyncpa [#allocation4], 1 }
0x10ce   :  { %4670 = vsyncpa [#allocation7], 1 }
0x10cf   :  { %4671 = vsyncpa [#allocation10], 1 }
0x10d0   :  { %4672 = vsyncpa [#allocation5], 1 }

</bundles_post_ra>
